<compile_context>
chip_gen: v7x
topology: tpu7x:2x2x1
jax: 0.10.0
libtpu: 0.0.40
codegen_flags: <defaults>
</compile_context>

<pallas_src>
import math

import jax
import jax.numpy as jnp
from jax.experimental import pallas as pl
from jax.experimental.pallas import tpu as pltpu  # noqa: F401  (TPU backend module)

# ----------------------------- config (small) ------------------------------
B = 2            # batch
L = 8            # input sequence length (seq_len)
ENC_IN = 4       # configs.enc_in
D = 32           # configs.d_model
H = D            # hidden size (encoder/decoder hidden == d_model)
C_OUT = 4        # configs.c_out
PRED_LEN = 4     # configs.pred_len
LAYERS = 2       # e_layers == d_layers
FREQ = 4         # timeF feature dim (freq='h' -> 4)
G = 4 * H        # LSTM gate width (i, f, g, o) = 128 lanes (lane-dense)
F_IN = 3 * ENC_IN + FREQ   # fused embedding input width = 16

# ---- single parameter-slab row layout (all block starts 8-aligned) ----
R_ENC = 0                       # LAYERS x [w_ih (H,G); w_hh (H,G)]
R_DEC = 2 * LAYERS * H          # 128
R_BIAS = 4 * LAYERS * H         # 256: rows [b_e0, b_e1, b_d0, b_d1, pad...] (8 rows)
R_MISC = R_BIAS + 8             # 264: (H rows) lanes [w_emb | w_att_e | w_att_h | w_out]
R_VEC = R_MISC + H              # 296: row 0 lanes [v_att(0:H) | b_out(H:H+C_OUT) | 0...]
N_ROWS = R_VEC + 8              # 304


# ------------------------------ LSTM cell ----------------------------------
def _lstm_cell(pre, c_prev):
    # pre: (B, 4H), PyTorch gate order [i | f | g | o].
    # Whole-vreg sigmoid/tanh (EUP) over the 128-lane row, then static lane slices.
    # TODO(synk): gate-layout micro-experiment (item 8 of the review) intentionally skipped.
    sig = jax.nn.sigmoid(pre)
    tnh = jnp.tanh(pre)
    i_g = sig[:, 0 * H:1 * H]
    f_g = sig[:, 1 * H:2 * H]
    g_g = tnh[:, 2 * H:3 * H]
    o_g = sig[:, 3 * H:4 * H]
    c_new = f_g * c_prev + i_g * g_g
    h_new = o_g * jnp.tanh(c_new)
    return h_new, c_new


# ------------------------- single fused forward kernel ---------------------
def dalstm_kernel(x_ref, xm_ref, p_ref, pred_ref):
    f32 = jnp.float32
    dot = lambda a, b: jnp.dot(a, b, preferred_element_type=f32)

    # ---- unpack the single param slab with static ref slices (one HBM->VMEM DMA) ----
    w_ih_e = [p_ref[R_ENC + l * 2 * H: R_ENC + l * 2 * H + H, :] for l in range(LAYERS)]
    w_hh_e = [p_ref[R_ENC + l * 2 * H + H: R_ENC + (l + 1) * 2 * H, :] for l in range(LAYERS)]
    w_ih_d = [p_ref[R_DEC + l * 2 * H: R_DEC + l * 2 * H + H, :] for l in range(LAYERS)]
    w_hh_d = [p_ref[R_DEC + l * 2 * H + H: R_DEC + (l + 1) * 2 * H, :] for l in range(LAYERS)]
    b_e = [p_ref[R_BIAS + l: R_BIAS + l + 1, :] for l in range(LAYERS)]
    b_d = [p_ref[R_BIAS + LAYERS + l: R_BIAS + LAYERS + l + 1, :] for l in range(LAYERS)]
    w_emb = p_ref[R_MISC: R_MISC + F_IN, 0:D]                       # (F_IN, D)
    w_att_e = p_ref[R_MISC: R_MISC + H, H:2 * H]                    # (H, H)
    w_att_h = p_ref[R_MISC: R_MISC + H, 2 * H:3 * H]                # (H, H)
    w_out = p_ref[R_MISC: R_MISC + H, 3 * H:3 * H + C_OUT]          # (H, C_OUT)
    v_att = p_ref[R_VEC: R_VEC + 1, 0:H]                            # (1, H)
    b_out = p_ref[R_VEC: R_VEC + 1, H:H + C_OUT]                    # (1, C_OUT)

    # ---- in-kernel embedding input: circular Conv1d (k=3) as fused K=F_IN features ----
    # rows are batch-major: r = b*L + t
    prev_blks, cur_blks, next_blks, mark_blks = [], [], [], []
    for b in range(B):
        xb = x_ref[b]                                                # (L, ENC_IN)
        mb = xm_ref[b]                                               # (L, FREQ)
        prev_blks.append(jnp.concatenate([xb[L - 1:L, :], xb[:L - 1, :]], axis=0))  # x[t-1]
        next_blks.append(jnp.concatenate([xb[1:, :], xb[0:1, :]], axis=0))          # x[t+1]
        cur_blks.append(xb)
        mark_blks.append(mb)
    x_rows = jnp.concatenate(
        [jnp.concatenate(prev_blks, axis=0),
         jnp.concatenate(cur_blks, axis=0),
         jnp.concatenate(next_blks, axis=0),
         jnp.concatenate(mark_blks, axis=0)], axis=-1)               # (B*L, F_IN)

    # embedding + encoder layer-0 input projection hoisted over all timesteps
    emb = dot(x_rows, w_emb)                                         # (B*L, D)
    xproj0 = dot(emb, w_ih_e[0]) + b_e[0]                            # (B*L, G)
    # per-timestep (B, G) blocks; depend only on xproj0 -> hoistable off the recurrence chain
    xp_steps = [jnp.concatenate([xproj0[b * L + t: b * L + t + 1, :] for b in range(B)],
                                axis=0) for t in range(L)]

    h = [jnp.zeros((B, H), f32) for _ in range(LAYERS)]
    c = [jnp.zeros((B, H), f32) for _ in range(LAYERS)]

    # ---- encoder: fully-unrolled time loop, h/c carried as values (vregs) ----
    enc_steps = []
    for t in range(L):
        pre = xp_steps[t] + dot(h[0], w_hh_e[0])
        h[0], c[0] = _lstm_cell(pre, c[0])
        inp = h[0]
        for layer in range(1, LAYERS):
            # split ih/hh matmuls: no lane concat on the serial chain, h-part overlaps
            pre = dot(inp, w_ih_e[layer]) + dot(h[layer], w_hh_e[layer]) + b_e[layer]
            h[layer], c[layer] = _lstm_cell(pre, c[layer])
            inp = h[layer]
        enc_steps.append(inp)                                        # (B, H)

    # ---- attention precompute: flat 2D matmul over batch-major encoder rows ----
    enc2d = jnp.concatenate(
        [jnp.concatenate([enc_steps[t][b:b + 1, :] for t in range(L)], axis=0)
         for b in range(B)], axis=0)                                 # (B*L, H), rows b*L+t
    proj_e = dot(enc2d, w_att_e).reshape(B, L, H)                    # (B, L, H), free reshape

    # ---- decoder: fully-unrolled prediction loop, warm-started from encoder h/c ----
    h_tops = []
    for _ in range(PRED_LEN):
        h_top = h[LAYERS - 1]
        proj_h = dot(h_top, w_att_h)                                 # (B, H)
        e = jnp.tanh(proj_e + proj_h[:, None, :])                    # (B, L, H)
        scores = jnp.sum(e * v_att, axis=-1)                         # (B, L) lane-major
        m = jnp.max(scores, axis=-1, keepdims=True)
        ex = jnp.exp(scores - m)
        alpha = ex / jnp.sum(ex, axis=-1, keepdims=True)             # (B, L)

        # context = sum_t alpha[:, t] * enc_t : VPU weighted sum over per-step vregs
        context = alpha[:, 0:1] * enc_steps[0]
        for t in range(1, L):
            context = context + alpha[:, t:t + 1] * enc_steps[t]     # (B, H)

        inp = context
        for layer in range(LAYERS):
            pre = dot(inp, w_ih_d[layer]) + dot(h[layer], w_hh_d[layer]) + b_d[layer]
            h[layer], c[layer] = _lstm_cell(pre, c[layer])
            inp = h[layer]
        h_tops.append(inp)                                           # (B, H)

    # ---- deferred output projection: one matmul for all prediction steps ----
    h_all = jnp.concatenate(
        [jnp.concatenate([h_tops[s][b:b + 1, :] for s in range(PRED_LEN)], axis=0)
         for b in range(B)], axis=0)                                 # (B*PRED_LEN, H)
    out2d = dot(h_all, w_out) + b_out                                # (B*PRED_LEN, C_OUT)
    for b in range(B):
        pred_ref[b] = out2d[b * PRED_LEN:(b + 1) * PRED_LEN, :]      # (PRED_LEN, C_OUT)


# ------------------------------ parameter init -----------------------------
def _uniform(key, shape, fan_in):
    bound = 1.0 / math.sqrt(fan_in)
    return jax.random.uniform(key, shape, jnp.float32, -bound, bound)


def init_params(key):
    ks = jax.random.split(key, 13)
    return {
        # DataEmbedding_wo_pos
        'w_conv':  _uniform(ks[0], (D, ENC_IN, 3), ENC_IN * 3),   # Conv1d weight (no bias)
        'w_time':  _uniform(ks[1], (D, FREQ), FREQ),              # timeF Linear (no bias)
        # encoder LSTM (weights stored pre-transposed: [layers, in, 4H])
        'w_ih_e':  _uniform(ks[2], (LAYERS, D, G), H),
        'w_hh_e':  _uniform(ks[3], (LAYERS, H, G), H),
        'b_e':     _uniform(ks[4], (LAYERS, 1, G), H),            # b_ih + b_hh summed
        # decoder additive attention
        'w_att_e': _uniform(ks[5], (H, H), H),
        'w_att_h': _uniform(ks[6], (H, H), H),
        'v_att':   _uniform(ks[7], (1, H), H),
        # decoder LSTM
        'w_ih_d':  _uniform(ks[8], (LAYERS, H, G), H),
        'w_hh_d':  _uniform(ks[9], (LAYERS, H, G), H),
        'b_d':     _uniform(ks[10], (LAYERS, 1, G), H),
        # output projection
        'w_out':   _uniform(ks[11], (H, C_OUT), H),
        'b_out':   _uniform(ks[12], (1, C_OUT), H),
    }


def pack_params(p):
    """One-time packing of all weights into a single lane-dense (N_ROWS, 128) f32 slab.
    Runs once at init — the jitted forward only sees the slab (one input DMA)."""
    blocks = []
    for l in range(LAYERS):
        blocks += [p['w_ih_e'][l], p['w_hh_e'][l]]
    for l in range(LAYERS):
        blocks += [p['w_ih_d'][l], p['w_hh_d'][l]]
    bias = jnp.concatenate([p['b_e'].reshape(LAYERS, G), p['b_d'].reshape(LAYERS, G)], axis=0)
    blocks.append(jnp.pad(bias, ((0, 8 - 2 * LAYERS), (0, 0))))
    # fused circular-conv + timeF embedding weight [w0; w1; w2; wt] : (F_IN, D)
    w_emb = jnp.concatenate([p['w_conv'][:, :, 0].T, p['w_conv'][:, :, 1].T,
                             p['w_conv'][:, :, 2].T, p['w_time'].T], axis=0)
    misc = jnp.concatenate([jnp.pad(w_emb, ((0, H - F_IN), (0, 0))),
                            p['w_att_e'], p['w_att_h'],
                            jnp.pad(p['w_out'], ((0, 0), (0, H - C_OUT)))], axis=1)  # (H, G)
    blocks.append(misc)
    vec = jnp.zeros((8, G), jnp.float32)
    vec = vec.at[0, 0:H].set(p['v_att'][0])
    vec = vec.at[0, H:H + C_OUT].set(p['b_out'][0])
    blocks.append(vec)
    slab = jnp.concatenate(blocks, axis=0)
    assert slab.shape == (N_ROWS, G)
    return slab


# ------------------------------- full forward ------------------------------
@jax.jit
def model_forward(x, x_mark, param_slab):
    # One fused launch; zero wrapper-side XLA ops per call.
    # (For large batches on v7x, add a leading batch grid axis with
    #  dimension_semantics=("parallel",) to use both TensorCores.)
    return pl.pallas_call(
        dalstm_kernel,
        out_shape=jax.ShapeDtypeStruct((B, PRED_LEN, C_OUT), jnp.float32),
    )(x, x_mark, param_slab)


if __name__ == "__main__":
    key = jax.random.PRNGKey(0)
    kx, km, kp = jax.random.split(key, 3)
    x = jax.random.normal(kx, (B, L, ENC_IN), jnp.float32)
    x_mark = jax.random.normal(km, (B, L, FREQ), jnp.float32)
    param_slab = jax.block_until_ready(pack_params(init_params(kp)))  # packed ONCE at init

    preds = model_forward(x, x_mark, param_slab)
    preds = jax.block_until_ready(preds)
    assert preds.shape == (B, PRED_LEN, C_OUT)
    assert bool(jnp.all(jnp.isfinite(preds)))
    print("KERNEL_OK")
</pallas_src>

<mosaic_0001>
module attributes {stable_mosaic.version = 11 : i64} {
  func.func @dalstm_kernel(%arg0: memref<2x8x4xf32, #tpu.memory_space<vmem>>, %arg1: memref<2x8x4xf32, #tpu.memory_space<vmem>>, %arg2: memref<304x128xf32, #tpu.memory_space<vmem>>, %arg3: memref<2x4x4xf32, #tpu.memory_space<vmem>>) attributes {dimension_semantics = [], scalar_prefetch = 0 : i64, scratch_operands = 0 : i64, tpu.core_type = #tpu.core_type<tc>} {
    %c0 = arith.constant 0 : index
    %c0_0 = arith.constant 0 : index
    %0 = vector.load %arg2[%c0, %c0_0] : memref<304x128xf32, #tpu.memory_space<vmem>>, vector<32x128xf32>
    %c64 = arith.constant 64 : index
    %c0_1 = arith.constant 0 : index
    %1 = vector.load %arg2[%c64, %c0_1] : memref<304x128xf32, #tpu.memory_space<vmem>>, vector<32x128xf32>
    %c32 = arith.constant 32 : index
    %c0_2 = arith.constant 0 : index
    %2 = vector.load %arg2[%c32, %c0_2] : memref<304x128xf32, #tpu.memory_space<vmem>>, vector<32x128xf32>
    %c96 = arith.constant 96 : index
    %c0_3 = arith.constant 0 : index
    %3 = vector.load %arg2[%c96, %c0_3] : memref<304x128xf32, #tpu.memory_space<vmem>>, vector<32x128xf32>
    %c128 = arith.constant 128 : index
    %c0_4 = arith.constant 0 : index
    %4 = vector.load %arg2[%c128, %c0_4] : memref<304x128xf32, #tpu.memory_space<vmem>>, vector<32x128xf32>
    %c192 = arith.constant 192 : index
    %c0_5 = arith.constant 0 : index
    %5 = vector.load %arg2[%c192, %c0_5] : memref<304x128xf32, #tpu.memory_space<vmem>>, vector<32x128xf32>
    %c160 = arith.constant 160 : index
    %c0_6 = arith.constant 0 : index
    %6 = vector.load %arg2[%c160, %c0_6] : memref<304x128xf32, #tpu.memory_space<vmem>>, vector<32x128xf32>
    %c224 = arith.constant 224 : index
    %c0_7 = arith.constant 0 : index
    %7 = vector.load %arg2[%c224, %c0_7] : memref<304x128xf32, #tpu.memory_space<vmem>>, vector<32x128xf32>
    %c256 = arith.constant 256 : index
    %c0_8 = arith.constant 0 : index
    %8 = vector.load %arg2[%c256, %c0_8] : memref<304x128xf32, #tpu.memory_space<vmem>>, vector<1x128xf32>
    %c257 = arith.constant 257 : index
    %c0_9 = arith.constant 0 : index
    %9 = vector.load %arg2[%c257, %c0_9] : memref<304x128xf32, #tpu.memory_space<vmem>>, vector<1x128xf32>
    %c258 = arith.constant 258 : index
    %c0_10 = arith.constant 0 : index
    %10 = vector.load %arg2[%c258, %c0_10] : memref<304x128xf32, #tpu.memory_space<vmem>>, vector<1x128xf32>
    %c259 = arith.constant 259 : index
    %c0_11 = arith.constant 0 : index
    %11 = vector.load %arg2[%c259, %c0_11] : memref<304x128xf32, #tpu.memory_space<vmem>>, vector<1x128xf32>
    %c264 = arith.constant 264 : index
    %c0_12 = arith.constant 0 : index
    %12 = vector.load %arg2[%c264, %c0_12] : memref<304x128xf32, #tpu.memory_space<vmem>>, vector<16x32xf32>
    %c264_13 = arith.constant 264 : index
    %c32_14 = arith.constant 32 : index
    %13 = vector.load %arg2[%c264_13, %c32_14] : memref<304x128xf32, #tpu.memory_space<vmem>>, vector<32x32xf32>
    %c264_15 = arith.constant 264 : index
    %c64_16 = arith.constant 64 : index
    %14 = vector.load %arg2[%c264_15, %c64_16] : memref<304x128xf32, #tpu.memory_space<vmem>>, vector<32x32xf32>
    %c264_17 = arith.constant 264 : index
    %c96_18 = arith.constant 96 : index
    %15 = vector.load %arg2[%c264_17, %c96_18] : memref<304x128xf32, #tpu.memory_space<vmem>>, vector<32x4xf32>
    %c296 = arith.constant 296 : index
    %c0_19 = arith.constant 0 : index
    %16 = vector.load %arg2[%c296, %c0_19] : memref<304x128xf32, #tpu.memory_space<vmem>>, vector<1x32xf32>
    %c296_20 = arith.constant 296 : index
    %c32_21 = arith.constant 32 : index
    %17 = vector.load %arg2[%c296_20, %c32_21] : memref<304x128xf32, #tpu.memory_space<vmem>>, vector<1x4xf32>
    %c0_22 = arith.constant 0 : index
    %c0_23 = arith.constant 0 : index
    %c0_24 = arith.constant 0 : index
    %18 = vector.load %arg0[%c0_22, %c0_23, %c0_24] : memref<2x8x4xf32, #tpu.memory_space<vmem>>, vector<1x8x4xf32>
    %19 = vector.shape_cast %18 : vector<1x8x4xf32> to vector<8x4xf32>
    %c0_25 = arith.constant 0 : index
    %c0_26 = arith.constant 0 : index
    %c0_27 = arith.constant 0 : index
    %20 = vector.load %arg1[%c0_25, %c0_26, %c0_27] : memref<2x8x4xf32, #tpu.memory_space<vmem>>, vector<1x8x4xf32>
    %21 = vector.shape_cast %20 : vector<1x8x4xf32> to vector<8x4xf32>
    %22 = vector.extract_strided_slice %19 {offsets = [7, 0], sizes = [1, 4], strides = [1, 1]} : vector<8x4xf32> to vector<1x4xf32>
    %23 = vector.extract_strided_slice %19 {offsets = [0, 0], sizes = [7, 4], strides = [1, 1]} : vector<8x4xf32> to vector<7x4xf32>
    %24 = tpu.concatenate %22, %23 in 0 : vector<1x4xf32>, vector<7x4xf32> -> vector<8x4xf32>
    %25 = vector.extract_strided_slice %19 {offsets = [1, 0], sizes = [7, 4], strides = [1, 1]} : vector<8x4xf32> to vector<7x4xf32>
    %26 = vector.extract_strided_slice %19 {offsets = [0, 0], sizes = [1, 4], strides = [1, 1]} : vector<8x4xf32> to vector<1x4xf32>
    %27 = tpu.concatenate %25, %26 in 0 : vector<7x4xf32>, vector<1x4xf32> -> vector<8x4xf32>
    %c1 = arith.constant 1 : index
    %c0_28 = arith.constant 0 : index
    %c0_29 = arith.constant 0 : index
    %28 = vector.load %arg0[%c1, %c0_28, %c0_29] : memref<2x8x4xf32, #tpu.memory_space<vmem>>, vector<1x8x4xf32>
    %29 = vector.shape_cast %28 : vector<1x8x4xf32> to vector<8x4xf32>
    %c1_30 = arith.constant 1 : index
    %c0_31 = arith.constant 0 : index
    %c0_32 = arith.constant 0 : index
    %30 = vector.load %arg1[%c1_30, %c0_31, %c0_32] : memref<2x8x4xf32, #tpu.memory_space<vmem>>, vector<1x8x4xf32>
    %31 = vector.shape_cast %30 : vector<1x8x4xf32> to vector<8x4xf32>
    %32 = vector.extract_strided_slice %29 {offsets = [7, 0], sizes = [1, 4], strides = [1, 1]} : vector<8x4xf32> to vector<1x4xf32>
    %33 = vector.extract_strided_slice %29 {offsets = [0, 0], sizes = [7, 4], strides = [1, 1]} : vector<8x4xf32> to vector<7x4xf32>
    %34 = tpu.concatenate %32, %33 in 0 : vector<1x4xf32>, vector<7x4xf32> -> vector<8x4xf32>
    %35 = vector.extract_strided_slice %29 {offsets = [1, 0], sizes = [7, 4], strides = [1, 1]} : vector<8x4xf32> to vector<7x4xf32>
    %36 = vector.extract_strided_slice %29 {offsets = [0, 0], sizes = [1, 4], strides = [1, 1]} : vector<8x4xf32> to vector<1x4xf32>
    %37 = tpu.concatenate %35, %36 in 0 : vector<7x4xf32>, vector<1x4xf32> -> vector<8x4xf32>
    %38 = tpu.concatenate %24, %34 in 0 : vector<8x4xf32>, vector<8x4xf32> -> vector<16x4xf32>
    %39 = tpu.concatenate %19, %29 in 0 : vector<8x4xf32>, vector<8x4xf32> -> vector<16x4xf32>
    %40 = tpu.concatenate %27, %37 in 0 : vector<8x4xf32>, vector<8x4xf32> -> vector<16x4xf32>
    %41 = tpu.concatenate %21, %31 in 0 : vector<8x4xf32>, vector<8x4xf32> -> vector<16x4xf32>
    %42 = tpu.concatenate %38, %39, %40, %41 in 1 : vector<16x4xf32>, vector<16x4xf32>, vector<16x4xf32>, vector<16x4xf32> -> vector<16x16xf32>
    %cst = arith.constant dense<0.000000e+00> : vector<16x32xf32>
    %43 = tpu.matmul %42, %12, %cst {dimension_numbers = #tpu.dot_dimension_numbers<[1], [0], [0], [1], [0, 0, 1, 1], [], []>} : vector<16x16xf32>, vector<16x32xf32>, vector<16x32xf32> -> vector<16x32xf32>
    %cst_33 = arith.constant dense<0.000000e+00> : vector<16x128xf32>
    %44 = tpu.matmul %43, %0, %cst_33 {dimension_numbers = #tpu.dot_dimension_numbers<[1], [0], [0], [1], [0, 0, 1, 1], [], []>} : vector<16x32xf32>, vector<32x128xf32>, vector<16x128xf32> -> vector<16x128xf32>
    %45 = vector.broadcast %8 : vector<1x128xf32> to vector<16x128xf32>
    %46 = arith.addf %44, %45 : vector<16x128xf32>
    %47 = vector.extract_strided_slice %46 {offsets = [0, 0], sizes = [1, 128], strides = [1, 1]} : vector<16x128xf32> to vector<1x128xf32>
    %48 = vector.extract_strided_slice %46 {offsets = [8, 0], sizes = [1, 128], strides = [1, 1]} : vector<16x128xf32> to vector<1x128xf32>
    %49 = tpu.concatenate %47, %48 in 0 : vector<1x128xf32>, vector<1x128xf32> -> vector<2x128xf32>
    %50 = vector.extract_strided_slice %46 {offsets = [1, 0], sizes = [1, 128], strides = [1, 1]} : vector<16x128xf32> to vector<1x128xf32>
    %51 = vector.extract_strided_slice %46 {offsets = [9, 0], sizes = [1, 128], strides = [1, 1]} : vector<16x128xf32> to vector<1x128xf32>
    %52 = tpu.concatenate %50, %51 in 0 : vector<1x128xf32>, vector<1x128xf32> -> vector<2x128xf32>
    %53 = vector.extract_strided_slice %46 {offsets = [2, 0], sizes = [1, 128], strides = [1, 1]} : vector<16x128xf32> to vector<1x128xf32>
    %54 = vector.extract_strided_slice %46 {offsets = [10, 0], sizes = [1, 128], strides = [1, 1]} : vector<16x128xf32> to vector<1x128xf32>
    %55 = tpu.concatenate %53, %54 in 0 : vector<1x128xf32>, vector<1x128xf32> -> vector<2x128xf32>
    %56 = vector.extract_strided_slice %46 {offsets = [3, 0], sizes = [1, 128], strides = [1, 1]} : vector<16x128xf32> to vector<1x128xf32>
    %57 = vector.extract_strided_slice %46 {offsets = [11, 0], sizes = [1, 128], strides = [1, 1]} : vector<16x128xf32> to vector<1x128xf32>
    %58 = tpu.concatenate %56, %57 in 0 : vector<1x128xf32>, vector<1x128xf32> -> vector<2x128xf32>
    %59 = vector.extract_strided_slice %46 {offsets = [4, 0], sizes = [1, 128], strides = [1, 1]} : vector<16x128xf32> to vector<1x128xf32>
    %60 = vector.extract_strided_slice %46 {offsets = [12, 0], sizes = [1, 128], strides = [1, 1]} : vector<16x128xf32> to vector<1x128xf32>
    %61 = tpu.concatenate %59, %60 in 0 : vector<1x128xf32>, vector<1x128xf32> -> vector<2x128xf32>
    %62 = vector.extract_strided_slice %46 {offsets = [5, 0], sizes = [1, 128], strides = [1, 1]} : vector<16x128xf32> to vector<1x128xf32>
    %63 = vector.extract_strided_slice %46 {offsets = [13, 0], sizes = [1, 128], strides = [1, 1]} : vector<16x128xf32> to vector<1x128xf32>
    %64 = tpu.concatenate %62, %63 in 0 : vector<1x128xf32>, vector<1x128xf32> -> vector<2x128xf32>
    %65 = vector.extract_strided_slice %46 {offsets = [6, 0], sizes = [1, 128], strides = [1, 1]} : vector<16x128xf32> to vector<1x128xf32>
    %66 = vector.extract_strided_slice %46 {offsets = [14, 0], sizes = [1, 128], strides = [1, 1]} : vector<16x128xf32> to vector<1x128xf32>
    %67 = tpu.concatenate %65, %66 in 0 : vector<1x128xf32>, vector<1x128xf32> -> vector<2x128xf32>
    %68 = vector.extract_strided_slice %46 {offsets = [7, 0], sizes = [1, 128], strides = [1, 1]} : vector<16x128xf32> to vector<1x128xf32>
    %69 = vector.extract_strided_slice %46 {offsets = [15, 0], sizes = [1, 128], strides = [1, 1]} : vector<16x128xf32> to vector<1x128xf32>
    %70 = tpu.concatenate %68, %69 in 0 : vector<1x128xf32>, vector<1x128xf32> -> vector<2x128xf32>
    %cst_34 = arith.constant 0.000000e+00 : f32
    %71 = vector.broadcast %cst_34 : f32 to vector<2x32xf32>
    %cst_35 = arith.constant 0.000000e+00 : f32
    %72 = vector.broadcast %cst_35 : f32 to vector<2x32xf32>
    %cst_36 = arith.constant 0.000000e+00 : f32
    %73 = vector.broadcast %cst_36 : f32 to vector<2x32xf32>
    %cst_37 = arith.constant 0.000000e+00 : f32
    %74 = vector.broadcast %cst_37 : f32 to vector<2x32xf32>
    %cst_38 = arith.constant dense<0.000000e+00> : vector<2x128xf32>
    %75 = tpu.matmul %71, %2, %cst_38 {dimension_numbers = #tpu.dot_dimension_numbers<[1], [0], [0], [1], [0, 0, 1, 1], [], []>} : vector<2x32xf32>, vector<32x128xf32>, vector<2x128xf32> -> vector<2x128xf32>
    %76 = arith.addf %49, %75 : vector<2x128xf32>
    %77 = arith.negf %76 : vector<2x128xf32>
    %78 = math.exp %77 : vector<2x128xf32>
    %cst_39 = arith.constant 1.000000e+00 : f32
    %79 = vector.broadcast %cst_39 : f32 to vector<2x128xf32>
    %80 = arith.addf %79, %78 : vector<2x128xf32>
    %81 = arith.divf %79, %80 : vector<2x128xf32>
    %82 = math.tanh %76 : vector<2x128xf32>
    %83 = vector.extract_strided_slice %81 {offsets = [0, 0], sizes = [2, 32], strides = [1, 1]} : vector<2x128xf32> to vector<2x32xf32>
    %84 = vector.extract_strided_slice %81 {offsets = [0, 32], sizes = [2, 32], strides = [1, 1]} : vector<2x128xf32> to vector<2x32xf32>
    %85 = vector.extract_strided_slice %82 {offsets = [0, 64], sizes = [2, 32], strides = [1, 1]} : vector<2x128xf32> to vector<2x32xf32>
    %86 = vector.extract_strided_slice %81 {offsets = [0, 96], sizes = [2, 32], strides = [1, 1]} : vector<2x128xf32> to vector<2x32xf32>
    %87 = arith.mulf %84, %73 : vector<2x32xf32>
    %88 = arith.mulf %83, %85 : vector<2x32xf32>
    %89 = arith.addf %87, %88 : vector<2x32xf32>
    %90 = math.tanh %89 : vector<2x32xf32>
    %91 = arith.mulf %86, %90 : vector<2x32xf32>
    %cst_40 = arith.constant dense<0.000000e+00> : vector<2x128xf32>
    %92 = tpu.matmul %91, %1, %cst_40 {dimension_numbers = #tpu.dot_dimension_numbers<[1], [0], [0], [1], [0, 0, 1, 1], [], []>} : vector<2x32xf32>, vector<32x128xf32>, vector<2x128xf32> -> vector<2x128xf32>
    %cst_41 = arith.constant dense<0.000000e+00> : vector<2x128xf32>
    %93 = tpu.matmul %72, %3, %cst_41 {dimension_numbers = #tpu.dot_dimension_numbers<[1], [0], [0], [1], [0, 0, 1, 1], [], []>} : vector<2x32xf32>, vector<32x128xf32>, vector<2x128xf32> -> vector<2x128xf32>
    %94 = arith.addf %92, %93 : vector<2x128xf32>
    %95 = vector.broadcast %9 : vector<1x128xf32> to vector<2x128xf32>
    %96 = arith.addf %94, %95 : vector<2x128xf32>
    %97 = arith.negf %96 : vector<2x128xf32>
    %98 = math.exp %97 : vector<2x128xf32>
    %cst_42 = arith.constant 1.000000e+00 : f32
    %99 = vector.broadcast %cst_42 : f32 to vector<2x128xf32>
    %100 = arith.addf %99, %98 : vector<2x128xf32>
    %101 = arith.divf %99, %100 : vector<2x128xf32>
    %102 = math.tanh %96 : vector<2x128xf32>
    %103 = vector.extract_strided_slice %101 {offsets = [0, 0], sizes = [2, 32], strides = [1, 1]} : vector<2x128xf32> to vector<2x32xf32>
    %104 = vector.extract_strided_slice %101 {offsets = [0, 32], sizes = [2, 32], strides = [1, 1]} : vector<2x128xf32> to vector<2x32xf32>
    %105 = vector.extract_strided_slice %102 {offsets = [0, 64], sizes = [2, 32], strides = [1, 1]} : vector<2x128xf32> to vector<2x32xf32>
    %106 = vector.extract_strided_slice %101 {offsets = [0, 96], sizes = [2, 32], strides = [1, 1]} : vector<2x128xf32> to vector<2x32xf32>
    %107 = arith.mulf %104, %74 : vector<2x32xf32>
    %108 = arith.mulf %103, %105 : vector<2x32xf32>
    %109 = arith.addf %107, %108 : vector<2x32xf32>
    %110 = math.tanh %109 : vector<2x32xf32>
    %111 = arith.mulf %106, %110 : vector<2x32xf32>
    %cst_43 = arith.constant dense<0.000000e+00> : vector<2x128xf32>
    %112 = tpu.matmul %91, %2, %cst_43 {dimension_numbers = #tpu.dot_dimension_numbers<[1], [0], [0], [1], [0, 0, 1, 1], [], []>} : vector<2x32xf32>, vector<32x128xf32>, vector<2x128xf32> -> vector<2x128xf32>
    %113 = arith.addf %52, %112 : vector<2x128xf32>
    %114 = arith.negf %113 : vector<2x128xf32>
    %115 = math.exp %114 : vector<2x128xf32>
    %cst_44 = arith.constant 1.000000e+00 : f32
    %116 = vector.broadcast %cst_44 : f32 to vector<2x128xf32>
    %117 = arith.addf %116, %115 : vector<2x128xf32>
    %118 = arith.divf %116, %117 : vector<2x128xf32>
    %119 = math.tanh %113 : vector<2x128xf32>
    %120 = vector.extract_strided_slice %118 {offsets = [0, 0], sizes = [2, 32], strides = [1, 1]} : vector<2x128xf32> to vector<2x32xf32>
    %121 = vector.extract_strided_slice %118 {offsets = [0, 32], sizes = [2, 32], strides = [1, 1]} : vector<2x128xf32> to vector<2x32xf32>
    %122 = vector.extract_strided_slice %119 {offsets = [0, 64], sizes = [2, 32], strides = [1, 1]} : vector<2x128xf32> to vector<2x32xf32>
    %123 = vector.extract_strided_slice %118 {offsets = [0, 96], sizes = [2, 32], strides = [1, 1]} : vector<2x128xf32> to vector<2x32xf32>
    %124 = arith.mulf %121, %89 : vector<2x32xf32>
    %125 = arith.mulf %120, %122 : vector<2x32xf32>
    %126 = arith.addf %124, %125 : vector<2x32xf32>
    %127 = math.tanh %126 : vector<2x32xf32>
    %128 = arith.mulf %123, %127 : vector<2x32xf32>
    %cst_45 = arith.constant dense<0.000000e+00> : vector<2x128xf32>
    %129 = tpu.matmul %128, %1, %cst_45 {dimension_numbers = #tpu.dot_dimension_numbers<[1], [0], [0], [1], [0, 0, 1, 1], [], []>} : vector<2x32xf32>, vector<32x128xf32>, vector<2x128xf32> -> vector<2x128xf32>
    %cst_46 = arith.constant dense<0.000000e+00> : vector<2x128xf32>
    %130 = tpu.matmul %111, %3, %cst_46 {dimension_numbers = #tpu.dot_dimension_numbers<[1], [0], [0], [1], [0, 0, 1, 1], [], []>} : vector<2x32xf32>, vector<32x128xf32>, vector<2x128xf32> -> vector<2x128xf32>
    %131 = arith.addf %129, %130 : vector<2x128xf32>
    %132 = vector.broadcast %9 : vector<1x128xf32> to vector<2x128xf32>
    %133 = arith.addf %131, %132 : vector<2x128xf32>
    %134 = arith.negf %133 : vector<2x128xf32>
    %135 = math.exp %134 : vector<2x128xf32>
    %cst_47 = arith.constant 1.000000e+00 : f32
    %136 = vector.broadcast %cst_47 : f32 to vector<2x128xf32>
    %137 = arith.addf %136, %135 : vector<2x128xf32>
    %138 = arith.divf %136, %137 : vector<2x128xf32>
    %139 = math.tanh %133 : vector<2x128xf32>
    %140 = vector.extract_strided_slice %138 {offsets = [0, 0], sizes = [2, 32], strides = [1, 1]} : vector<2x128xf32> to vector<2x32xf32>
    %141 = vector.extract_strided_slice %138 {offsets = [0, 32], sizes = [2, 32], strides = [1, 1]} : vector<2x128xf32> to vector<2x32xf32>
    %142 = vector.extract_strided_slice %139 {offsets = [0, 64], sizes = [2, 32], strides = [1, 1]} : vector<2x128xf32> to vector<2x32xf32>
    %143 = vector.extract_strided_slice %138 {offsets = [0, 96], sizes = [2, 32], strides = [1, 1]} : vector<2x128xf32> to vector<2x32xf32>
    %144 = arith.mulf %141, %109 : vector<2x32xf32>
    %145 = arith.mulf %140, %142 : vector<2x32xf32>
    %146 = arith.addf %144, %145 : vector<2x32xf32>
    %147 = math.tanh %146 : vector<2x32xf32>
    %148 = arith.mulf %143, %147 : vector<2x32xf32>
    %cst_48 = arith.constant dense<0.000000e+00> : vector<2x128xf32>
    %149 = tpu.matmul %128, %2, %cst_48 {dimension_numbers = #tpu.dot_dimension_numbers<[1], [0], [0], [1], [0, 0, 1, 1], [], []>} : vector<2x32xf32>, vector<32x128xf32>, vector<2x128xf32> -> vector<2x128xf32>
    %150 = arith.addf %55, %149 : vector<2x128xf32>
    %151 = arith.negf %150 : vector<2x128xf32>
    %152 = math.exp %151 : vector<2x128xf32>
    %cst_49 = arith.constant 1.000000e+00 : f32
    %153 = vector.broadcast %cst_49 : f32 to vector<2x128xf32>
    %154 = arith.addf %153, %152 : vector<2x128xf32>
    %155 = arith.divf %153, %154 : vector<2x128xf32>
    %156 = math.tanh %150 : vector<2x128xf32>
    %157 = vector.extract_strided_slice %155 {offsets = [0, 0], sizes = [2, 32], strides = [1, 1]} : vector<2x128xf32> to vector<2x32xf32>
    %158 = vector.extract_strided_slice %155 {offsets = [0, 32], sizes = [2, 32], strides = [1, 1]} : vector<2x128xf32> to vector<2x32xf32>
    %159 = vector.extract_strided_slice %156 {offsets = [0, 64], sizes = [2, 32], strides = [1, 1]} : vector<2x128xf32> to vector<2x32xf32>
    %160 = vector.extract_strided_slice %155 {offsets = [0, 96], sizes = [2, 32], strides = [1, 1]} : vector<2x128xf32> to vector<2x32xf32>
    %161 = arith.mulf %158, %126 : vector<2x32xf32>
    %162 = arith.mulf %157, %159 : vector<2x32xf32>
    %163 = arith.addf %161, %162 : vector<2x32xf32>
    %164 = math.tanh %163 : vector<2x32xf32>
    %165 = arith.mulf %160, %164 : vector<2x32xf32>
    %cst_50 = arith.constant dense<0.000000e+00> : vector<2x128xf32>
    %166 = tpu.matmul %165, %1, %cst_50 {dimension_numbers = #tpu.dot_dimension_numbers<[1], [0], [0], [1], [0, 0, 1, 1], [], []>} : vector<2x32xf32>, vector<32x128xf32>, vector<2x128xf32> -> vector<2x128xf32>
    %cst_51 = arith.constant dense<0.000000e+00> : vector<2x128xf32>
    %167 = tpu.matmul %148, %3, %cst_51 {dimension_numbers = #tpu.dot_dimension_numbers<[1], [0], [0], [1], [0, 0, 1, 1], [], []>} : vector<2x32xf32>, vector<32x128xf32>, vector<2x128xf32> -> vector<2x128xf32>
    %168 = arith.addf %166, %167 : vector<2x128xf32>
    %169 = vector.broadcast %9 : vector<1x128xf32> to vector<2x128xf32>
    %170 = arith.addf %168, %169 : vector<2x128xf32>
    %171 = arith.negf %170 : vector<2x128xf32>
    %172 = math.exp %171 : vector<2x128xf32>
    %cst_52 = arith.constant 1.000000e+00 : f32
    %173 = vector.broadcast %cst_52 : f32 to vector<2x128xf32>
    %174 = arith.addf %173, %172 : vector<2x128xf32>
    %175 = arith.divf %173, %174 : vector<2x128xf32>
    %176 = math.tanh %170 : vector<2x128xf32>
    %177 = vector.extract_strided_slice %175 {offsets = [0, 0], sizes = [2, 32], strides = [1, 1]} : vector<2x128xf32> to vector<2x32xf32>
    %178 = vector.extract_strided_slice %175 {offsets = [0, 32], sizes = [2, 32], strides = [1, 1]} : vector<2x128xf32> to vector<2x32xf32>
    %179 = vector.extract_strided_slice %176 {offsets = [0, 64], sizes = [2, 32], strides = [1, 1]} : vector<2x128xf32> to vector<2x32xf32>
    %180 = vector.extract_strided_slice %175 {offsets = [0, 96], sizes = [2, 32], strides = [1, 1]} : vector<2x128xf32> to vector<2x32xf32>
    %181 = arith.mulf %178, %146 : vector<2x32xf32>
    %182 = arith.mulf %177, %179 : vector<2x32xf32>
    %183 = arith.addf %181, %182 : vector<2x32xf32>
    %184 = math.tanh %183 : vector<2x32xf32>
    %185 = arith.mulf %180, %184 : vector<2x32xf32>
    %cst_53 = arith.constant dense<0.000000e+00> : vector<2x128xf32>
    %186 = tpu.matmul %165, %2, %cst_53 {dimension_numbers = #tpu.dot_dimension_numbers<[1], [0], [0], [1], [0, 0, 1, 1], [], []>} : vector<2x32xf32>, vector<32x128xf32>, vector<2x128xf32> -> vector<2x128xf32>
    %187 = arith.addf %58, %186 : vector<2x128xf32>
    %188 = arith.negf %187 : vector<2x128xf32>
    %189 = math.exp %188 : vector<2x128xf32>
    %cst_54 = arith.constant 1.000000e+00 : f32
    %190 = vector.broadcast %cst_54 : f32 to vector<2x128xf32>
    %191 = arith.addf %190, %189 : vector<2x128xf32>
    %192 = arith.divf %190, %191 : vector<2x128xf32>
    %193 = math.tanh %187 : vector<2x128xf32>
    %194 = vector.extract_strided_slice %192 {offsets = [0, 0], sizes = [2, 32], strides = [1, 1]} : vector<2x128xf32> to vector<2x32xf32>
    %195 = vector.extract_strided_slice %192 {offsets = [0, 32], sizes = [2, 32], strides = [1, 1]} : vector<2x128xf32> to vector<2x32xf32>
    %196 = vector.extract_strided_slice %193 {offsets = [0, 64], sizes = [2, 32], strides = [1, 1]} : vector<2x128xf32> to vector<2x32xf32>
    %197 = vector.extract_strided_slice %192 {offsets = [0, 96], sizes = [2, 32], strides = [1, 1]} : vector<2x128xf32> to vector<2x32xf32>
    %198 = arith.mulf %195, %163 : vector<2x32xf32>
    %199 = arith.mulf %194, %196 : vector<2x32xf32>
    %200 = arith.addf %198, %199 : vector<2x32xf32>
    %201 = math.tanh %200 : vector<2x32xf32>
    %202 = arith.mulf %197, %201 : vector<2x32xf32>
    %cst_55 = arith.constant dense<0.000000e+00> : vector<2x128xf32>
    %203 = tpu.matmul %202, %1, %cst_55 {dimension_numbers = #tpu.dot_dimension_numbers<[1], [0], [0], [1], [0, 0, 1, 1], [], []>} : vector<2x32xf32>, vector<32x128xf32>, vector<2x128xf32> -> vector<2x128xf32>
    %cst_56 = arith.constant dense<0.000000e+00> : vector<2x128xf32>
    %204 = tpu.matmul %185, %3, %cst_56 {dimension_numbers = #tpu.dot_dimension_numbers<[1], [0], [0], [1], [0, 0, 1, 1], [], []>} : vector<2x32xf32>, vector<32x128xf32>, vector<2x128xf32> -> vector<2x128xf32>
    %205 = arith.addf %203, %204 : vector<2x128xf32>
    %206 = vector.broadcast %9 : vector<1x128xf32> to vector<2x128xf32>
    %207 = arith.addf %205, %206 : vector<2x128xf32>
    %208 = arith.negf %207 : vector<2x128xf32>
    %209 = math.exp %208 : vector<2x128xf32>
    %cst_57 = arith.constant 1.000000e+00 : f32
    %210 = vector.broadcast %cst_57 : f32 to vector<2x128xf32>
    %211 = arith.addf %210, %209 : vector<2x128xf32>
    %212 = arith.divf %210, %211 : vector<2x128xf32>
    %213 = math.tanh %207 : vector<2x128xf32>
    %214 = vector.extract_strided_slice %212 {offsets = [0, 0], sizes = [2, 32], strides = [1, 1]} : vector<2x128xf32> to vector<2x32xf32>
    %215 = vector.extract_strided_slice %212 {offsets = [0, 32], sizes = [2, 32], strides = [1, 1]} : vector<2x128xf32> to vector<2x32xf32>
    %216 = vector.extract_strided_slice %213 {offsets = [0, 64], sizes = [2, 32], strides = [1, 1]} : vector<2x128xf32> to vector<2x32xf32>
    %217 = vector.extract_strided_slice %212 {offsets = [0, 96], sizes = [2, 32], strides = [1, 1]} : vector<2x128xf32> to vector<2x32xf32>
    %218 = arith.mulf %215, %183 : vector<2x32xf32>
    %219 = arith.mulf %214, %216 : vector<2x32xf32>
    %220 = arith.addf %218, %219 : vector<2x32xf32>
    %221 = math.tanh %220 : vector<2x32xf32>
    %222 = arith.mulf %217, %221 : vector<2x32xf32>
    %cst_58 = arith.constant dense<0.000000e+00> : vector<2x128xf32>
    %223 = tpu.matmul %202, %2, %cst_58 {dimension_numbers = #tpu.dot_dimension_numbers<[1], [0], [0], [1], [0, 0, 1, 1], [], []>} : vector<2x32xf32>, vector<32x128xf32>, vector<2x128xf32> -> vector<2x128xf32>
    %224 = arith.addf %61, %223 : vector<2x128xf32>
    %225 = arith.negf %224 : vector<2x128xf32>
    %226 = math.exp %225 : vector<2x128xf32>
    %cst_59 = arith.constant 1.000000e+00 : f32
    %227 = vector.broadcast %cst_59 : f32 to vector<2x128xf32>
    %228 = arith.addf %227, %226 : vector<2x128xf32>
    %229 = arith.divf %227, %228 : vector<2x128xf32>
    %230 = math.tanh %224 : vector<2x128xf32>
    %231 = vector.extract_strided_slice %229 {offsets = [0, 0], sizes = [2, 32], strides = [1, 1]} : vector<2x128xf32> to vector<2x32xf32>
    %232 = vector.extract_strided_slice %229 {offsets = [0, 32], sizes = [2, 32], strides = [1, 1]} : vector<2x128xf32> to vector<2x32xf32>
    %233 = vector.extract_strided_slice %230 {offsets = [0, 64], sizes = [2, 32], strides = [1, 1]} : vector<2x128xf32> to vector<2x32xf32>
    %234 = vector.extract_strided_slice %229 {offsets = [0, 96], sizes = [2, 32], strides = [1, 1]} : vector<2x128xf32> to vector<2x32xf32>
    %235 = arith.mulf %232, %200 : vector<2x32xf32>
    %236 = arith.mulf %231, %233 : vector<2x32xf32>
    %237 = arith.addf %235, %236 : vector<2x32xf32>
    %238 = math.tanh %237 : vector<2x32xf32>
    %239 = arith.mulf %234, %238 : vector<2x32xf32>
    %cst_60 = arith.constant dense<0.000000e+00> : vector<2x128xf32>
    %240 = tpu.matmul %239, %1, %cst_60 {dimension_numbers = #tpu.dot_dimension_numbers<[1], [0], [0], [1], [0, 0, 1, 1], [], []>} : vector<2x32xf32>, vector<32x128xf32>, vector<2x128xf32> -> vector<2x128xf32>
    %cst_61 = arith.constant dense<0.000000e+00> : vector<2x128xf32>
    %241 = tpu.matmul %222, %3, %cst_61 {dimension_numbers = #tpu.dot_dimension_numbers<[1], [0], [0], [1], [0, 0, 1, 1], [], []>} : vector<2x32xf32>, vector<32x128xf32>, vector<2x128xf32> -> vector<2x128xf32>
    %242 = arith.addf %240, %241 : vector<2x128xf32>
    %243 = vector.broadcast %9 : vector<1x128xf32> to vector<2x128xf32>
    %244 = arith.addf %242, %243 : vector<2x128xf32>
    %245 = arith.negf %244 : vector<2x128xf32>
    %246 = math.exp %245 : vector<2x128xf32>
    %cst_62 = arith.constant 1.000000e+00 : f32
    %247 = vector.broadcast %cst_62 : f32 to vector<2x128xf32>
    %248 = arith.addf %247, %246 : vector<2x128xf32>
    %249 = arith.divf %247, %248 : vector<2x128xf32>
    %250 = math.tanh %244 : vector<2x128xf32>
    %251 = vector.extract_strided_slice %249 {offsets = [0, 0], sizes = [2, 32], strides = [1, 1]} : vector<2x128xf32> to vector<2x32xf32>
    %252 = vector.extract_strided_slice %249 {offsets = [0, 32], sizes = [2, 32], strides = [1, 1]} : vector<2x128xf32> to vector<2x32xf32>
    %253 = vector.extract_strided_slice %250 {offsets = [0, 64], sizes = [2, 32], strides = [1, 1]} : vector<2x128xf32> to vector<2x32xf32>
    %254 = vector.extract_strided_slice %249 {offsets = [0, 96], sizes = [2, 32], strides = [1, 1]} : vector<2x128xf32> to vector<2x32xf32>
    %255 = arith.mulf %252, %220 : vector<2x32xf32>
    %256 = arith.mulf %251, %253 : vector<2x32xf32>
    %257 = arith.addf %255, %256 : vector<2x32xf32>
    %258 = math.tanh %257 : vector<2x32xf32>
    %259 = arith.mulf %254, %258 : vector<2x32xf32>
    %cst_63 = arith.constant dense<0.000000e+00> : vector<2x128xf32>
    %260 = tpu.matmul %239, %2, %cst_63 {dimension_numbers = #tpu.dot_dimension_numbers<[1], [0], [0], [1], [0, 0, 1, 1], [], []>} : vector<2x32xf32>, vector<32x128xf32>, vector<2x128xf32> -> vector<2x128xf32>
    %261 = arith.addf %64, %260 : vector<2x128xf32>
    %262 = arith.negf %261 : vector<2x128xf32>
    %263 = math.exp %262 : vector<2x128xf32>
    %cst_64 = arith.constant 1.000000e+00 : f32
    %264 = vector.broadcast %cst_64 : f32 to vector<2x128xf32>
    %265 = arith.addf %264, %263 : vector<2x128xf32>
    %266 = arith.divf %264, %265 : vector<2x128xf32>
    %267 = math.tanh %261 : vector<2x128xf32>
    %268 = vector.extract_strided_slice %266 {offsets = [0, 0], sizes = [2, 32], strides = [1, 1]} : vector<2x128xf32> to vector<2x32xf32>
    %269 = vector.extract_strided_slice %266 {offsets = [0, 32], sizes = [2, 32], strides = [1, 1]} : vector<2x128xf32> to vector<2x32xf32>
    %270 = vector.extract_strided_slice %267 {offsets = [0, 64], sizes = [2, 32], strides = [1, 1]} : vector<2x128xf32> to vector<2x32xf32>
    %271 = vector.extract_strided_slice %266 {offsets = [0, 96], sizes = [2, 32], strides = [1, 1]} : vector<2x128xf32> to vector<2x32xf32>
    %272 = arith.mulf %269, %237 : vector<2x32xf32>
    %273 = arith.mulf %268, %270 : vector<2x32xf32>
    %274 = arith.addf %272, %273 : vector<2x32xf32>
    %275 = math.tanh %274 : vector<2x32xf32>
    %276 = arith.mulf %271, %275 : vector<2x32xf32>
    %cst_65 = arith.constant dense<0.000000e+00> : vector<2x128xf32>
    %277 = tpu.matmul %276, %1, %cst_65 {dimension_numbers = #tpu.dot_dimension_numbers<[1], [0], [0], [1], [0, 0, 1, 1], [], []>} : vector<2x32xf32>, vector<32x128xf32>, vector<2x128xf32> -> vector<2x128xf32>
    %cst_66 = arith.constant dense<0.000000e+00> : vector<2x128xf32>
    %278 = tpu.matmul %259, %3, %cst_66 {dimension_numbers = #tpu.dot_dimension_numbers<[1], [0], [0], [1], [0, 0, 1, 1], [], []>} : vector<2x32xf32>, vector<32x128xf32>, vector<2x128xf32> -> vector<2x128xf32>
    %279 = arith.addf %277, %278 : vector<2x128xf32>
    %280 = vector.broadcast %9 : vector<1x128xf32> to vector<2x128xf32>
    %281 = arith.addf %279, %280 : vector<2x128xf32>
    %282 = arith.negf %281 : vector<2x128xf32>
    %283 = math.exp %282 : vector<2x128xf32>
    %cst_67 = arith.constant 1.000000e+00 : f32
    %284 = vector.broadcast %cst_67 : f32 to vector<2x128xf32>
    %285 = arith.addf %284, %283 : vector<2x128xf32>
    %286 = arith.divf %284, %285 : vector<2x128xf32>
    %287 = math.tanh %281 : vector<2x128xf32>
    %288 = vector.extract_strided_slice %286 {offsets = [0, 0], sizes = [2, 32], strides = [1, 1]} : vector<2x128xf32> to vector<2x32xf32>
    %289 = vector.extract_strided_slice %286 {offsets = [0, 32], sizes = [2, 32], strides = [1, 1]} : vector<2x128xf32> to vector<2x32xf32>
    %290 = vector.extract_strided_slice %287 {offsets = [0, 64], sizes = [2, 32], strides = [1, 1]} : vector<2x128xf32> to vector<2x32xf32>
    %291 = vector.extract_strided_slice %286 {offsets = [0, 96], sizes = [2, 32], strides = [1, 1]} : vector<2x128xf32> to vector<2x32xf32>
    %292 = arith.mulf %289, %257 : vector<2x32xf32>
    %293 = arith.mulf %288, %290 : vector<2x32xf32>
    %294 = arith.addf %292, %293 : vector<2x32xf32>
    %295 = math.tanh %294 : vector<2x32xf32>
    %296 = arith.mulf %291, %295 : vector<2x32xf32>
    %cst_68 = arith.constant dense<0.000000e+00> : vector<2x128xf32>
    %297 = tpu.matmul %276, %2, %cst_68 {dimension_numbers = #tpu.dot_dimension_numbers<[1], [0], [0], [1], [0, 0, 1, 1], [], []>} : vector<2x32xf32>, vector<32x128xf32>, vector<2x128xf32> -> vector<2x128xf32>
    %298 = arith.addf %67, %297 : vector<2x128xf32>
    %299 = arith.negf %298 : vector<2x128xf32>
    %300 = math.exp %299 : vector<2x128xf32>
    %cst_69 = arith.constant 1.000000e+00 : f32
    %301 = vector.broadcast %cst_69 : f32 to vector<2x128xf32>
    %302 = arith.addf %301, %300 : vector<2x128xf32>
    %303 = arith.divf %301, %302 : vector<2x128xf32>
    %304 = math.tanh %298 : vector<2x128xf32>
    %305 = vector.extract_strided_slice %303 {offsets = [0, 0], sizes = [2, 32], strides = [1, 1]} : vector<2x128xf32> to vector<2x32xf32>
    %306 = vector.extract_strided_slice %303 {offsets = [0, 32], sizes = [2, 32], strides = [1, 1]} : vector<2x128xf32> to vector<2x32xf32>
    %307 = vector.extract_strided_slice %304 {offsets = [0, 64], sizes = [2, 32], strides = [1, 1]} : vector<2x128xf32> to vector<2x32xf32>
    %308 = vector.extract_strided_slice %303 {offsets = [0, 96], sizes = [2, 32], strides = [1, 1]} : vector<2x128xf32> to vector<2x32xf32>
    %309 = arith.mulf %306, %274 : vector<2x32xf32>
    %310 = arith.mulf %305, %307 : vector<2x32xf32>
    %311 = arith.addf %309, %310 : vector<2x32xf32>
    %312 = math.tanh %311 : vector<2x32xf32>
    %313 = arith.mulf %308, %312 : vector<2x32xf32>
    %cst_70 = arith.constant dense<0.000000e+00> : vector<2x128xf32>
    %314 = tpu.matmul %313, %1, %cst_70 {dimension_numbers = #tpu.dot_dimension_numbers<[1], [0], [0], [1], [0, 0, 1, 1], [], []>} : vector<2x32xf32>, vector<32x128xf32>, vector<2x128xf32> -> vector<2x128xf32>
    %cst_71 = arith.constant dense<0.000000e+00> : vector<2x128xf32>
    %315 = tpu.matmul %296, %3, %cst_71 {dimension_numbers = #tpu.dot_dimension_numbers<[1], [0], [0], [1], [0, 0, 1, 1], [], []>} : vector<2x32xf32>, vector<32x128xf32>, vector<2x128xf32> -> vector<2x128xf32>
    %316 = arith.addf %314, %315 : vector<2x128xf32>
    %317 = vector.broadcast %9 : vector<1x128xf32> to vector<2x128xf32>
    %318 = arith.addf %316, %317 : vector<2x128xf32>
    %319 = arith.negf %318 : vector<2x128xf32>
    %320 = math.exp %319 : vector<2x128xf32>
    %cst_72 = arith.constant 1.000000e+00 : f32
    %321 = vector.broadcast %cst_72 : f32 to vector<2x128xf32>
    %322 = arith.addf %321, %320 : vector<2x128xf32>
    %323 = arith.divf %321, %322 : vector<2x128xf32>
    %324 = math.tanh %318 : vector<2x128xf32>
    %325 = vector.extract_strided_slice %323 {offsets = [0, 0], sizes = [2, 32], strides = [1, 1]} : vector<2x128xf32> to vector<2x32xf32>
    %326 = vector.extract_strided_slice %323 {offsets = [0, 32], sizes = [2, 32], strides = [1, 1]} : vector<2x128xf32> to vector<2x32xf32>
    %327 = vector.extract_strided_slice %324 {offsets = [0, 64], sizes = [2, 32], strides = [1, 1]} : vector<2x128xf32> to vector<2x32xf32>
    %328 = vector.extract_strided_slice %323 {offsets = [0, 96], sizes = [2, 32], strides = [1, 1]} : vector<2x128xf32> to vector<2x32xf32>
    %329 = arith.mulf %326, %294 : vector<2x32xf32>
    %330 = arith.mulf %325, %327 : vector<2x32xf32>
    %331 = arith.addf %329, %330 : vector<2x32xf32>
    %332 = math.tanh %331 : vector<2x32xf32>
    %333 = arith.mulf %328, %332 : vector<2x32xf32>
    %cst_73 = arith.constant dense<0.000000e+00> : vector<2x128xf32>
    %334 = tpu.matmul %313, %2, %cst_73 {dimension_numbers = #tpu.dot_dimension_numbers<[1], [0], [0], [1], [0, 0, 1, 1], [], []>} : vector<2x32xf32>, vector<32x128xf32>, vector<2x128xf32> -> vector<2x128xf32>
    %335 = arith.addf %70, %334 : vector<2x128xf32>
    %336 = arith.negf %335 : vector<2x128xf32>
    %337 = math.exp %336 : vector<2x128xf32>
    %cst_74 = arith.constant 1.000000e+00 : f32
    %338 = vector.broadcast %cst_74 : f32 to vector<2x128xf32>
    %339 = arith.addf %338, %337 : vector<2x128xf32>
    %340 = arith.divf %338, %339 : vector<2x128xf32>
    %341 = math.tanh %335 : vector<2x128xf32>
    %342 = vector.extract_strided_slice %340 {offsets = [0, 0], sizes = [2, 32], strides = [1, 1]} : vector<2x128xf32> to vector<2x32xf32>
    %343 = vector.extract_strided_slice %340 {offsets = [0, 32], sizes = [2, 32], strides = [1, 1]} : vector<2x128xf32> to vector<2x32xf32>
    %344 = vector.extract_strided_slice %341 {offsets = [0, 64], sizes = [2, 32], strides = [1, 1]} : vector<2x128xf32> to vector<2x32xf32>
    %345 = vector.extract_strided_slice %340 {offsets = [0, 96], sizes = [2, 32], strides = [1, 1]} : vector<2x128xf32> to vector<2x32xf32>
    %346 = arith.mulf %343, %311 : vector<2x32xf32>
    %347 = arith.mulf %342, %344 : vector<2x32xf32>
    %348 = arith.addf %346, %347 : vector<2x32xf32>
    %349 = math.tanh %348 : vector<2x32xf32>
    %350 = arith.mulf %345, %349 : vector<2x32xf32>
    %cst_75 = arith.constant dense<0.000000e+00> : vector<2x128xf32>
    %351 = tpu.matmul %350, %1, %cst_75 {dimension_numbers = #tpu.dot_dimension_numbers<[1], [0], [0], [1], [0, 0, 1, 1], [], []>} : vector<2x32xf32>, vector<32x128xf32>, vector<2x128xf32> -> vector<2x128xf32>
    %cst_76 = arith.constant dense<0.000000e+00> : vector<2x128xf32>
    %352 = tpu.matmul %333, %3, %cst_76 {dimension_numbers = #tpu.dot_dimension_numbers<[1], [0], [0], [1], [0, 0, 1, 1], [], []>} : vector<2x32xf32>, vector<32x128xf32>, vector<2x128xf32> -> vector<2x128xf32>
    %353 = arith.addf %351, %352 : vector<2x128xf32>
    %354 = vector.broadcast %9 : vector<1x128xf32> to vector<2x128xf32>
    %355 = arith.addf %353, %354 : vector<2x128xf32>
    %356 = arith.negf %355 : vector<2x128xf32>
    %357 = math.exp %356 : vector<2x128xf32>
    %cst_77 = arith.constant 1.000000e+00 : f32
    %358 = vector.broadcast %cst_77 : f32 to vector<2x128xf32>
    %359 = arith.addf %358, %357 : vector<2x128xf32>
    %360 = arith.divf %358, %359 : vector<2x128xf32>
    %361 = math.tanh %355 : vector<2x128xf32>
    %362 = vector.extract_strided_slice %360 {offsets = [0, 0], sizes = [2, 32], strides = [1, 1]} : vector<2x128xf32> to vector<2x32xf32>
    %363 = vector.extract_strided_slice %360 {offsets = [0, 32], sizes = [2, 32], strides = [1, 1]} : vector<2x128xf32> to vector<2x32xf32>
    %364 = vector.extract_strided_slice %361 {offsets = [0, 64], sizes = [2, 32], strides = [1, 1]} : vector<2x128xf32> to vector<2x32xf32>
    %365 = vector.extract_strided_slice %360 {offsets = [0, 96], sizes = [2, 32], strides = [1, 1]} : vector<2x128xf32> to vector<2x32xf32>
    %366 = arith.mulf %363, %331 : vector<2x32xf32>
    %367 = arith.mulf %362, %364 : vector<2x32xf32>
    %368 = arith.addf %366, %367 : vector<2x32xf32>
    %369 = math.tanh %368 : vector<2x32xf32>
    %370 = arith.mulf %365, %369 : vector<2x32xf32>
    %371 = vector.extract_strided_slice %111 {offsets = [0, 0], sizes = [1, 32], strides = [1, 1]} : vector<2x32xf32> to vector<1x32xf32>
    %372 = vector.extract_strided_slice %148 {offsets = [0, 0], sizes = [1, 32], strides = [1, 1]} : vector<2x32xf32> to vector<1x32xf32>
    %373 = vector.extract_strided_slice %185 {offsets = [0, 0], sizes = [1, 32], strides = [1, 1]} : vector<2x32xf32> to vector<1x32xf32>
    %374 = vector.extract_strided_slice %222 {offsets = [0, 0], sizes = [1, 32], strides = [1, 1]} : vector<2x32xf32> to vector<1x32xf32>
    %375 = vector.extract_strided_slice %259 {offsets = [0, 0], sizes = [1, 32], strides = [1, 1]} : vector<2x32xf32> to vector<1x32xf32>
    %376 = vector.extract_strided_slice %296 {offsets = [0, 0], sizes = [1, 32], strides = [1, 1]} : vector<2x32xf32> to vector<1x32xf32>
    %377 = vector.extract_strided_slice %333 {offsets = [0, 0], sizes = [1, 32], strides = [1, 1]} : vector<2x32xf32> to vector<1x32xf32>
    %378 = vector.extract_strided_slice %370 {offsets = [0, 0], sizes = [1, 32], strides = [1, 1]} : vector<2x32xf32> to vector<1x32xf32>
    %379 = tpu.concatenate %371, %372, %373, %374, %375, %376, %377, %378 in 0 : vector<1x32xf32>, vector<1x32xf32>, vector<1x32xf32>, vector<1x32xf32>, vector<1x32xf32>, vector<1x32xf32>, vector<1x32xf32>, vector<1x32xf32> -> vector<8x32xf32>
    %380 = vector.extract_strided_slice %111 {offsets = [1, 0], sizes = [1, 32], strides = [1, 1]} : vector<2x32xf32> to vector<1x32xf32>
    %381 = vector.extract_strided_slice %148 {offsets = [1, 0], sizes = [1, 32], strides = [1, 1]} : vector<2x32xf32> to vector<1x32xf32>
    %382 = vector.extract_strided_slice %185 {offsets = [1, 0], sizes = [1, 32], strides = [1, 1]} : vector<2x32xf32> to vector<1x32xf32>
    %383 = vector.extract_strided_slice %222 {offsets = [1, 0], sizes = [1, 32], strides = [1, 1]} : vector<2x32xf32> to vector<1x32xf32>
    %384 = vector.extract_strided_slice %259 {offsets = [1, 0], sizes = [1, 32], strides = [1, 1]} : vector<2x32xf32> to vector<1x32xf32>
    %385 = vector.extract_strided_slice %296 {offsets = [1, 0], sizes = [1, 32], strides = [1, 1]} : vector<2x32xf32> to vector<1x32xf32>
    %386 = vector.extract_strided_slice %333 {offsets = [1, 0], sizes = [1, 32], strides = [1, 1]} : vector<2x32xf32> to vector<1x32xf32>
    %387 = vector.extract_strided_slice %370 {offsets = [1, 0], sizes = [1, 32], strides = [1, 1]} : vector<2x32xf32> to vector<1x32xf32>
    %388 = tpu.concatenate %380, %381, %382, %383, %384, %385, %386, %387 in 0 : vector<1x32xf32>, vector<1x32xf32>, vector<1x32xf32>, vector<1x32xf32>, vector<1x32xf32>, vector<1x32xf32>, vector<1x32xf32>, vector<1x32xf32> -> vector<8x32xf32>
    %389 = tpu.concatenate %379, %388 in 0 : vector<8x32xf32>, vector<8x32xf32> -> vector<16x32xf32>
    %cst_78 = arith.constant dense<0.000000e+00> : vector<16x32xf32>
    %390 = tpu.matmul %389, %13, %cst_78 {dimension_numbers = #tpu.dot_dimension_numbers<[1], [0], [0], [1], [0, 0, 1, 1], [], []>} : vector<16x32xf32>, vector<32x32xf32>, vector<16x32xf32> -> vector<16x32xf32>
    %391 = vector.shape_cast %390 : vector<16x32xf32> to vector<2x8x32xf32>
    %cst_79 = arith.constant dense<0.000000e+00> : vector<2x32xf32>
    %392 = tpu.matmul %370, %14, %cst_79 {dimension_numbers = #tpu.dot_dimension_numbers<[1], [0], [0], [1], [0, 0, 1, 1], [], []>} : vector<2x32xf32>, vector<32x32xf32>, vector<2x32xf32> -> vector<2x32xf32>
    %393 = vector.shape_cast %392 : vector<2x32xf32> to vector<2x1x32xf32>
    %394 = vector.broadcast %393 : vector<2x1x32xf32> to vector<2x8x32xf32>
    %395 = arith.addf %391, %394 : vector<2x8x32xf32>
    %396 = math.tanh %395 : vector<2x8x32xf32>
    %397 = vector.shape_cast %16 : vector<1x32xf32> to vector<1x1x32xf32>
    %398 = vector.broadcast %397 : vector<1x1x32xf32> to vector<2x8x32xf32>
    %399 = arith.mulf %396, %398 : vector<2x8x32xf32>
    %cst_80 = arith.constant dense<0.000000e+00> : vector<2x8xf32>
    %400 = vector.multi_reduction <add>, %399, %cst_80 [2] : vector<2x8x32xf32> to vector<2x8xf32>
    %cst_81 = arith.constant dense<0xFF800000> : vector<2xf32>
    %401 = vector.multi_reduction <maximumf>, %400, %cst_81 [1] : vector<2x8xf32> to vector<2xf32>
    %402 = vector.shape_cast %401 : vector<2xf32> to vector<2x1xf32>
    %403 = vector.broadcast %402 : vector<2x1xf32> to vector<2x8xf32>
    %404 = arith.subf %400, %403 : vector<2x8xf32>
    %405 = math.exp %404 : vector<2x8xf32>
    %cst_82 = arith.constant dense<0.000000e+00> : vector<2xf32>
    %406 = vector.multi_reduction <add>, %405, %cst_82 [1] : vector<2x8xf32> to vector<2xf32>
    %407 = vector.shape_cast %406 : vector<2xf32> to vector<2x1xf32>
    %408 = vector.broadcast %407 : vector<2x1xf32> to vector<2x8xf32>
    %409 = arith.divf %405, %408 : vector<2x8xf32>
    %410 = vector.extract_strided_slice %409 {offsets = [0, 0], sizes = [2, 1], strides = [1, 1]} : vector<2x8xf32> to vector<2x1xf32>
    %411 = vector.broadcast %410 : vector<2x1xf32> to vector<2x32xf32>
    %412 = arith.mulf %411, %111 : vector<2x32xf32>
    %413 = vector.extract_strided_slice %409 {offsets = [0, 1], sizes = [2, 1], strides = [1, 1]} : vector<2x8xf32> to vector<2x1xf32>
    %414 = vector.broadcast %413 : vector<2x1xf32> to vector<2x32xf32>
    %415 = arith.mulf %414, %148 : vector<2x32xf32>
    %416 = arith.addf %412, %415 : vector<2x32xf32>
    %417 = vector.extract_strided_slice %409 {offsets = [0, 2], sizes = [2, 1], strides = [1, 1]} : vector<2x8xf32> to vector<2x1xf32>
    %418 = vector.broadcast %417 : vector<2x1xf32> to vector<2x32xf32>
    %419 = arith.mulf %418, %185 : vector<2x32xf32>
    %420 = arith.addf %416, %419 : vector<2x32xf32>
    %421 = vector.extract_strided_slice %409 {offsets = [0, 3], sizes = [2, 1], strides = [1, 1]} : vector<2x8xf32> to vector<2x1xf32>
    %422 = vector.broadcast %421 : vector<2x1xf32> to vector<2x32xf32>
    %423 = arith.mulf %422, %222 : vector<2x32xf32>
    %424 = arith.addf %420, %423 : vector<2x32xf32>
    %425 = vector.extract_strided_slice %409 {offsets = [0, 4], sizes = [2, 1], strides = [1, 1]} : vector<2x8xf32> to vector<2x1xf32>
    %426 = vector.broadcast %425 : vector<2x1xf32> to vector<2x32xf32>
    %427 = arith.mulf %426, %259 : vector<2x32xf32>
    %428 = arith.addf %424, %427 : vector<2x32xf32>
    %429 = vector.extract_strided_slice %409 {offsets = [0, 5], sizes = [2, 1], strides = [1, 1]} : vector<2x8xf32> to vector<2x1xf32>
    %430 = vector.broadcast %429 : vector<2x1xf32> to vector<2x32xf32>
    %431 = arith.mulf %430, %296 : vector<2x32xf32>
    %432 = arith.addf %428, %431 : vector<2x32xf32>
    %433 = vector.extract_strided_slice %409 {offsets = [0, 6], sizes = [2, 1], strides = [1, 1]} : vector<2x8xf32> to vector<2x1xf32>
    %434 = vector.broadcast %433 : vector<2x1xf32> to vector<2x32xf32>
    %435 = arith.mulf %434, %333 : vector<2x32xf32>
    %436 = arith.addf %432, %435 : vector<2x32xf32>
    %437 = vector.extract_strided_slice %409 {offsets = [0, 7], sizes = [2, 1], strides = [1, 1]} : vector<2x8xf32> to vector<2x1xf32>
    %438 = vector.broadcast %437 : vector<2x1xf32> to vector<2x32xf32>
    %439 = arith.mulf %438, %370 : vector<2x32xf32>
    %440 = arith.addf %436, %439 : vector<2x32xf32>
    %cst_83 = arith.constant dense<0.000000e+00> : vector<2x128xf32>
    %441 = tpu.matmul %440, %4, %cst_83 {dimension_numbers = #tpu.dot_dimension_numbers<[1], [0], [0], [1], [0, 0, 1, 1], [], []>} : vector<2x32xf32>, vector<32x128xf32>, vector<2x128xf32> -> vector<2x128xf32>
    %cst_84 = arith.constant dense<0.000000e+00> : vector<2x128xf32>
    %442 = tpu.matmul %350, %6, %cst_84 {dimension_numbers = #tpu.dot_dimension_numbers<[1], [0], [0], [1], [0, 0, 1, 1], [], []>} : vector<2x32xf32>, vector<32x128xf32>, vector<2x128xf32> -> vector<2x128xf32>
    %443 = arith.addf %441, %442 : vector<2x128xf32>
    %444 = vector.broadcast %10 : vector<1x128xf32> to vector<2x128xf32>
    %445 = arith.addf %443, %444 : vector<2x128xf32>
    %446 = arith.negf %445 : vector<2x128xf32>
    %447 = math.exp %446 : vector<2x128xf32>
    %cst_85 = arith.constant 1.000000e+00 : f32
    %448 = vector.broadcast %cst_85 : f32 to vector<2x128xf32>
    %449 = arith.addf %448, %447 : vector<2x128xf32>
    %450 = arith.divf %448, %449 : vector<2x128xf32>
    %451 = math.tanh %445 : vector<2x128xf32>
    %452 = vector.extract_strided_slice %450 {offsets = [0, 0], sizes = [2, 32], strides = [1, 1]} : vector<2x128xf32> to vector<2x32xf32>
    %453 = vector.extract_strided_slice %450 {offsets = [0, 32], sizes = [2, 32], strides = [1, 1]} : vector<2x128xf32> to vector<2x32xf32>
    %454 = vector.extract_strided_slice %451 {offsets = [0, 64], sizes = [2, 32], strides = [1, 1]} : vector<2x128xf32> to vector<2x32xf32>
    %455 = vector.extract_strided_slice %450 {offsets = [0, 96], sizes = [2, 32], strides = [1, 1]} : vector<2x128xf32> to vector<2x32xf32>
    %456 = arith.mulf %453, %348 : vector<2x32xf32>
    %457 = arith.mulf %452, %454 : vector<2x32xf32>
    %458 = arith.addf %456, %457 : vector<2x32xf32>
    %459 = math.tanh %458 : vector<2x32xf32>
    %460 = arith.mulf %455, %459 : vector<2x32xf32>
    %cst_86 = arith.constant dense<0.000000e+00> : vector<2x128xf32>
    %461 = tpu.matmul %460, %5, %cst_86 {dimension_numbers = #tpu.dot_dimension_numbers<[1], [0], [0], [1], [0, 0, 1, 1], [], []>} : vector<2x32xf32>, vector<32x128xf32>, vector<2x128xf32> -> vector<2x128xf32>
    %cst_87 = arith.constant dense<0.000000e+00> : vector<2x128xf32>
    %462 = tpu.matmul %370, %7, %cst_87 {dimension_numbers = #tpu.dot_dimension_numbers<[1], [0], [0], [1], [0, 0, 1, 1], [], []>} : vector<2x32xf32>, vector<32x128xf32>, vector<2x128xf32> -> vector<2x128xf32>
    %463 = arith.addf %461, %462 : vector<2x128xf32>
    %464 = vector.broadcast %11 : vector<1x128xf32> to vector<2x128xf32>
    %465 = arith.addf %463, %464 : vector<2x128xf32>
    %466 = arith.negf %465 : vector<2x128xf32>
    %467 = math.exp %466 : vector<2x128xf32>
    %cst_88 = arith.constant 1.000000e+00 : f32
    %468 = vector.broadcast %cst_88 : f32 to vector<2x128xf32>
    %469 = arith.addf %468, %467 : vector<2x128xf32>
    %470 = arith.divf %468, %469 : vector<2x128xf32>
    %471 = math.tanh %465 : vector<2x128xf32>
    %472 = vector.extract_strided_slice %470 {offsets = [0, 0], sizes = [2, 32], strides = [1, 1]} : vector<2x128xf32> to vector<2x32xf32>
    %473 = vector.extract_strided_slice %470 {offsets = [0, 32], sizes = [2, 32], strides = [1, 1]} : vector<2x128xf32> to vector<2x32xf32>
    %474 = vector.extract_strided_slice %471 {offsets = [0, 64], sizes = [2, 32], strides = [1, 1]} : vector<2x128xf32> to vector<2x32xf32>
    %475 = vector.extract_strided_slice %470 {offsets = [0, 96], sizes = [2, 32], strides = [1, 1]} : vector<2x128xf32> to vector<2x32xf32>
    %476 = arith.mulf %473, %368 : vector<2x32xf32>
    %477 = arith.mulf %472, %474 : vector<2x32xf32>
    %478 = arith.addf %476, %477 : vector<2x32xf32>
    %479 = math.tanh %478 : vector<2x32xf32>
    %480 = arith.mulf %475, %479 : vector<2x32xf32>
    %cst_89 = arith.constant dense<0.000000e+00> : vector<2x32xf32>
    %481 = tpu.matmul %480, %14, %cst_89 {dimension_numbers = #tpu.dot_dimension_numbers<[1], [0], [0], [1], [0, 0, 1, 1], [], []>} : vector<2x32xf32>, vector<32x32xf32>, vector<2x32xf32> -> vector<2x32xf32>
    %482 = vector.shape_cast %481 : vector<2x32xf32> to vector<2x1x32xf32>
    %483 = vector.broadcast %482 : vector<2x1x32xf32> to vector<2x8x32xf32>
    %484 = arith.addf %391, %483 : vector<2x8x32xf32>
    %485 = math.tanh %484 : vector<2x8x32xf32>
    %486 = vector.shape_cast %16 : vector<1x32xf32> to vector<1x1x32xf32>
    %487 = vector.broadcast %486 : vector<1x1x32xf32> to vector<2x8x32xf32>
    %488 = arith.mulf %485, %487 : vector<2x8x32xf32>
    %cst_90 = arith.constant dense<0.000000e+00> : vector<2x8xf32>
    %489 = vector.multi_reduction <add>, %488, %cst_90 [2] : vector<2x8x32xf32> to vector<2x8xf32>
    %cst_91 = arith.constant dense<0xFF800000> : vector<2xf32>
    %490 = vector.multi_reduction <maximumf>, %489, %cst_91 [1] : vector<2x8xf32> to vector<2xf32>
    %491 = vector.shape_cast %490 : vector<2xf32> to vector<2x1xf32>
    %492 = vector.broadcast %491 : vector<2x1xf32> to vector<2x8xf32>
    %493 = arith.subf %489, %492 : vector<2x8xf32>
    %494 = math.exp %493 : vector<2x8xf32>
    %cst_92 = arith.constant dense<0.000000e+00> : vector<2xf32>
    %495 = vector.multi_reduction <add>, %494, %cst_92 [1] : vector<2x8xf32> to vector<2xf32>
    %496 = vector.shape_cast %495 : vector<2xf32> to vector<2x1xf32>
    %497 = vector.broadcast %496 : vector<2x1xf32> to vector<2x8xf32>
    %498 = arith.divf %494, %497 : vector<2x8xf32>
    %499 = vector.extract_strided_slice %498 {offsets = [0, 0], sizes = [2, 1], strides = [1, 1]} : vector<2x8xf32> to vector<2x1xf32>
    %500 = vector.broadcast %499 : vector<2x1xf32> to vector<2x32xf32>
    %501 = arith.mulf %500, %111 : vector<2x32xf32>
    %502 = vector.extract_strided_slice %498 {offsets = [0, 1], sizes = [2, 1], strides = [1, 1]} : vector<2x8xf32> to vector<2x1xf32>
    %503 = vector.broadcast %502 : vector<2x1xf32> to vector<2x32xf32>
    %504 = arith.mulf %503, %148 : vector<2x32xf32>
    %505 = arith.addf %501, %504 : vector<2x32xf32>
    %506 = vector.extract_strided_slice %498 {offsets = [0, 2], sizes = [2, 1], strides = [1, 1]} : vector<2x8xf32> to vector<2x1xf32>
    %507 = vector.broadcast %506 : vector<2x1xf32> to vector<2x32xf32>
    %508 = arith.mulf %507, %185 : vector<2x32xf32>
    %509 = arith.addf %505, %508 : vector<2x32xf32>
    %510 = vector.extract_strided_slice %498 {offsets = [0, 3], sizes = [2, 1], strides = [1, 1]} : vector<2x8xf32> to vector<2x1xf32>
    %511 = vector.broadcast %510 : vector<2x1xf32> to vector<2x32xf32>
    %512 = arith.mulf %511, %222 : vector<2x32xf32>
    %513 = arith.addf %509, %512 : vector<2x32xf32>
    %514 = vector.extract_strided_slice %498 {offsets = [0, 4], sizes = [2, 1], strides = [1, 1]} : vector<2x8xf32> to vector<2x1xf32>
    %515 = vector.broadcast %514 : vector<2x1xf32> to vector<2x32xf32>
    %516 = arith.mulf %515, %259 : vector<2x32xf32>
    %517 = arith.addf %513, %516 : vector<2x32xf32>
    %518 = vector.extract_strided_slice %498 {offsets = [0, 5], sizes = [2, 1], strides = [1, 1]} : vector<2x8xf32> to vector<2x1xf32>
    %519 = vector.broadcast %518 : vector<2x1xf32> to vector<2x32xf32>
    %520 = arith.mulf %519, %296 : vector<2x32xf32>
    %521 = arith.addf %517, %520 : vector<2x32xf32>
    %522 = vector.extract_strided_slice %498 {offsets = [0, 6], sizes = [2, 1], strides = [1, 1]} : vector<2x8xf32> to vector<2x1xf32>
    %523 = vector.broadcast %522 : vector<2x1xf32> to vector<2x32xf32>
    %524 = arith.mulf %523, %333 : vector<2x32xf32>
    %525 = arith.addf %521, %524 : vector<2x32xf32>
    %526 = vector.extract_strided_slice %498 {offsets = [0, 7], sizes = [2, 1], strides = [1, 1]} : vector<2x8xf32> to vector<2x1xf32>
    %527 = vector.broadcast %526 : vector<2x1xf32> to vector<2x32xf32>
    %528 = arith.mulf %527, %370 : vector<2x32xf32>
    %529 = arith.addf %525, %528 : vector<2x32xf32>
    %cst_93 = arith.constant dense<0.000000e+00> : vector<2x128xf32>
    %530 = tpu.matmul %529, %4, %cst_93 {dimension_numbers = #tpu.dot_dimension_numbers<[1], [0], [0], [1], [0, 0, 1, 1], [], []>} : vector<2x32xf32>, vector<32x128xf32>, vector<2x128xf32> -> vector<2x128xf32>
    %cst_94 = arith.constant dense<0.000000e+00> : vector<2x128xf32>
    %531 = tpu.matmul %460, %6, %cst_94 {dimension_numbers = #tpu.dot_dimension_numbers<[1], [0], [0], [1], [0, 0, 1, 1], [], []>} : vector<2x32xf32>, vector<32x128xf32>, vector<2x128xf32> -> vector<2x128xf32>
    %532 = arith.addf %530, %531 : vector<2x128xf32>
    %533 = vector.broadcast %10 : vector<1x128xf32> to vector<2x128xf32>
    %534 = arith.addf %532, %533 : vector<2x128xf32>
    %535 = arith.negf %534 : vector<2x128xf32>
    %536 = math.exp %535 : vector<2x128xf32>
    %cst_95 = arith.constant 1.000000e+00 : f32
    %537 = vector.broadcast %cst_95 : f32 to vector<2x128xf32>
    %538 = arith.addf %537, %536 : vector<2x128xf32>
    %539 = arith.divf %537, %538 : vector<2x128xf32>
    %540 = math.tanh %534 : vector<2x128xf32>
    %541 = vector.extract_strided_slice %539 {offsets = [0, 0], sizes = [2, 32], strides = [1, 1]} : vector<2x128xf32> to vector<2x32xf32>
    %542 = vector.extract_strided_slice %539 {offsets = [0, 32], sizes = [2, 32], strides = [1, 1]} : vector<2x128xf32> to vector<2x32xf32>
    %543 = vector.extract_strided_slice %540 {offsets = [0, 64], sizes = [2, 32], strides = [1, 1]} : vector<2x128xf32> to vector<2x32xf32>
    %544 = vector.extract_strided_slice %539 {offsets = [0, 96], sizes = [2, 32], strides = [1, 1]} : vector<2x128xf32> to vector<2x32xf32>
    %545 = arith.mulf %542, %458 : vector<2x32xf32>
    %546 = arith.mulf %541, %543 : vector<2x32xf32>
    %547 = arith.addf %545, %546 : vector<2x32xf32>
    %548 = math.tanh %547 : vector<2x32xf32>
    %549 = arith.mulf %544, %548 : vector<2x32xf32>
    %cst_96 = arith.constant dense<0.000000e+00> : vector<2x128xf32>
    %550 = tpu.matmul %549, %5, %cst_96 {dimension_numbers = #tpu.dot_dimension_numbers<[1], [0], [0], [1], [0, 0, 1, 1], [], []>} : vector<2x32xf32>, vector<32x128xf32>, vector<2x128xf32> -> vector<2x128xf32>
    %cst_97 = arith.constant dense<0.000000e+00> : vector<2x128xf32>
    %551 = tpu.matmul %480, %7, %cst_97 {dimension_numbers = #tpu.dot_dimension_numbers<[1], [0], [0], [1], [0, 0, 1, 1], [], []>} : vector<2x32xf32>, vector<32x128xf32>, vector<2x128xf32> -> vector<2x128xf32>
    %552 = arith.addf %550, %551 : vector<2x128xf32>
    %553 = vector.broadcast %11 : vector<1x128xf32> to vector<2x128xf32>
    %554 = arith.addf %552, %553 : vector<2x128xf32>
    %555 = arith.negf %554 : vector<2x128xf32>
    %556 = math.exp %555 : vector<2x128xf32>
    %cst_98 = arith.constant 1.000000e+00 : f32
    %557 = vector.broadcast %cst_98 : f32 to vector<2x128xf32>
    %558 = arith.addf %557, %556 : vector<2x128xf32>
    %559 = arith.divf %557, %558 : vector<2x128xf32>
    %560 = math.tanh %554 : vector<2x128xf32>
    %561 = vector.extract_strided_slice %559 {offsets = [0, 0], sizes = [2, 32], strides = [1, 1]} : vector<2x128xf32> to vector<2x32xf32>
    %562 = vector.extract_strided_slice %559 {offsets = [0, 32], sizes = [2, 32], strides = [1, 1]} : vector<2x128xf32> to vector<2x32xf32>
    %563 = vector.extract_strided_slice %560 {offsets = [0, 64], sizes = [2, 32], strides = [1, 1]} : vector<2x128xf32> to vector<2x32xf32>
    %564 = vector.extract_strided_slice %559 {offsets = [0, 96], sizes = [2, 32], strides = [1, 1]} : vector<2x128xf32> to vector<2x32xf32>
    %565 = arith.mulf %562, %478 : vector<2x32xf32>
    %566 = arith.mulf %561, %563 : vector<2x32xf32>
    %567 = arith.addf %565, %566 : vector<2x32xf32>
    %568 = math.tanh %567 : vector<2x32xf32>
    %569 = arith.mulf %564, %568 : vector<2x32xf32>
    %cst_99 = arith.constant dense<0.000000e+00> : vector<2x32xf32>
    %570 = tpu.matmul %569, %14, %cst_99 {dimension_numbers = #tpu.dot_dimension_numbers<[1], [0], [0], [1], [0, 0, 1, 1], [], []>} : vector<2x32xf32>, vector<32x32xf32>, vector<2x32xf32> -> vector<2x32xf32>
    %571 = vector.shape_cast %570 : vector<2x32xf32> to vector<2x1x32xf32>
    %572 = vector.broadcast %571 : vector<2x1x32xf32> to vector<2x8x32xf32>
    %573 = arith.addf %391, %572 : vector<2x8x32xf32>
    %574 = math.tanh %573 : vector<2x8x32xf32>
    %575 = vector.shape_cast %16 : vector<1x32xf32> to vector<1x1x32xf32>
    %576 = vector.broadcast %575 : vector<1x1x32xf32> to vector<2x8x32xf32>
    %577 = arith.mulf %574, %576 : vector<2x8x32xf32>
    %cst_100 = arith.constant dense<0.000000e+00> : vector<2x8xf32>
    %578 = vector.multi_reduction <add>, %577, %cst_100 [2] : vector<2x8x32xf32> to vector<2x8xf32>
    %cst_101 = arith.constant dense<0xFF800000> : vector<2xf32>
    %579 = vector.multi_reduction <maximumf>, %578, %cst_101 [1] : vector<2x8xf32> to vector<2xf32>
    %580 = vector.shape_cast %579 : vector<2xf32> to vector<2x1xf32>
    %581 = vector.broadcast %580 : vector<2x1xf32> to vector<2x8xf32>
    %582 = arith.subf %578, %581 : vector<2x8xf32>
    %583 = math.exp %582 : vector<2x8xf32>
    %cst_102 = arith.constant dense<0.000000e+00> : vector<2xf32>
    %584 = vector.multi_reduction <add>, %583, %cst_102 [1] : vector<2x8xf32> to vector<2xf32>
    %585 = vector.shape_cast %584 : vector<2xf32> to vector<2x1xf32>
    %586 = vector.broadcast %585 : vector<2x1xf32> to vector<2x8xf32>
    %587 = arith.divf %583, %586 : vector<2x8xf32>
    %588 = vector.extract_strided_slice %587 {offsets = [0, 0], sizes = [2, 1], strides = [1, 1]} : vector<2x8xf32> to vector<2x1xf32>
    %589 = vector.broadcast %588 : vector<2x1xf32> to vector<2x32xf32>
    %590 = arith.mulf %589, %111 : vector<2x32xf32>
    %591 = vector.extract_strided_slice %587 {offsets = [0, 1], sizes = [2, 1], strides = [1, 1]} : vector<2x8xf32> to vector<2x1xf32>
    %592 = vector.broadcast %591 : vector<2x1xf32> to vector<2x32xf32>
    %593 = arith.mulf %592, %148 : vector<2x32xf32>
    %594 = arith.addf %590, %593 : vector<2x32xf32>
    %595 = vector.extract_strided_slice %587 {offsets = [0, 2], sizes = [2, 1], strides = [1, 1]} : vector<2x8xf32> to vector<2x1xf32>
    %596 = vector.broadcast %595 : vector<2x1xf32> to vector<2x32xf32>
    %597 = arith.mulf %596, %185 : vector<2x32xf32>
    %598 = arith.addf %594, %597 : vector<2x32xf32>
    %599 = vector.extract_strided_slice %587 {offsets = [0, 3], sizes = [2, 1], strides = [1, 1]} : vector<2x8xf32> to vector<2x1xf32>
    %600 = vector.broadcast %599 : vector<2x1xf32> to vector<2x32xf32>
    %601 = arith.mulf %600, %222 : vector<2x32xf32>
    %602 = arith.addf %598, %601 : vector<2x32xf32>
    %603 = vector.extract_strided_slice %587 {offsets = [0, 4], sizes = [2, 1], strides = [1, 1]} : vector<2x8xf32> to vector<2x1xf32>
    %604 = vector.broadcast %603 : vector<2x1xf32> to vector<2x32xf32>
    %605 = arith.mulf %604, %259 : vector<2x32xf32>
    %606 = arith.addf %602, %605 : vector<2x32xf32>
    %607 = vector.extract_strided_slice %587 {offsets = [0, 5], sizes = [2, 1], strides = [1, 1]} : vector<2x8xf32> to vector<2x1xf32>
    %608 = vector.broadcast %607 : vector<2x1xf32> to vector<2x32xf32>
    %609 = arith.mulf %608, %296 : vector<2x32xf32>
    %610 = arith.addf %606, %609 : vector<2x32xf32>
    %611 = vector.extract_strided_slice %587 {offsets = [0, 6], sizes = [2, 1], strides = [1, 1]} : vector<2x8xf32> to vector<2x1xf32>
    %612 = vector.broadcast %611 : vector<2x1xf32> to vector<2x32xf32>
    %613 = arith.mulf %612, %333 : vector<2x32xf32>
    %614 = arith.addf %610, %613 : vector<2x32xf32>
    %615 = vector.extract_strided_slice %587 {offsets = [0, 7], sizes = [2, 1], strides = [1, 1]} : vector<2x8xf32> to vector<2x1xf32>
    %616 = vector.broadcast %615 : vector<2x1xf32> to vector<2x32xf32>
    %617 = arith.mulf %616, %370 : vector<2x32xf32>
    %618 = arith.addf %614, %617 : vector<2x32xf32>
    %cst_103 = arith.constant dense<0.000000e+00> : vector<2x128xf32>
    %619 = tpu.matmul %618, %4, %cst_103 {dimension_numbers = #tpu.dot_dimension_numbers<[1], [0], [0], [1], [0, 0, 1, 1], [], []>} : vector<2x32xf32>, vector<32x128xf32>, vector<2x128xf32> -> vector<2x128xf32>
    %cst_104 = arith.constant dense<0.000000e+00> : vector<2x128xf32>
    %620 = tpu.matmul %549, %6, %cst_104 {dimension_numbers = #tpu.dot_dimension_numbers<[1], [0], [0], [1], [0, 0, 1, 1], [], []>} : vector<2x32xf32>, vector<32x128xf32>, vector<2x128xf32> -> vector<2x128xf32>
    %621 = arith.addf %619, %620 : vector<2x128xf32>
    %622 = vector.broadcast %10 : vector<1x128xf32> to vector<2x128xf32>
    %623 = arith.addf %621, %622 : vector<2x128xf32>
    %624 = arith.negf %623 : vector<2x128xf32>
    %625 = math.exp %624 : vector<2x128xf32>
    %cst_105 = arith.constant 1.000000e+00 : f32
    %626 = vector.broadcast %cst_105 : f32 to vector<2x128xf32>
    %627 = arith.addf %626, %625 : vector<2x128xf32>
    %628 = arith.divf %626, %627 : vector<2x128xf32>
    %629 = math.tanh %623 : vector<2x128xf32>
    %630 = vector.extract_strided_slice %628 {offsets = [0, 0], sizes = [2, 32], strides = [1, 1]} : vector<2x128xf32> to vector<2x32xf32>
    %631 = vector.extract_strided_slice %628 {offsets = [0, 32], sizes = [2, 32], strides = [1, 1]} : vector<2x128xf32> to vector<2x32xf32>
    %632 = vector.extract_strided_slice %629 {offsets = [0, 64], sizes = [2, 32], strides = [1, 1]} : vector<2x128xf32> to vector<2x32xf32>
    %633 = vector.extract_strided_slice %628 {offsets = [0, 96], sizes = [2, 32], strides = [1, 1]} : vector<2x128xf32> to vector<2x32xf32>
    %634 = arith.mulf %631, %547 : vector<2x32xf32>
    %635 = arith.mulf %630, %632 : vector<2x32xf32>
    %636 = arith.addf %634, %635 : vector<2x32xf32>
    %637 = math.tanh %636 : vector<2x32xf32>
    %638 = arith.mulf %633, %637 : vector<2x32xf32>
    %cst_106 = arith.constant dense<0.000000e+00> : vector<2x128xf32>
    %639 = tpu.matmul %638, %5, %cst_106 {dimension_numbers = #tpu.dot_dimension_numbers<[1], [0], [0], [1], [0, 0, 1, 1], [], []>} : vector<2x32xf32>, vector<32x128xf32>, vector<2x128xf32> -> vector<2x128xf32>
    %cst_107 = arith.constant dense<0.000000e+00> : vector<2x128xf32>
    %640 = tpu.matmul %569, %7, %cst_107 {dimension_numbers = #tpu.dot_dimension_numbers<[1], [0], [0], [1], [0, 0, 1, 1], [], []>} : vector<2x32xf32>, vector<32x128xf32>, vector<2x128xf32> -> vector<2x128xf32>
    %641 = arith.addf %639, %640 : vector<2x128xf32>
    %642 = vector.broadcast %11 : vector<1x128xf32> to vector<2x128xf32>
    %643 = arith.addf %641, %642 : vector<2x128xf32>
    %644 = arith.negf %643 : vector<2x128xf32>
    %645 = math.exp %644 : vector<2x128xf32>
    %cst_108 = arith.constant 1.000000e+00 : f32
    %646 = vector.broadcast %cst_108 : f32 to vector<2x128xf32>
    %647 = arith.addf %646, %645 : vector<2x128xf32>
    %648 = arith.divf %646, %647 : vector<2x128xf32>
    %649 = math.tanh %643 : vector<2x128xf32>
    %650 = vector.extract_strided_slice %648 {offsets = [0, 0], sizes = [2, 32], strides = [1, 1]} : vector<2x128xf32> to vector<2x32xf32>
    %651 = vector.extract_strided_slice %648 {offsets = [0, 32], sizes = [2, 32], strides = [1, 1]} : vector<2x128xf32> to vector<2x32xf32>
    %652 = vector.extract_strided_slice %649 {offsets = [0, 64], sizes = [2, 32], strides = [1, 1]} : vector<2x128xf32> to vector<2x32xf32>
    %653 = vector.extract_strided_slice %648 {offsets = [0, 96], sizes = [2, 32], strides = [1, 1]} : vector<2x128xf32> to vector<2x32xf32>
    %654 = arith.mulf %651, %567 : vector<2x32xf32>
    %655 = arith.mulf %650, %652 : vector<2x32xf32>
    %656 = arith.addf %654, %655 : vector<2x32xf32>
    %657 = math.tanh %656 : vector<2x32xf32>
    %658 = arith.mulf %653, %657 : vector<2x32xf32>
    %cst_109 = arith.constant dense<0.000000e+00> : vector<2x32xf32>
    %659 = tpu.matmul %658, %14, %cst_109 {dimension_numbers = #tpu.dot_dimension_numbers<[1], [0], [0], [1], [0, 0, 1, 1], [], []>} : vector<2x32xf32>, vector<32x32xf32>, vector<2x32xf32> -> vector<2x32xf32>
    %660 = vector.shape_cast %659 : vector<2x32xf32> to vector<2x1x32xf32>
    %661 = vector.broadcast %660 : vector<2x1x32xf32> to vector<2x8x32xf32>
    %662 = arith.addf %391, %661 : vector<2x8x32xf32>
    %663 = math.tanh %662 : vector<2x8x32xf32>
    %664 = vector.shape_cast %16 : vector<1x32xf32> to vector<1x1x32xf32>
    %665 = vector.broadcast %664 : vector<1x1x32xf32> to vector<2x8x32xf32>
    %666 = arith.mulf %663, %665 : vector<2x8x32xf32>
    %cst_110 = arith.constant dense<0.000000e+00> : vector<2x8xf32>
    %667 = vector.multi_reduction <add>, %666, %cst_110 [2] : vector<2x8x32xf32> to vector<2x8xf32>
    %cst_111 = arith.constant dense<0xFF800000> : vector<2xf32>
    %668 = vector.multi_reduction <maximumf>, %667, %cst_111 [1] : vector<2x8xf32> to vector<2xf32>
    %669 = vector.shape_cast %668 : vector<2xf32> to vector<2x1xf32>
    %670 = vector.broadcast %669 : vector<2x1xf32> to vector<2x8xf32>
    %671 = arith.subf %667, %670 : vector<2x8xf32>
    %672 = math.exp %671 : vector<2x8xf32>
    %cst_112 = arith.constant dense<0.000000e+00> : vector<2xf32>
    %673 = vector.multi_reduction <add>, %672, %cst_112 [1] : vector<2x8xf32> to vector<2xf32>
    %674 = vector.shape_cast %673 : vector<2xf32> to vector<2x1xf32>
    %675 = vector.broadcast %674 : vector<2x1xf32> to vector<2x8xf32>
    %676 = arith.divf %672, %675 : vector<2x8xf32>
    %677 = vector.extract_strided_slice %676 {offsets = [0, 0], sizes = [2, 1], strides = [1, 1]} : vector<2x8xf32> to vector<2x1xf32>
    %678 = vector.broadcast %677 : vector<2x1xf32> to vector<2x32xf32>
    %679 = arith.mulf %678, %111 : vector<2x32xf32>
    %680 = vector.extract_strided_slice %676 {offsets = [0, 1], sizes = [2, 1], strides = [1, 1]} : vector<2x8xf32> to vector<2x1xf32>
    %681 = vector.broadcast %680 : vector<2x1xf32> to vector<2x32xf32>
    %682 = arith.mulf %681, %148 : vector<2x32xf32>
    %683 = arith.addf %679, %682 : vector<2x32xf32>
    %684 = vector.extract_strided_slice %676 {offsets = [0, 2], sizes = [2, 1], strides = [1, 1]} : vector<2x8xf32> to vector<2x1xf32>
    %685 = vector.broadcast %684 : vector<2x1xf32> to vector<2x32xf32>
    %686 = arith.mulf %685, %185 : vector<2x32xf32>
    %687 = arith.addf %683, %686 : vector<2x32xf32>
    %688 = vector.extract_strided_slice %676 {offsets = [0, 3], sizes = [2, 1], strides = [1, 1]} : vector<2x8xf32> to vector<2x1xf32>
    %689 = vector.broadcast %688 : vector<2x1xf32> to vector<2x32xf32>
    %690 = arith.mulf %689, %222 : vector<2x32xf32>
    %691 = arith.addf %687, %690 : vector<2x32xf32>
    %692 = vector.extract_strided_slice %676 {offsets = [0, 4], sizes = [2, 1], strides = [1, 1]} : vector<2x8xf32> to vector<2x1xf32>
    %693 = vector.broadcast %692 : vector<2x1xf32> to vector<2x32xf32>
    %694 = arith.mulf %693, %259 : vector<2x32xf32>
    %695 = arith.addf %691, %694 : vector<2x32xf32>
    %696 = vector.extract_strided_slice %676 {offsets = [0, 5], sizes = [2, 1], strides = [1, 1]} : vector<2x8xf32> to vector<2x1xf32>
    %697 = vector.broadcast %696 : vector<2x1xf32> to vector<2x32xf32>
    %698 = arith.mulf %697, %296 : vector<2x32xf32>
    %699 = arith.addf %695, %698 : vector<2x32xf32>
    %700 = vector.extract_strided_slice %676 {offsets = [0, 6], sizes = [2, 1], strides = [1, 1]} : vector<2x8xf32> to vector<2x1xf32>
    %701 = vector.broadcast %700 : vector<2x1xf32> to vector<2x32xf32>
    %702 = arith.mulf %701, %333 : vector<2x32xf32>
    %703 = arith.addf %699, %702 : vector<2x32xf32>
    %704 = vector.extract_strided_slice %676 {offsets = [0, 7], sizes = [2, 1], strides = [1, 1]} : vector<2x8xf32> to vector<2x1xf32>
    %705 = vector.broadcast %704 : vector<2x1xf32> to vector<2x32xf32>
    %706 = arith.mulf %705, %370 : vector<2x32xf32>
    %707 = arith.addf %703, %706 : vector<2x32xf32>
    %cst_113 = arith.constant dense<0.000000e+00> : vector<2x128xf32>
    %708 = tpu.matmul %707, %4, %cst_113 {dimension_numbers = #tpu.dot_dimension_numbers<[1], [0], [0], [1], [0, 0, 1, 1], [], []>} : vector<2x32xf32>, vector<32x128xf32>, vector<2x128xf32> -> vector<2x128xf32>
    %cst_114 = arith.constant dense<0.000000e+00> : vector<2x128xf32>
    %709 = tpu.matmul %638, %6, %cst_114 {dimension_numbers = #tpu.dot_dimension_numbers<[1], [0], [0], [1], [0, 0, 1, 1], [], []>} : vector<2x32xf32>, vector<32x128xf32>, vector<2x128xf32> -> vector<2x128xf32>
    %710 = arith.addf %708, %709 : vector<2x128xf32>
    %711 = vector.broadcast %10 : vector<1x128xf32> to vector<2x128xf32>
    %712 = arith.addf %710, %711 : vector<2x128xf32>
    %713 = arith.negf %712 : vector<2x128xf32>
    %714 = math.exp %713 : vector<2x128xf32>
    %cst_115 = arith.constant 1.000000e+00 : f32
    %715 = vector.broadcast %cst_115 : f32 to vector<2x128xf32>
    %716 = arith.addf %715, %714 : vector<2x128xf32>
    %717 = arith.divf %715, %716 : vector<2x128xf32>
    %718 = math.tanh %712 : vector<2x128xf32>
    %719 = vector.extract_strided_slice %717 {offsets = [0, 0], sizes = [2, 32], strides = [1, 1]} : vector<2x128xf32> to vector<2x32xf32>
    %720 = vector.extract_strided_slice %717 {offsets = [0, 32], sizes = [2, 32], strides = [1, 1]} : vector<2x128xf32> to vector<2x32xf32>
    %721 = vector.extract_strided_slice %718 {offsets = [0, 64], sizes = [2, 32], strides = [1, 1]} : vector<2x128xf32> to vector<2x32xf32>
    %722 = vector.extract_strided_slice %717 {offsets = [0, 96], sizes = [2, 32], strides = [1, 1]} : vector<2x128xf32> to vector<2x32xf32>
    %723 = arith.mulf %720, %636 : vector<2x32xf32>
    %724 = arith.mulf %719, %721 : vector<2x32xf32>
    %725 = arith.addf %723, %724 : vector<2x32xf32>
    %726 = math.tanh %725 : vector<2x32xf32>
    %727 = arith.mulf %722, %726 : vector<2x32xf32>
    %cst_116 = arith.constant dense<0.000000e+00> : vector<2x128xf32>
    %728 = tpu.matmul %727, %5, %cst_116 {dimension_numbers = #tpu.dot_dimension_numbers<[1], [0], [0], [1], [0, 0, 1, 1], [], []>} : vector<2x32xf32>, vector<32x128xf32>, vector<2x128xf32> -> vector<2x128xf32>
    %cst_117 = arith.constant dense<0.000000e+00> : vector<2x128xf32>
    %729 = tpu.matmul %658, %7, %cst_117 {dimension_numbers = #tpu.dot_dimension_numbers<[1], [0], [0], [1], [0, 0, 1, 1], [], []>} : vector<2x32xf32>, vector<32x128xf32>, vector<2x128xf32> -> vector<2x128xf32>
    %730 = arith.addf %728, %729 : vector<2x128xf32>
    %731 = vector.broadcast %11 : vector<1x128xf32> to vector<2x128xf32>
    %732 = arith.addf %730, %731 : vector<2x128xf32>
    %733 = arith.negf %732 : vector<2x128xf32>
    %734 = math.exp %733 : vector<2x128xf32>
    %cst_118 = arith.constant 1.000000e+00 : f32
    %735 = vector.broadcast %cst_118 : f32 to vector<2x128xf32>
    %736 = arith.addf %735, %734 : vector<2x128xf32>
    %737 = arith.divf %735, %736 : vector<2x128xf32>
    %738 = math.tanh %732 : vector<2x128xf32>
    %739 = vector.extract_strided_slice %737 {offsets = [0, 0], sizes = [2, 32], strides = [1, 1]} : vector<2x128xf32> to vector<2x32xf32>
    %740 = vector.extract_strided_slice %737 {offsets = [0, 32], sizes = [2, 32], strides = [1, 1]} : vector<2x128xf32> to vector<2x32xf32>
    %741 = vector.extract_strided_slice %738 {offsets = [0, 64], sizes = [2, 32], strides = [1, 1]} : vector<2x128xf32> to vector<2x32xf32>
    %742 = vector.extract_strided_slice %737 {offsets = [0, 96], sizes = [2, 32], strides = [1, 1]} : vector<2x128xf32> to vector<2x32xf32>
    %743 = arith.mulf %740, %656 : vector<2x32xf32>
    %744 = arith.mulf %739, %741 : vector<2x32xf32>
    %745 = arith.addf %743, %744 : vector<2x32xf32>
    %746 = math.tanh %745 : vector<2x32xf32>
    %747 = arith.mulf %742, %746 : vector<2x32xf32>
    %748 = vector.extract_strided_slice %480 {offsets = [0, 0], sizes = [1, 32], strides = [1, 1]} : vector<2x32xf32> to vector<1x32xf32>
    %749 = vector.extract_strided_slice %569 {offsets = [0, 0], sizes = [1, 32], strides = [1, 1]} : vector<2x32xf32> to vector<1x32xf32>
    %750 = vector.extract_strided_slice %658 {offsets = [0, 0], sizes = [1, 32], strides = [1, 1]} : vector<2x32xf32> to vector<1x32xf32>
    %751 = vector.extract_strided_slice %747 {offsets = [0, 0], sizes = [1, 32], strides = [1, 1]} : vector<2x32xf32> to vector<1x32xf32>
    %752 = tpu.concatenate %748, %749, %750, %751 in 0 : vector<1x32xf32>, vector<1x32xf32>, vector<1x32xf32>, vector<1x32xf32> -> vector<4x32xf32>
    %753 = vector.extract_strided_slice %480 {offsets = [1, 0], sizes = [1, 32], strides = [1, 1]} : vector<2x32xf32> to vector<1x32xf32>
    %754 = vector.extract_strided_slice %569 {offsets = [1, 0], sizes = [1, 32], strides = [1, 1]} : vector<2x32xf32> to vector<1x32xf32>
    %755 = vector.extract_strided_slice %658 {offsets = [1, 0], sizes = [1, 32], strides = [1, 1]} : vector<2x32xf32> to vector<1x32xf32>
    %756 = vector.extract_strided_slice %747 {offsets = [1, 0], sizes = [1, 32], strides = [1, 1]} : vector<2x32xf32> to vector<1x32xf32>
    %757 = tpu.concatenate %753, %754, %755, %756 in 0 : vector<1x32xf32>, vector<1x32xf32>, vector<1x32xf32>, vector<1x32xf32> -> vector<4x32xf32>
    %758 = tpu.concatenate %752, %757 in 0 : vector<4x32xf32>, vector<4x32xf32> -> vector<8x32xf32>
    %cst_119 = arith.constant dense<0.000000e+00> : vector<8x4xf32>
    %759 = tpu.matmul %758, %15, %cst_119 {dimension_numbers = #tpu.dot_dimension_numbers<[1], [0], [0], [1], [0, 0, 1, 1], [], []>} : vector<8x32xf32>, vector<32x4xf32>, vector<8x4xf32> -> vector<8x4xf32>
    %760 = vector.broadcast %17 : vector<1x4xf32> to vector<8x4xf32>
    %761 = arith.addf %759, %760 : vector<8x4xf32>
    %762 = vector.extract_strided_slice %761 {offsets = [0, 0], sizes = [4, 4], strides = [1, 1]} : vector<8x4xf32> to vector<4x4xf32>
    %c0_120 = arith.constant 0 : index
    %c0_121 = arith.constant 0 : index
    %c0_122 = arith.constant 0 : index
    %763 = vector.load %arg3[%c0_120, %c0_121, %c0_122] : memref<2x4x4xf32, #tpu.memory_space<vmem>>, vector<1x4x4xf32>
    %764 = vector.shape_cast %763 : vector<1x4x4xf32> to vector<4x4xf32>
    %765 = vector.shape_cast %762 : vector<4x4xf32> to vector<1x4x4xf32>
    tpu.vector_store %arg3[%c0_120, %c0_121, %c0_122], %765 {strides = array<i32>} : memref<2x4x4xf32, #tpu.memory_space<vmem>>, vector<1x4x4xf32>,
    %766 = vector.extract_strided_slice %761 {offsets = [4, 0], sizes = [4, 4], strides = [1, 1]} : vector<8x4xf32> to vector<4x4xf32>
    %c1_123 = arith.constant 1 : index
    %c0_124 = arith.constant 0 : index
    %c0_125 = arith.constant 0 : index
    %767 = vector.load %arg3[%c1_123, %c0_124, %c0_125] : memref<2x4x4xf32, #tpu.memory_space<vmem>>, vector<1x4x4xf32>
    %768 = vector.shape_cast %767 : vector<1x4x4xf32> to vector<4x4xf32>
    %769 = vector.shape_cast %766 : vector<4x4xf32> to vector<1x4x4xf32>
    tpu.vector_store %arg3[%c1_123, %c0_124, %c0_125], %769 {strides = array<i32>} : memref<2x4x4xf32, #tpu.memory_space<vmem>>, vector<1x4x4xf32>,
    return
  }
}

</mosaic_0001>

<bundles_post_ra>
// kernel: model_forward.1
= control target key start
LH: loop header
LB: loop body
LE: loop exit
PB: predicated region body
PF: predicated region fallthrough
CT: control target
= control target key end

     0   :  { %8 = vsyncpa [#allocation3], 0  ;;  %s9677_s0 = inlined_call_operand.vmem [shape: f32[2,8,4], index: 0, kind: input, shape index: {}]   ;;  %s9678_s1 = inlined_call_operand.vmem [shape: f32[2,8,4], index: 1, kind: input, shape index: {}]   ;;  %s9679_s2 = inlined_call_operand.hbm [shape: f32[304,128], index: 2, kind: input, shape index: {}]   ;;  %s9680_s3 = inlined_call_operand.hbm [shape: f32[2,4,4], index: 3, kind: output, shape index: {}]  }
   0x1   :  { %9 = vsyncpa [#allocation4], 0  ;;  %s7793_s12 = smov [#allocation2]   ;;  %s7745_s16 = scalar_lea.hbm %s9679_s2, 4864 }
   0x2   :  { %s19_s13 = sshll.u32 %s7793_s12, 4  ;;  %p7746_p0 = scmp.ne.s32.totalorder %s9679_s2, %s7745_s16  ;;  %s20_s13 = int_to_ptr.vmem [resolvable:$true] %s19_s13 }
   0x3   :  { %p7749_p1 = scmp.lt.u32.totalorder %s7745_s16, %s9679_s2 }
   0x5   :  { %p7751_p2 = pnand %p7749_p1, %p7746_p0 }
   0x7   :  { %7754 = shalt.err (!%p7751_p2)
}
   0x8   :  { %s7755_s21 = scalar_lea.vmem %s20_s13, 4864  ;;  %p7760_p4 = scmp.lt.s32.totalorder %s20_s13, %s20_s13 }
   0x9   :  { %p7756_p3 = scmp.ne.s32.totalorder %s20_s13, %s7755_s21  ;;  %p7761_p5 = scmp.lt.s32.totalorder %s7755_s21, %s7755_s21 }
   0xb   :  { %p7762_p6 = por %p7761_p5, %p7760_p4 }
   0xd   :  { %p7763_p7 = pnand %p7762_p6, %p7756_p3 }
   0xf   :  { %7766 = shalt.err (!%p7763_p7)
}
  0x10   :  { %s7794_s22 = smov 128   ;;  %s7795_s23 = smov 8  }
  0x11   :  { %25 = dma.hbm_to_vmem [thread:$0]  %s9679_s2, 4864, %s20_s13, [#allocation3], %s7794_s22, %s7794_s22, %s7795_s23  }
  0x12   :  { %7789 = dma.done.wait [#allocation3], 4864  }
  0x13   :  { %7790 = vsyncadd [#allocation3], 4294962432  ;;  %v70_v0 = vld [vmem:[%s9677_s0] sm:$0xff]  ;;  %v6313_v1 = vld [vmem:[%s9677_s0 + $0x8] sm:$0xff]  ;;  %s7796_s30 = smov 4   ;;  %v9683_v15 = vmov 0.0|0.0  }
  0x14   :  { %92 = vrot.lane.b32.xlu0 %v70_v0, %s7796_s30  ;;  %v77_v2 = vrot.slane %v70_v0, 1  ;;  %v65_v3 = vld [vmem:[#allocation2 + $0x108] sm:$0xff]  ;;  %v66_v4 = vld [vmem:[#allocation2 + $0x110] sm:$0xff]  ;;  %v29_v5 = vld [vmem:[#allocation2] sm:$0xff]  ;;  %v89_v7 = vrot.slane %v6313_v1, 1  ;;  %s7798_s6 = smov 12  }
  0x15   :  { %v30_v6 = vld [vmem:[#allocation2 + $0x8] sm:$0xff]  ;;  %v7158_v8 = vpack.c.bf16 %v66_v4, %v65_v3  ;;  %v31_v10 = vld [vmem:[#allocation2 + $0x10] sm:$0xff]  ;;  %v32_v11 = vld [vmem:[#allocation2 + $0x18] sm:$0xff]  ;;  %v73_v17 = vrot.slane %v70_v0, 7  ;;  %vm114_vm0 = vcmask 31744   ;;  %v86_v19 = vrot.slane %v6313_v1, 7 }
  0x16   :  { %100 = vrot.lane.b32.xlu1 %v77_v2, %s7795_s23  ;;  %v7162_v9 = vpack.c.bf16 %v30_v6, %v29_v5  ;;  %v7166_v12 = vpack.c.bf16 %v32_v11, %v31_v10  ;;  %v71_v13 = vld [vmem:[%s9678_s1] sm:$0xff]  ;;  %v6314_v14 = vld [vmem:[%s9678_s1 + $0x8] sm:$0xff]  ;;  %vm117_vm1 = vcmask 64512   ;;  %vm120_vm2 = vcmask 97280   ;;  %v39_v33 = vld [vmem:[#allocation2 + $0x30] sm:$0xff]  ;;  %s7801_s1 = smov 64  }
  0x17   :  { %7159 = vmatprep.subr.bf16.mxu0 %v7158_v8  ;;  %vm123_vm3 = vcmask 130048   ;;  %v37_v30 = vld [vmem:[#allocation2 + $0x20] sm:$0xff]  ;;  %v38_v31 = vld [vmem:[#allocation2 + $0x28] sm:$0xff]  ;;  %v40_v34 = vld [vmem:[#allocation2 + $0x38] sm:$0xff]  ;;  %vm7799_vm4 = vmmov 0   ;;  %v9681_v36 = vmov 0.0  }
  0x18   :  { %94 = vrot.lane.b32.xlu0 %v6313_v1, %s7796_s30  ;;  %7161 = vmatpush3.bf16.msra.mxu0 %v7158_v8  ;;  %v7855_v32 = vpack.c.bf16 %v38_v31, %v37_v30  ;;  %v7859_v35 = vpack.c.bf16 %v40_v34, %v39_v33  ;;  %vm209_vm5 = vcmask 261120   ;;  %v6317_v41 = vld [vmem:[#allocation2 + $0x100] ss:$0 sm:$0xff]  ;;  %vm75_vm6 = vcmask 1040384   ;;  %s7802_s7 = smov 32   ;;  %s7803_s8 = smov 96  }
  0x19   :  { %7163 = vmatprep.subr.bf16.mxu1 %v7162_v9  ;;  %7170 = vmatprep.subr.bf16.mxu0 %v9683_v15  ;;  %vm2507_vm7 = vcmask 1041408   ;;  %vm2509_vm8 = vcmask 1042432   ;;  %vm2511_vm9 = vcmask 1043456   ;;  %vm2513_vm10 = vcmask 1044480   ;;  %s7806_s9 = smov [#allocation5]  }
  0x1a   :  { %102 = vrot.lane.b32.xlu1 %v89_v7, %s7795_s23  ;;  %7165 = vmatpush3.bf16.msra.mxu1 %v7162_v9  ;;  %vm2515_vm11 = vcmask 1045504   ;;  %vm79_vm12 = vcmask 1046528   ;;  %vm2787_vm13 = vcmask 1041409   ;;  %vm2790_vm14 = vcmask 58368   ;;  %s6301_s10 = sshll.u32 %s7806_s9, 4  ;;  %s6302_s10 = int_to_ptr.vmem [resolvable:$true] %s6301_s10 }
  0x1b   :  { %7167 = vmatprep.subr.bf16.mxu1 %v7166_v12  ;;  %vm3526_vm15 = vcmask 130112   ;;  %s7767_s11 = scalar_lea.vmem %s6302_s10, 128  ;;  %p7772_p9 = scmp.lt.s32.totalorder %s6302_s10, %s6302_s10 }
  0x1c   :  { %108 = vrot.lane.b32.xlu0 %v71_v13, %s7798_s6  ;;  %p7768_p8 = scmp.ne.s32.totalorder %s6302_s10, %s7767_s11  ;;  %p7773_p10 = scmp.lt.s32.totalorder %s7767_s11, %s7767_s11 }
  0x1e   :  { %110 = vrot.lane.b32.xlu1 %v6314_v14, %s7798_s6  ;;  %7169 = vmatpush3.bf16.msra.mxu1 %v7166_v12  ;;  %p7774_p11 = por %p7773_p10, %p7772_p9 }
  0x1f   :  { %7176 = vmatprep.subr.bf16.mxu1 %v9683_v15 }
  0x20   :  { %p7775_p12 = pnand %p7774_p11, %p7768_p8 }
  0x86   :  { %v93_v16 = vpop.permute.xlu0 %92 }
  0x87   :  { %v115_v21 = vsel %vm114_vm0, %v73_v17, %v93_v16  ;;  %v41_v16 = vld [vmem:[#allocation2 + $0x60] sm:$0xff]  ;;  %v42_v17 = vld [vmem:[#allocation2 + $0x68] sm:$0xff] }
  0x88   :  { %v101_v18 = vpop.permute.xlu1 %100 }
  0x89   :  { %v118_v24 = vsel %vm117_vm1, %v115_v21, %v101_v18  ;;  %v43_v18 = vld [vmem:[#allocation2 + $0x70] sm:$0xff]  ;;  %v33_v21 = vld [vmem:[#allocation2 + $0x40] sm:$0xff] }
  0x8a   :  { %v95_v20 = vpop.permute.xlu0 %94 }
  0x8b   :  { %v116_v23 = vsel %vm114_vm0, %v86_v19, %v95_v20  ;;  %v7899_v19 = vpack.c.bf16 %v42_v17, %v41_v16  ;;  %v44_v20 = vld [vmem:[#allocation2 + $0x78] sm:$0xff]  ;;  %vm3533_vm0 = vcmask 195712  }
  0x8c   :  { %v103_v22 = vpop.permute.xlu1 %102 }
  0x8d   :  { %v119_v27 = vsel %vm117_vm1, %v116_v23, %v103_v22  ;;  %v34_v22 = vld [vmem:[#allocation2 + $0x48] sm:$0xff]  ;;  %vm3540_vm1 = vcmask 261312  }
  0x8e   :  { %v109_v25 = vpop.permute.xlu0 %108  ;;  %v7901_v23 = vpack.c.bf16 %v34_v22, %v33_v21 }
  0x8f   :  { %v121_v26 = vsel %vm120_vm2, %v118_v24, %v109_v25  ;;  %v35_v24 = vld [vmem:[#allocation2 + $0x50] sm:$0xff]  ;;  %v36_v25 = vld [vmem:[#allocation2 + $0x58] sm:$0xff] }
  0x90   :  { %v111_v28 = vpop.permute.xlu1 %110  ;;  %6638 = vmatprep.mubr.msk.f32.mxu0 %vm123_vm3, %v121_v26  ;;  %v7904_v26 = vpack.c.bf16 %v44_v20, %v43_v18 }
  0x91   :  { %v122_v29 = vsel %vm120_vm2, %v119_v27, %v111_v28  ;;  %v7908_v27 = vpack.c.bf16 %v36_v25, %v35_v24  ;;  %vm6291_vm2 = vcmask 27648  }
  0x92   :  { %6639 = vmatmul.mubr.msk.f32.vlgmr.msra.gmra.mrb[0].mxu0 %vm123_vm3, %v122_v29  ;;  %vm6294_vm3 = vcmask 31748  }
  0x93   :  { %7172 = vmatpush3.bf16.msra.mxu0 %v7855_v32  ;;  %6660 = vmatprep.mubr.msk.f32.mxu0 %vm7799_vm4, %v9681_v36 }
  0x94   :  { %7173 = vmatprep.subr.bf16.mxu0 %v9683_v15 }
  0x97   :  { %7175 = vmatpush3.bf16.msra.mxu0 %v7859_v35 }
  0x98   :  { %7182 = vmatprep.subr.bf16.mxu0 %v9683_v15 }
  0x9a   :  { %6661 = vmatmul.mubr.f32.vlgmr.msra.gmra.mrb[2].mxu0 %v9681_v36 }
  0x9b   :  { %6682 = vmatprep.mubr.msk.f32.mxu0 %vm7799_vm4, %v9681_v36  ;;  %7184 = vmatpush3.bf16.msra.mxu0 %v7901_v23 }
  0x9c   :  { %7185 = vmatprep.subr.bf16.mxu0 %v9683_v15 }
  0x9f   :  { %7187 = vmatpush3.bf16.msra.mxu0 %v7908_v27 }
  0xa0   :  { %7194 = vmatprep.subr.bf16.mxu0 %v9683_v15 }
 0x165   :  { %v6640_v37 = vpop.f32.mrb[0].mxu0 }
 0x166   :  { %v196_v38 = vpop.f32.mrb[1].mxu0 }
 0x167   :  { %6649 = vmatprep.mubr.msk.f32.mxu1 %vm209_vm5, %v196_v38 }
 0x168   :  { %6650 = vmatmul.mubr.msk.f32.vlgmr.msra.gmra.mrb[0].mxu1 %vm209_vm5, %v6640_v37  ;;  %v7938_v37 = vld [vmem:[#allocation2 + $0x101] ss:$0 sm:$0xff] }
 0x169   :  { %6671 = vmatprep.mubr.msk.f32.mxu1 %vm7799_vm4, %v9681_v36  ;;  %7178 = vmatpush3.bf16.msra.mxu1 %v7899_v19 }
 0x16a   :  { %7179 = vmatprep.subr.bf16.mxu1 %v9683_v15 }
 0x16d   :  { %v398_v39 = vpop.f32.mrb[2].mxu0  ;;  %7181 = vmatpush3.bf16.msra.mxu1 %v7904_v26 }
 0x16e   :  { %v6662_v40 = vpop.f32.mrb[3].mxu0  ;;  %7188 = vmatprep.subr.bf16.mxu1 %v9683_v15 }
 0x170   :  { %6672 = vmatmul.mubr.f32.vlgmr.msra.gmra.mrb[2].mxu1 %v9681_v36 }
 0x171   :  { %7190 = vmatpush3.bf16.msra.mxu1 %v7855_v32  ;;  %6693 = vmatprep.mubr.msk.f32.mxu1 %vm7799_vm4, %v9681_v36 }
 0x172   :  { %7191 = vmatprep.subr.bf16.mxu1 %v9683_v15 }
 0x175   :  { %7193 = vmatpush3.bf16.msra.mxu1 %v7859_v35 }
 0x176   :  { %7200 = vmatprep.subr.bf16.mxu1 %v9683_v15 }
 0x23b   :  { %v6651_v42 = vpop.f32.mrb[0].mxu1 }
 0x23c   :  { %v288_v43 = vadd.f32 %v6651_v42, %v6317_v41  ;;  %v282_v44 = vpop.f32.mrb[1].mxu1 }
 0x23d   :  { %v283_v45 = vadd.f32 %v6317_v41, %v282_v44 }
 0x23e   :  { %v292_v46 = vrot.slane %v288_v43, 7  ;;  %v301_v47 = vrot.slane %v288_v43, 1  ;;  %v306_v48 = vrot.slane %v288_v43, 2  ;;  %v311_v49 = vrot.slane %v288_v43, 3 }
 0x23f   :  { %v296_v50 = vrot.slane %v283_v45, 1  ;;  %v299_v51 = vrot.slane %v283_v45, 2  ;;  %v304_v52 = vrot.slane %v283_v45, 3  ;;  %v309_v53 = vrot.slane %v283_v45, 4 }
 0x240   :  { %v294_v54 = vsel %vm75_vm6, %v283_v45, %v292_v46  ;;  %v314_v55 = vrot.slane %v283_v45, 5  ;;  %v316_v56 = vrot.slane %v288_v43, 4  ;;  %v319_v57 = vrot.slane %v283_v45, 6 }
 0x241   :  { %v402_v58 = vadd.f32 %v398_v39, %v294_v54  ;;  %v7874_v59 = vsel %vm75_vm6, %v296_v50, %v288_v43  ;;  %v7877_v60 = vsel %vm75_vm6, %v299_v51, %v301_v47  ;;  %v7880_v61 = vsel %vm75_vm6, %v304_v52, %v306_v48 }
 0x242   :  { %v7883_v62 = vsel %vm75_vm6, %v309_v53, %v311_v49  ;;  %v7886_v63 = vsel %vm75_vm6, %v314_v55, %v316_v56  ;;  %v321_v0 = vrot.slane %v288_v43, 5  ;;  %v324_v1 = vrot.slane %v283_v45, 7 }
 0x243   :  { %7494 = vtanh.f32 %v402_v58  ;;  %v326_v2 = vrot.slane %v288_v43, 6  ;;  %v6320_v6 = vmul.f32 -1.442695, %v402_v58  ;;  %v493_v31 = vpop.f32.mrb[2].mxu1 }
 0x244   :  { %v7889_v3 = vsel %vm75_vm6, %v319_v57, %v321_v0  ;;  %v6673_v33 = vpop.f32.mrb[3].mxu1 }
 0x245   :  { %v7892_v4 = vsel %vm75_vm6, %v324_v1, %v326_v2  ;;  %7496 = vpow2.f32 %v6320_v6 }
 0x24d   :  { %v7495_v5 = vpop.eup %7494 }
 0x24e   :  { %412 = vrot.lane.b32.xlu0 %v7495_v5, %s7801_s1 }
 0x24f   :  { %v7497_v7 = vpop.eup %7496 }
 0x250   :  { %v406_v8 = vadd.f32 1.0, %v7497_v7 }
 0x252   :  { %7498 = vrcp.f32 %v406_v8 }
 0x25c   :  { %v7499_v9 = vpop.eup %7498 }
 0x25d   :  { %v410_v12 = vmul.f32 0.0, %v7499_v9 }
 0x2c0   :  { %v413_v10 = vpop.permute.xlu0 %412 }
 0x2c1   :  { %v415_v11 = vmul.f32 %v7499_v9, %v413_v10 }
 0x2c3   :  { %417 = vrot.lane.b32.xlu1 %v415_v11, %s7802_s7 }
 0x335   :  { %v418_v13 = vpop.permute.xlu1 %417 }
 0x336   :  { %v7896_v14 = vadd.f32 %v418_v13, %v410_v12 }
 0x338   :  { %7500 = vtanh.f32 %v7896_v14 }
 0x342   :  { %v7501_v28 = vpop.eup %7500 }
 0x343   :  { %423 = vrot.lane.b32.xlu0 %v7501_v28, %s7801_s1 }
 0x3b5   :  { %v424_v29 = vpop.permute.xlu0 %423 }
 0x3b6   :  { %v426_v30 = vmul.f32 %v7499_v9, %v424_v29 }
 0x3b8   :  { %498 = vrot.lane.b32.xlu1 %v426_v30, %s7802_s7 }
 0x42a   :  { %v499_v34 = vpop.permute.xlu1 %498 }
 0x42b   :  { %6683 = vmatmul.mubr.msk.f32.vlgmr.msra.gmra.mrb[4].mxu0 %vm209_vm5, %v499_v34  ;;  %6694 = vmatmul.mubr.msk.f32.vlgmr.msra.gmra.mrb[4].mxu1 %vm209_vm5, %v499_v34 }
 0x42c   :  { %7202 = vmatpush3.bf16.msra.mxu1 %v7901_v23  ;;  %7196 = vmatpush3.bf16.msra.mxu0 %v7899_v19 }
 0x42d   :  { %7203 = vmatprep.subr.bf16.mxu1 %v9683_v15  ;;  %7197 = vmatprep.subr.bf16.mxu0 %v9683_v15 }
 0x42e   :  { %6715 = vmatprep.mubr.msk.f32.mxu1 %vm7799_vm4, %v9681_v36  ;;  %6704 = vmatprep.mubr.msk.f32.mxu0 %vm7799_vm4, %v9681_v36 }
 0x430   :  { %7205 = vmatpush3.bf16.msra.mxu1 %v7908_v27  ;;  %7199 = vmatpush3.bf16.msra.mxu0 %v7904_v26 }
 0x431   :  { %7206 = vmatprep.subr.bf16.mxu0 %v9683_v15  ;;  %7212 = vmatprep.subr.bf16.mxu1 %v9683_v15 }
 0x4fe   :  { %v568_v38 = vpop.f32.mrb[4].mxu0  ;;  %v667_v39 = vpop.f32.mrb[4].mxu1 }
 0x4ff   :  { %v569_v40 = vadd.f32 %v568_v38, %v493_v31  ;;  %v671_v41 = vadd.f32 %v667_v39, %v7874_v59  ;;  %v6684_v42 = vpop.f32.mrb[5].mxu0  ;;  %v6695_v43 = vpop.f32.mrb[5].mxu1 }
 0x501   :  { %v576_v44 = vadd.f32 %v7938_v37, %v569_v40  ;;  %7502 = vtanh.f32 %v671_v41  ;;  %v6325_v47 = vmul.f32 -1.442695, %v671_v41 }
 0x503   :  { %7504 = vtanh.f32 %v576_v44  ;;  %v6323_v48 = vmul.f32 -1.442695, %v576_v44 }
 0x504   :  { %7506 = vpow2.f32 %v6325_v47 }
 0x505   :  { %7508 = vpow2.f32 %v6323_v48 }
 0x50b   :  { %v7503_v45 = vpop.eup %7502 }
 0x50c   :  { %681 = vrot.lane.b32.xlu1 %v7503_v45, %s7801_s1 }
 0x50d   :  { %v7505_v46 = vpop.eup %7504 }
 0x50e   :  { %586 = vrot.lane.b32.xlu0 %v7505_v46, %s7801_s1  ;;  %v7507_v49 = vpop.eup %7506 }
 0x50f   :  { %v7509_v50 = vpop.eup %7508  ;;  %v675_v51 = vadd.f32 1.0, %v7507_v49 }
 0x510   :  { %v580_v52 = vadd.f32 1.0, %v7509_v50 }
 0x511   :  { %7510 = vrcp.f32 %v675_v51 }
 0x512   :  { %7512 = vrcp.f32 %v580_v52 }
 0x51b   :  { %v7511_v53 = vpop.eup %7510 }
 0x51c   :  { %v7513_v56 = vpop.eup %7512  ;;  %v679_v59 = vmul.f32 %v7511_v53, %v7896_v14 }
 0x51d   :  { %v584_v2 = vmul.f32 0.0, %v7513_v56 }
 0x57e   :  { %v682_v54 = vpop.permute.xlu1 %681 }
 0x57f   :  { %v684_v55 = vmul.f32 %v7511_v53, %v682_v54 }
 0x580   :  { %v587_v57 = vpop.permute.xlu0 %586 }
 0x581   :  { %v589_v58 = vmul.f32 %v7513_v56, %v587_v57  ;;  %686 = vrot.lane.b32.xlu1 %v684_v55, %s7802_s7 }
 0x583   :  { %591 = vrot.lane.b32.xlu0 %v589_v58, %s7802_s7 }
 0x5f3   :  { %v687_v0 = vpop.permute.xlu1 %686 }
 0x5f4   :  { %v7947_v1 = vadd.f32 %v687_v0, %v679_v59 }
 0x5f5   :  { %v592_v5 = vpop.permute.xlu0 %591 }
 0x5f6   :  { %7514 = vtanh.f32 %v7947_v1  ;;  %v7950_v6 = vadd.f32 %v592_v5, %v584_v2 }
 0x5f8   :  { %7516 = vtanh.f32 %v7950_v6 }
 0x600   :  { %v7515_v7 = vpop.eup %7514 }
 0x601   :  { %692 = vrot.lane.b32.xlu1 %v7515_v7, %s7801_s1 }
 0x602   :  { %v7517_v8 = vpop.eup %7516 }
 0x603   :  { %597 = vrot.lane.b32.xlu0 %v7517_v8, %s7801_s1 }
 0x673   :  { %v693_v9 = vpop.permute.xlu1 %692 }
 0x674   :  { %v695_v10 = vmul.f32 %v7511_v53, %v693_v9 }
 0x675   :  { %v598_v11 = vpop.permute.xlu0 %597 }
 0x676   :  { %v7955_v12 = vmul.f32 %v7513_v56, %v598_v11  ;;  %772 = vrot.lane.b32.xlu1 %v695_v10, %s7802_s7 }
 0x678   :  { %697 = vrot.lane.b32.xlu0 %v7955_v12, %s7802_s7 }
 0x6e8   :  { %v773_v13 = vpop.permute.xlu1 %772 }
 0x6e9   :  { %6716 = vmatmul.mubr.msk.f32.vlgmr.msra.gmra.mrb[6].mxu1 %vm209_vm5, %v773_v13 }
 0x6ea   :  { %v698_v14 = vpop.permute.xlu0 %697  ;;  %7214 = vmatpush3.bf16.msra.mxu1 %v7899_v19  ;;  %6737 = vmatprep.mubr.msk.f32.mxu1 %vm7799_vm4, %v9681_v36 }
 0x6eb   :  { %6705 = vmatmul.mubr.msk.f32.vlgmr.msra.gmra.mrb[6].mxu0 %vm209_vm5, %v698_v14  ;;  %7215 = vmatprep.subr.bf16.mxu1 %v9683_v15 }
 0x6ec   :  { %7208 = vmatpush3.bf16.msra.mxu0 %v7855_v32  ;;  %6726 = vmatprep.mubr.msk.f32.mxu0 %vm7799_vm4, %v9681_v36 }
 0x6ed   :  { %7209 = vmatprep.subr.bf16.mxu0 %v9683_v15 }
 0x6ee   :  { %7217 = vmatpush3.bf16.msra.mxu1 %v7904_v26 }
 0x6ef   :  { %7224 = vmatprep.subr.bf16.mxu1 %v9683_v15 }
 0x6f0   :  { %7211 = vmatpush3.bf16.msra.mxu0 %v7859_v35 }
 0x6f1   :  { %7218 = vmatprep.subr.bf16.mxu0 %v9683_v15 }
 0x6f3   :  { %6727 = vmatmul.mubr.msk.f32.vlgmr.msra.gmra.mrb[8].mxu0 %vm209_vm5, %v773_v13 }
 0x6f4   :  { %7220 = vmatpush3.bf16.msra.mxu0 %v7901_v23  ;;  %6748 = vmatprep.mubr.msk.f32.mxu0 %vm7799_vm4, %v9681_v36 }
 0x6f5   :  { %7221 = vmatprep.subr.bf16.mxu0 %v9683_v15 }
 0x6f8   :  { %7223 = vmatpush3.bf16.msra.mxu0 %v7908_v27 }
 0x6f9   :  { %7230 = vmatprep.subr.bf16.mxu0 %v9683_v15 }
 0x7bc   :  { %v842_v16 = vpop.f32.mrb[6].mxu1 }
 0x7bd   :  { %v6717_v17 = vpop.f32.mrb[7].mxu1 }
 0x7be   :  { %v767_v18 = vpop.f32.mrb[6].mxu0 }
 0x7bf   :  { %v843_v20 = vadd.f32 %v842_v16, %v767_v18  ;;  %v6706_v21 = vpop.f32.mrb[7].mxu0 }
 0x7c1   :  { %v846_v22 = vadd.f32 %v7938_v37, %v843_v20 }
 0x7c3   :  { %7518 = vtanh.f32 %v846_v22  ;;  %v6328_v31 = vmul.f32 -1.442695, %v846_v22 }
 0x7c6   :  { %v937_v24 = vpop.f32.mrb[8].mxu0 }
 0x7c7   :  { %v941_v25 = vadd.f32 %v937_v24, %v7877_v60  ;;  %v6728_v28 = vpop.f32.mrb[9].mxu0 }
 0x7c9   :  { %7520 = vtanh.f32 %v941_v25  ;;  %v6330_v33 = vmul.f32 -1.442695, %v941_v25 }
 0x7ca   :  { %7522 = vpow2.f32 %v6328_v31 }
 0x7cb   :  { %7524 = vpow2.f32 %v6330_v33 }
 0x7cd   :  { %v7519_v29 = vpop.eup %7518 }
 0x7ce   :  { %856 = vrot.lane.b32.xlu0 %v7519_v29, %s7801_s1 }
 0x7d3   :  { %v7521_v30 = vpop.eup %7520 }
 0x7d4   :  { %951 = vrot.lane.b32.xlu1 %v7521_v30, %s7801_s1  ;;  %v7523_v34 = vpop.eup %7522 }
 0x7d5   :  { %v850_v38 = vadd.f32 1.0, %v7523_v34  ;;  %v7525_v39 = vpop.eup %7524 }
 0x7d6   :  { %v945_v40 = vadd.f32 1.0, %v7525_v39 }
 0x7d7   :  { %7526 = vrcp.f32 %v850_v38 }
 0x7d8   :  { %7528 = vrcp.f32 %v945_v40 }
 0x7e1   :  { %v7527_v41 = vpop.eup %7526 }
 0x7e2   :  { %v7529_v43 = vpop.eup %7528  ;;  %v854_v46 = vmul.f32 %v7527_v41, %v7950_v6 }
 0x7e3   :  { %v949_v49 = vmul.f32 %v7529_v43, %v7947_v1 }
 0x840   :  { %v857_v60 = vpop.permute.xlu0 %856 }
 0x841   :  { %v859_v42 = vmul.f32 %v7527_v41, %v857_v60 }
 0x843   :  { %861 = vrot.lane.b32.xlu0 %v859_v42, %s7802_s7 }
 0x846   :  { %v952_v44 = vpop.permute.xlu1 %951 }
 0x847   :  { %v954_v45 = vmul.f32 %v7529_v43, %v952_v44 }
 0x849   :  { %956 = vrot.lane.b32.xlu1 %v954_v45, %s7802_s7  ;;  %v2518_v45 = vrot.slane %v7955_v12, 1 }
 0x8b5   :  { %v862_v47 = vpop.permute.xlu0 %861 }
 0x8b6   :  { %v7988_v48 = vadd.f32 %v862_v47, %v854_v46 }
 0x8b8   :  { %7530 = vtanh.f32 %v7988_v48 }
 0x8bb   :  { %v957_v50 = vpop.permute.xlu1 %956 }
 0x8bc   :  { %v7992_v51 = vadd.f32 %v957_v50, %v949_v49 }
 0x8be   :  { %7532 = vtanh.f32 %v7992_v51 }
 0x8c2   :  { %v7531_v52 = vpop.eup %7530 }
 0x8c3   :  { %867 = vrot.lane.b32.xlu0 %v7531_v52, %s7801_s1 }
 0x8c8   :  { %v7533_v53 = vpop.eup %7532 }
 0x8c9   :  { %962 = vrot.lane.b32.xlu1 %v7533_v53, %s7801_s1 }
 0x935   :  { %v868_v54 = vpop.permute.xlu0 %867 }
 0x936   :  { %v7997_v55 = vmul.f32 %v7527_v41, %v868_v54 }
 0x938   :  { %967 = vrot.lane.b32.xlu0 %v7997_v55, %s7802_s7  ;;  %v2491_v60 = vrot.slane %v7997_v55, 7  ;;  %v2532_v49 = vsel %vm75_vm6, %v2518_v45, %v7997_v55 }
 0x93a   :  { %v2506_v50 = vsel %vm75_vm6, %v7955_v12, %v2491_v60 }
 0x93b   :  { %v963_v56 = vpop.permute.xlu1 %962 }
 0x93c   :  { %v965_v57 = vmul.f32 %v7529_v43, %v963_v56 }
 0x93e   :  { %1042 = vrot.lane.b32.xlu1 %v965_v57, %s7802_s7 }
 0x9aa   :  { %v968_v58 = vpop.permute.xlu0 %967 }
 0x9ab   :  { %6738 = vmatmul.mubr.msk.f32.vlgmr.msra.gmra.mrb[8].mxu1 %vm209_vm5, %v968_v58 }
 0x9ac   :  { %7226 = vmatpush3.bf16.msra.mxu1 %v7855_v32  ;;  %6759 = vmatprep.mubr.msk.f32.mxu1 %vm7799_vm4, %v9681_v36 }
 0x9ad   :  { %7227 = vmatprep.subr.bf16.mxu1 %v9683_v15 }
 0x9b0   :  { %7229 = vmatpush3.bf16.msra.mxu1 %v7859_v35  ;;  %v1043_v59 = vpop.permute.xlu1 %1042 }
 0x9b1   :  { %6749 = vmatmul.mubr.msk.f32.vlgmr.msra.gmra.mrb[10].mxu0 %vm209_vm5, %v1043_v59  ;;  %7236 = vmatprep.subr.bf16.mxu1 %v9683_v15 }
 0x9b2   :  { %7232 = vmatpush3.bf16.msra.mxu0 %v7899_v19  ;;  %6770 = vmatprep.mubr.msk.f32.mxu0 %vm7799_vm4, %v9681_v36 }
 0x9b3   :  { %6760 = vmatmul.mubr.msk.f32.vlgmr.msra.gmra.mrb[10].mxu1 %vm209_vm5, %v1043_v59  ;;  %7233 = vmatprep.subr.bf16.mxu0 %v9683_v15 }
 0x9b4   :  { %7238 = vmatpush3.bf16.msra.mxu1 %v7901_v23  ;;  %6781 = vmatprep.mubr.msk.f32.mxu1 %vm7799_vm4, %v9681_v36 }
 0x9b5   :  { %7239 = vmatprep.subr.bf16.mxu1 %v9683_v15 }
 0x9b6   :  { %7235 = vmatpush3.bf16.msra.mxu0 %v7904_v26 }
 0x9b7   :  { %7242 = vmatprep.subr.bf16.mxu0 %v9683_v15 }
 0x9b8   :  { %7241 = vmatpush3.bf16.msra.mxu1 %v7908_v27 }
 0x9b9   :  { %7248 = vmatprep.subr.bf16.mxu1 %v9683_v15 }
 0xa7e   :  { %v1037_v0 = vpop.f32.mrb[8].mxu1 }
 0xa7f   :  { %v6739_v1 = vpop.f32.mrb[9].mxu1 }
 0xa84   :  { %v1112_v2 = vpop.f32.mrb[10].mxu0 }
 0xa85   :  { %v1113_v5 = vadd.f32 %v1112_v2, %v1037_v0  ;;  %v6750_v6 = vpop.f32.mrb[11].mxu0 }
 0xa86   :  { %v1207_v7 = vpop.f32.mrb[10].mxu1 }
 0xa87   :  { %v1116_v8 = vadd.f32 %v7938_v37, %v1113_v5  ;;  %v1211_v9 = vadd.f32 %v1207_v7, %v7880_v61  ;;  %v6761_v10 = vpop.f32.mrb[11].mxu1 }
 0xa89   :  { %7534 = vtanh.f32 %v1116_v8  ;;  %v6333_v14 = vmul.f32 -1.442695, %v1116_v8  ;;  %v6335_v16 = vmul.f32 -1.442695, %v1211_v9 }
 0xa8a   :  { %7536 = vtanh.f32 %v1211_v9 }
 0xa8b   :  { %7538 = vpow2.f32 %v6333_v14 }
 0xa8c   :  { %7540 = vpow2.f32 %v6335_v16 }
 0xa93   :  { %v7535_v11 = vpop.eup %7534 }
 0xa94   :  { %v7537_v13 = vpop.eup %7536  ;;  %1126 = vrot.lane.b32.xlu0 %v7535_v11, %s7801_s1 }
 0xa95   :  { %1221 = vrot.lane.b32.xlu1 %v7537_v13, %s7801_s1  ;;  %v7539_v17 = vpop.eup %7538 }
 0xa96   :  { %v7541_v18 = vpop.eup %7540  ;;  %v1120_v20 = vadd.f32 1.0, %v7539_v17 }
 0xa97   :  { %v1215_v21 = vadd.f32 1.0, %v7541_v18 }
 0xa98   :  { %7542 = vrcp.f32 %v1120_v20 }
 0xa99   :  { %7544 = vrcp.f32 %v1215_v21 }
 0xaa2   :  { %v7543_v61 = vpop.eup %7542 }
 0xaa3   :  { %v7545_v24 = vpop.eup %7544  ;;  %v1124_v30 = vmul.f32 %v7543_v61, %v7988_v48 }
 0xaa4   :  { %v1219_v31 = vmul.f32 %v7545_v24, %v7992_v51 }
 0xb06   :  { %v1127_v22 = vpop.permute.xlu0 %1126 }
 0xb07   :  { %v1222_v25 = vpop.permute.xlu1 %1221  ;;  %v1129_v28 = vmul.f32 %v7543_v61, %v1127_v22 }
 0xb08   :  { %v1224_v29 = vmul.f32 %v7545_v24, %v1222_v25 }
 0xb09   :  { %1131 = vrot.lane.b32.xlu0 %v1129_v28, %s7802_s7 }
 0xb0a   :  { %1226 = vrot.lane.b32.xlu1 %v1224_v29, %s7802_s7 }
 0xb7b   :  { %v1132_v33 = vpop.permute.xlu0 %1131 }
 0xb7c   :  { %v1227_v34 = vpop.permute.xlu1 %1226  ;;  %v8031_v38 = vadd.f32 %v1132_v33, %v1124_v30 }
 0xb7d   :  { %v8033_v39 = vadd.f32 %v1227_v34, %v1219_v31 }
 0xb7e   :  { %7546 = vtanh.f32 %v8031_v38 }
 0xb7f   :  { %7548 = vtanh.f32 %v8033_v39 }
 0xb88   :  { %v7547_v40 = vpop.eup %7546 }
 0xb89   :  { %v7549_v41 = vpop.eup %7548  ;;  %1137 = vrot.lane.b32.xlu0 %v7547_v40, %s7801_s1 }
 0xb8a   :  { %1232 = vrot.lane.b32.xlu1 %v7549_v41, %s7801_s1 }
 0xbfb   :  { %v1138_v42 = vpop.permute.xlu0 %1137 }
 0xbfc   :  { %v1233_v43 = vpop.permute.xlu1 %1232  ;;  %v8040_v44 = vmul.f32 %v7543_v61, %v1138_v42 }
 0xbfd   :  { %v1235_v46 = vmul.f32 %v7545_v24, %v1233_v43 }
 0xbfe   :  { %v2493_v47 = vrot.slane %v8040_v44, 6  ;;  %v2520_v48 = vrot.slane %v8040_v44, 7  ;;  %1237 = vrot.lane.b32.xlu0 %v8040_v44, %s7802_s7 }
 0xbff   :  { %1312 = vrot.lane.b32.xlu1 %v1235_v46, %s7802_s7 }
 0xc00   :  { %v8053_v51 = vsel %vm2507_vm7, %v2532_v49, %v2520_v48  ;;  %v8056_v52 = vsel %vm2507_vm7, %v2506_v50, %v2493_v47 }
 0xc70   :  { %v1238_v53 = vpop.permute.xlu0 %1237 }
 0xc71   :  { %v1313_v54 = vpop.permute.xlu1 %1312  ;;  %6771 = vmatmul.mubr.msk.f32.vlgmr.msra.gmra.mrb[12].mxu0 %vm209_vm5, %v1238_v53 }
 0xc72   :  { %6782 = vmatmul.mubr.msk.f32.vlgmr.msra.gmra.mrb[12].mxu1 %vm209_vm5, %v1313_v54  ;;  %7244 = vmatpush3.bf16.msra.mxu0 %v7855_v32 }
 0xc73   :  { %7245 = vmatprep.subr.bf16.mxu0 %v9683_v15  ;;  %6792 = vmatprep.mubr.msk.f32.mxu0 %vm7799_vm4, %v9681_v36 }
 0xc74   :  { %7250 = vmatpush3.bf16.msra.mxu1 %v7899_v19  ;;  %6803 = vmatprep.mubr.msk.f32.mxu1 %vm7799_vm4, %v9681_v36 }
 0xc75   :  { %7251 = vmatprep.subr.bf16.mxu1 %v9683_v15 }
 0xc76   :  { %7247 = vmatpush3.bf16.msra.mxu0 %v7859_v35 }
 0xc77   :  { %7254 = vmatprep.subr.bf16.mxu0 %v9683_v15 }
 0xc78   :  { %7253 = vmatpush3.bf16.msra.mxu1 %v7904_v26 }
 0xc79   :  { %6793 = vmatmul.mubr.msk.f32.vlgmr.msra.gmra.mrb[14].mxu0 %vm209_vm5, %v1313_v54  ;;  %7260 = vmatprep.subr.bf16.mxu1 %v9683_v15 }
 0xc7a   :  { %7256 = vmatpush3.bf16.msra.mxu0 %v7901_v23  ;;  %6814 = vmatprep.mubr.msk.f32.mxu0 %vm7799_vm4, %v9681_v36 }
 0xc7b   :  { %7257 = vmatprep.subr.bf16.mxu0 %v9683_v15 }
 0xc7e   :  { %7259 = vmatpush3.bf16.msra.mxu0 %v7908_v27 }
 0xc7f   :  { %7266 = vmatprep.subr.bf16.mxu0 %v9683_v15 }
 0xd44   :  { %v1307_v56 = vpop.f32.mrb[12].mxu0 }
 0xd45   :  { %v1382_v57 = vpop.f32.mrb[12].mxu1  ;;  %v6772_v58 = vpop.f32.mrb[13].mxu0 }
 0xd46   :  { %v1383_v59 = vadd.f32 %v1382_v57, %v1307_v56  ;;  %v6783_v0 = vpop.f32.mrb[13].mxu1 }
 0xd48   :  { %v1386_v1 = vadd.f32 %v7938_v37, %v1383_v59 }
 0xd4a   :  { %7550 = vtanh.f32 %v1386_v1  ;;  %v6338_v9 = vmul.f32 -1.442695, %v1386_v1 }
 0xd4c   :  { %v1477_v2 = vpop.f32.mrb[14].mxu0 }
 0xd4d   :  { %v1481_v5 = vadd.f32 %v1477_v2, %v7883_v62  ;;  %v6794_v6 = vpop.f32.mrb[15].mxu0 }
 0xd4f   :  { %7552 = vtanh.f32 %v1481_v5  ;;  %v6340_v10 = vmul.f32 -1.442695, %v1481_v5 }
 0xd50   :  { %7554 = vpow2.f32 %v6338_v9 }
 0xd51   :  { %7556 = vpow2.f32 %v6340_v10 }
 0xd54   :  { %v7551_v7 = vpop.eup %7550 }
 0xd55   :  { %1396 = vrot.lane.b32.xlu0 %v7551_v7, %s7801_s1 }
 0xd59   :  { %v7553_v8 = vpop.eup %7552 }
 0xd5a   :  { %1491 = vrot.lane.b32.xlu1 %v7553_v8, %s7801_s1  ;;  %v7555_v11 = vpop.eup %7554 }
 0xd5b   :  { %v1390_v13 = vadd.f32 1.0, %v7555_v11  ;;  %v7557_v14 = vpop.eup %7556 }
 0xd5c   :  { %v1485_v16 = vadd.f32 1.0, %v7557_v14 }
 0xd5d   :  { %7558 = vrcp.f32 %v1390_v13 }
 0xd5e   :  { %7560 = vrcp.f32 %v1485_v16 }
 0xd67   :  { %v7559_v17 = vpop.eup %7558 }
 0xd68   :  { %v7561_v20 = vpop.eup %7560  ;;  %v1394_v22 = vmul.f32 %v7559_v17, %v8031_v38 }
 0xd69   :  { %v1489_v28 = vmul.f32 %v7561_v20, %v8033_v39 }
 0xdc7   :  { %v1397_v62 = vpop.permute.xlu0 %1396 }
 0xdc8   :  { %v1399_v18 = vmul.f32 %v7559_v17, %v1397_v62 }
 0xdca   :  { %1401 = vrot.lane.b32.xlu0 %v1399_v18, %s7802_s7 }
 0xdcc   :  { %v1492_v21 = vpop.permute.xlu1 %1491 }
 0xdcd   :  { %v1494_v61 = vmul.f32 %v7561_v20, %v1492_v21 }
 0xdcf   :  { %1496 = vrot.lane.b32.xlu1 %v1494_v61, %s7802_s7 }
 0xe3c   :  { %v1402_v24 = vpop.permute.xlu0 %1401 }
 0xe3d   :  { %v8086_v25 = vadd.f32 %v1402_v24, %v1394_v22 }
 0xe3f   :  { %7562 = vtanh.f32 %v8086_v25 }
 0xe41   :  { %v1497_v29 = vpop.permute.xlu1 %1496 }
 0xe42   :  { %v8090_v30 = vadd.f32 %v1497_v29, %v1489_v28 }
 0xe44   :  { %7564 = vtanh.f32 %v8090_v30 }
 0xe49   :  { %v7563_v31 = vpop.eup %7562 }
 0xe4a   :  { %1407 = vrot.lane.b32.xlu0 %v7563_v31, %s7801_s1 }
 0xe4e   :  { %v7565_v33 = vpop.eup %7564 }
 0xe4f   :  { %1502 = vrot.lane.b32.xlu1 %v7565_v33, %s7801_s1 }
 0xebc   :  { %v1408_v34 = vpop.permute.xlu0 %1407 }
 0xebd   :  { %v8095_v38 = vmul.f32 %v7559_v17, %v1408_v34 }
 0xebf   :  { %v2495_v40 = vrot.slane %v8095_v38, 5  ;;  %v2522_v41 = vrot.slane %v8095_v38, 6  ;;  %1507 = vrot.lane.b32.xlu0 %v8095_v38, %s7802_s7 }
 0xec1   :  { %v1503_v39 = vpop.permute.xlu1 %1502  ;;  %v8103_v60 = vsel %vm2509_vm8, %v8053_v51, %v2522_v41  ;;  %v8107_v42 = vsel %vm2509_vm8, %v8056_v52, %v2495_v40 }
 0xec2   :  { %v1505_v43 = vmul.f32 %v7561_v20, %v1503_v39 }
 0xec4   :  { %1582 = vrot.lane.b32.xlu1 %v1505_v43, %s7802_s7 }
 0xf31   :  { %v1508_v45 = vpop.permute.xlu0 %1507 }
 0xf32   :  { %6804 = vmatmul.mubr.msk.f32.vlgmr.msra.gmra.mrb[14].mxu1 %vm209_vm5, %v1508_v45 }
 0xf33   :  { %7262 = vmatpush3.bf16.msra.mxu1 %v7855_v32  ;;  %6825 = vmatprep.mubr.msk.f32.mxu1 %vm7799_vm4, %v9681_v36 }
 0xf34   :  { %7263 = vmatprep.subr.bf16.mxu1 %v9683_v15 }
 0xf36   :  { %v1583_v46 = vpop.permute.xlu1 %1582 }
 0xf37   :  { %7265 = vmatpush3.bf16.msra.mxu1 %v7859_v35  ;;  %6815 = vmatmul.mubr.msk.f32.vlgmr.msra.gmra.mrb[16].mxu0 %vm209_vm5, %v1583_v46 }
 0xf38   :  { %7268 = vmatpush3.bf16.msra.mxu0 %v7899_v19  ;;  %7272 = vmatprep.subr.bf16.mxu1 %v9683_v15 }
 0xf39   :  { %7269 = vmatprep.subr.bf16.mxu0 %v9683_v15  ;;  %6836 = vmatprep.mubr.msk.f32.mxu0 %vm7799_vm4, %v9681_v36 }
 0xf3a   :  { %6826 = vmatmul.mubr.msk.f32.vlgmr.msra.gmra.mrb[16].mxu1 %vm209_vm5, %v1583_v46 }
 0xf3b   :  { %7274 = vmatpush3.bf16.msra.mxu1 %v7901_v23  ;;  %6847 = vmatprep.mubr.msk.f32.mxu1 %vm7799_vm4, %v9681_v36 }
 0xf3c   :  { %7271 = vmatpush3.bf16.msra.mxu0 %v7904_v26  ;;  %7275 = vmatprep.subr.bf16.mxu1 %v9683_v15 }
 0xf3d   :  { %7278 = vmatprep.subr.bf16.mxu0 %v9683_v15 }
 0xf3f   :  { %7277 = vmatpush3.bf16.msra.mxu1 %v7908_v27 }
 0xf40   :  { %7284 = vmatprep.subr.bf16.mxu1 %v9683_v15 }
0x1005   :  { %v1577_v47 = vpop.f32.mrb[14].mxu1 }
0x1006   :  { %v6805_v48 = vpop.f32.mrb[15].mxu1 }
0x100a   :  { %v1652_v49 = vpop.f32.mrb[16].mxu0 }
0x100b   :  { %v1653_v50 = vadd.f32 %v1652_v49, %v1577_v47  ;;  %v6816_v51 = vpop.f32.mrb[17].mxu0 }
0x100d   :  { %v1656_v52 = vadd.f32 %v7938_v37, %v1653_v50  ;;  %v1747_v53 = vpop.f32.mrb[16].mxu1 }
0x100e   :  { %v1751_v54 = vadd.f32 %v1747_v53, %v7886_v63  ;;  %v6827_v56 = vpop.f32.mrb[17].mxu1 }
0x100f   :  { %7566 = vtanh.f32 %v1656_v52  ;;  %v6343_v59 = vmul.f32 -1.442695, %v1656_v52 }
0x1010   :  { %7568 = vtanh.f32 %v1751_v54  ;;  %v6345_v0 = vmul.f32 -1.442695, %v1751_v54 }
0x1011   :  { %7570 = vpow2.f32 %v6343_v59 }
0x1012   :  { %7572 = vpow2.f32 %v6345_v0 }
0x1019   :  { %v7567_v57 = vpop.eup %7566 }
0x101a   :  { %v7569_v58 = vpop.eup %7568  ;;  %1666 = vrot.lane.b32.xlu0 %v7567_v57, %s7801_s1 }
0x101b   :  { %1761 = vrot.lane.b32.xlu1 %v7569_v58, %s7801_s1  ;;  %v7571_v1 = vpop.eup %7570 }
0x101c   :  { %v7573_v2 = vpop.eup %7572  ;;  %v1660_v5 = vadd.f32 1.0, %v7571_v1 }
0x101d   :  { %v1755_v6 = vadd.f32 1.0, %v7573_v2 }
0x101e   :  { %7574 = vrcp.f32 %v1660_v5 }
0x101f   :  { %7576 = vrcp.f32 %v1755_v6 }
0x1028   :  { %v7575_v63 = vpop.eup %7574 }
0x1029   :  { %v7577_v8 = vpop.eup %7576  ;;  %v1664_v13 = vmul.f32 %v7575_v63, %v8086_v25 }
0x102a   :  { %v1759_v14 = vmul.f32 %v7577_v8, %v8090_v30 }
0x108c   :  { %v1667_v7 = vpop.permute.xlu0 %1666 }
0x108d   :  { %v1762_v9 = vpop.permute.xlu1 %1761  ;;  %v1669_v10 = vmul.f32 %v7575_v63, %v1667_v7 }
0x108e   :  { %v1764_v11 = vmul.f32 %v7577_v8, %v1762_v9 }
0x108f   :  { %1671 = vrot.lane.b32.xlu0 %v1669_v10, %s7802_s7 }
0x1090   :  { %1766 = vrot.lane.b32.xlu1 %v1764_v11, %s7802_s7 }
0x1101   :  { %v1672_v16 = vpop.permute.xlu0 %1671 }
0x1102   :  { %v1767_v17 = vpop.permute.xlu1 %1766  ;;  %v8139_v62 = vadd.f32 %v1672_v16, %v1664_v13 }
0x1103   :  { %v8141_v18 = vadd.f32 %v1767_v17, %v1759_v14 }
0x1104   :  { %7578 = vtanh.f32 %v8139_v62 }
0x1105   :  { %7580 = vtanh.f32 %v8141_v18 }
0x110e   :  { %v7579_v20 = vpop.eup %7578 }
0x110f   :  { %v7581_v21 = vpop.eup %7580  ;;  %1677 = vrot.lane.b32.xlu0 %v7579_v20, %s7801_s1 }
0x1110   :  { %1772 = vrot.lane.b32.xlu1 %v7581_v21, %s7801_s1 }
0x1181   :  { %v1678_v61 = vpop.permute.xlu0 %1677 }
0x1182   :  { %v1773_v22 = vpop.permute.xlu1 %1772  ;;  %v8147_v24 = vmul.f32 %v7575_v63, %v1678_v61 }
0x1183   :  { %v1775_v25 = vmul.f32 %v7577_v8, %v1773_v22 }
0x1184   :  { %1777 = vrot.lane.b32.xlu0 %v8147_v24, %s7802_s7  ;;  %v2524_v28 = vrot.slane %v8147_v24, 5  ;;  %v2497_v29 = vrot.slane %v8147_v24, 4 }
0x1185   :  { %1852 = vrot.lane.b32.xlu1 %v1775_v25, %s7802_s7 }
0x1186   :  { %v8156_v30 = vsel %vm2511_vm9, %v8103_v60, %v2524_v28  ;;  %v8160_v31 = vsel %vm2511_vm9, %v8107_v42, %v2497_v29 }
0x11f6   :  { %v1778_v33 = vpop.permute.xlu0 %1777 }
0x11f7   :  { %v1853_v34 = vpop.permute.xlu1 %1852  ;;  %6837 = vmatmul.mubr.msk.f32.vlgmr.msra.gmra.mrb[18].mxu0 %vm209_vm5, %v1778_v33 }
0x11f8   :  { %6848 = vmatmul.mubr.msk.f32.vlgmr.msra.gmra.mrb[18].mxu1 %vm209_vm5, %v1853_v34  ;;  %7280 = vmatpush3.bf16.msra.mxu0 %v7855_v32 }
0x11f9   :  { %7281 = vmatprep.subr.bf16.mxu0 %v9683_v15  ;;  %6858 = vmatprep.mubr.msk.f32.mxu0 %vm7799_vm4, %v9681_v36 }
0x11fa   :  { %7286 = vmatpush3.bf16.msra.mxu1 %v7899_v19  ;;  %6869 = vmatprep.mubr.msk.f32.mxu1 %vm7799_vm4, %v9681_v36 }
0x11fb   :  { %7287 = vmatprep.subr.bf16.mxu1 %v9683_v15 }
0x11fc   :  { %7283 = vmatpush3.bf16.msra.mxu0 %v7859_v35 }
0x11fd   :  { %7290 = vmatprep.subr.bf16.mxu0 %v9683_v15 }
0x11fe   :  { %7289 = vmatpush3.bf16.msra.mxu1 %v7904_v26 }
0x11ff   :  { %6859 = vmatmul.mubr.msk.f32.vlgmr.msra.gmra.mrb[20].mxu0 %vm209_vm5, %v1853_v34  ;;  %7296 = vmatprep.subr.bf16.mxu1 %v9683_v15 }
0x1200   :  { %7292 = vmatpush3.bf16.msra.mxu0 %v7901_v23  ;;  %6880 = vmatprep.mubr.msk.f32.mxu0 %vm7799_vm4, %v9681_v36 }
0x1201   :  { %7293 = vmatprep.subr.bf16.mxu0 %v9683_v15 }
0x1204   :  { %7295 = vmatpush3.bf16.msra.mxu0 %v7908_v27 }
0x1205   :  { %7302 = vmatprep.subr.bf16.mxu0 %v9683_v15 }
0x12ca   :  { %v1847_v40 = vpop.f32.mrb[18].mxu0 }
0x12cb   :  { %v1922_v41 = vpop.f32.mrb[18].mxu1  ;;  %v6838_v39 = vpop.f32.mrb[19].mxu0 }
0x12cc   :  { %v1923_v60 = vadd.f32 %v1922_v41, %v1847_v40  ;;  %v6849_v42 = vpop.f32.mrb[19].mxu1 }
0x12ce   :  { %v1926_v43 = vadd.f32 %v7938_v37, %v1923_v60 }
0x12d0   :  { %7582 = vtanh.f32 %v1926_v43  ;;  %v6348_v50 = vmul.f32 -1.442695, %v1926_v43 }
0x12d2   :  { %v2017_v45 = vpop.f32.mrb[20].mxu0 }
0x12d3   :  { %v2021_v46 = vadd.f32 %v2017_v45, %v7889_v3  ;;  %v6860_v47 = vpop.f32.mrb[21].mxu0 }
0x12d5   :  { %7584 = vtanh.f32 %v2021_v46  ;;  %v6350_v51 = vmul.f32 -1.442695, %v2021_v46 }
0x12d6   :  { %7586 = vpow2.f32 %v6348_v50 }
0x12d7   :  { %7588 = vpow2.f32 %v6350_v51 }
0x12da   :  { %v7583_v48 = vpop.eup %7582 }
0x12db   :  { %1936 = vrot.lane.b32.xlu0 %v7583_v48, %s7801_s1 }
0x12df   :  { %v7585_v49 = vpop.eup %7584 }
0x12e0   :  { %2031 = vrot.lane.b32.xlu1 %v7585_v49, %s7801_s1  ;;  %v7587_v52 = vpop.eup %7586 }
0x12e1   :  { %v1930_v53 = vadd.f32 1.0, %v7587_v52  ;;  %v7589_v54 = vpop.eup %7588 }
0x12e2   :  { %v2025_v56 = vadd.f32 1.0, %v7589_v54 }
0x12e3   :  { %7590 = vrcp.f32 %v1930_v53 }
0x12e4   :  { %7592 = vrcp.f32 %v2025_v56 }
0x12ed   :  { %v7591_v57 = vpop.eup %7590 }
0x12ee   :  { %v7593_v59 = vpop.eup %7592  ;;  %v1934_v2 = vmul.f32 %v7591_v57, %v8139_v62 }
0x12ef   :  { %v2029_v63 = vmul.f32 %v7593_v59, %v8141_v18 }
0x134d   :  { %v1937_v3 = vpop.permute.xlu0 %1936 }
0x134e   :  { %v1939_v58 = vmul.f32 %v7591_v57, %v1937_v3 }
0x1350   :  { %1941 = vrot.lane.b32.xlu0 %v1939_v58, %s7802_s7 }
0x1352   :  { %v2032_v0 = vpop.permute.xlu1 %2031 }
0x1353   :  { %v2034_v1 = vmul.f32 %v7593_v59, %v2032_v0 }
0x1355   :  { %2036 = vrot.lane.b32.xlu1 %v2034_v1, %s7802_s7 }
0x13c2   :  { %v1942_v5 = vpop.permute.xlu0 %1941 }
0x13c3   :  { %v8190_v6 = vadd.f32 %v1942_v5, %v1934_v2 }
0x13c5   :  { %7594 = vtanh.f32 %v8190_v6 }
0x13c7   :  { %v2037_v7 = vpop.permute.xlu1 %2036 }
0x13c8   :  { %v8194_v8 = vadd.f32 %v2037_v7, %v2029_v63 }
0x13ca   :  { %7596 = vtanh.f32 %v8194_v8 }
0x13cf   :  { %v7595_v9 = vpop.eup %7594 }
0x13d0   :  { %1947 = vrot.lane.b32.xlu0 %v7595_v9, %s7801_s1 }
0x13d4   :  { %v7597_v10 = vpop.eup %7596 }
0x13d5   :  { %2042 = vrot.lane.b32.xlu1 %v7597_v10, %s7801_s1  ;;  %v7734_v10 = vld [vmem:[#allocation2 + $0x101] ss:$0 sm:$0xff] }
0x1442   :  { %v1948_v11 = vpop.permute.xlu0 %1947 }
0x1443   :  { %v8199_v13 = vmul.f32 %v7591_v57, %v1948_v11 }
0x1445   :  { %2047 = vrot.lane.b32.xlu0 %v8199_v13, %s7802_s7  ;;  %v2526_v14 = vrot.slane %v8199_v13, 4  ;;  %v2499_v16 = vrot.slane %v8199_v13, 3 }
0x1447   :  { %v2043_v17 = vpop.permute.xlu1 %2042  ;;  %v8206_v62 = vsel %vm2513_vm10, %v8156_v30, %v2526_v14  ;;  %v8209_v18 = vsel %vm2513_vm10, %v8160_v31, %v2499_v16 }
0x1448   :  { %v2045_v20 = vmul.f32 %v7593_v59, %v2043_v17 }
0x144a   :  { %2122 = vrot.lane.b32.xlu1 %v2045_v20, %s7802_s7 }
0x14b7   :  { %v2048_v21 = vpop.permute.xlu0 %2047 }
0x14b8   :  { %6870 = vmatmul.mubr.msk.f32.vlgmr.msra.gmra.mrb[20].mxu1 %vm209_vm5, %v2048_v21 }
0x14b9   :  { %7298 = vmatpush3.bf16.msra.mxu1 %v7855_v32  ;;  %6891 = vmatprep.mubr.msk.f32.mxu1 %vm7799_vm4, %v9681_v36 }
0x14ba   :  { %7299 = vmatprep.subr.bf16.mxu1 %v9683_v15 }
0x14bc   :  { %v2123_v61 = vpop.permute.xlu1 %2122 }
0x14bd   :  { %7301 = vmatpush3.bf16.msra.mxu1 %v7859_v35  ;;  %6881 = vmatmul.mubr.msk.f32.vlgmr.msra.gmra.mrb[22].mxu0 %vm209_vm5, %v2123_v61 }
0x14be   :  { %7308 = vmatprep.subr.bf16.mxu1 %v9683_v15  ;;  %7304 = vmatpush3.bf16.msra.mxu0 %v7899_v19 }
0x14bf   :  { %7305 = vmatprep.subr.bf16.mxu0 %v9683_v15  ;;  %6902 = vmatprep.mubr.msk.f32.mxu0 %vm7799_vm4, %v9681_v36 }
0x14c0   :  { %6892 = vmatmul.mubr.msk.f32.vlgmr.msra.gmra.mrb[22].mxu1 %vm209_vm5, %v2123_v61  ;;  %v7735_v61 = vld [vmem:[#allocation2 + $0x108] sm:$0xff] }
0x14c1   :  { %7310 = vmatpush3.bf16.msra.mxu1 %v7901_v23  ;;  %6913 = vmatprep.mubr.msk.f32.mxu1 %vm7799_vm4, %v9681_v36 }
0x14c2   :  { %7311 = vmatprep.subr.bf16.mxu1 %v9683_v15  ;;  %7307 = vmatpush3.bf16.msra.mxu0 %v7904_v26 }
0x14c5   :  { %7313 = vmatpush3.bf16.msra.mxu1 %v7908_v27 }
0x14c6   :  { %7322 = vmatprep.subr.bf16.mxu1 %v9683_v15 }
0x158b   :  { %v2117_v32 = vpop.f32.mrb[20].mxu1 }
0x158c   :  { %v6871_v35 = vpop.f32.mrb[21].mxu1 }
0x1590   :  { %v2192_v19 = vpop.f32.mrb[22].mxu0 }
0x1591   :  { %v2193_v22 = vadd.f32 %v2192_v19, %v2117_v32  ;;  %v6882_v25 = vpop.f32.mrb[23].mxu0  ;;  %v7736_v32 = vld [vmem:[#allocation2 + $0x110] sm:$0xff]  ;;  %v67_v19 = vld [vmem:[#allocation2 + $0x118] sm:$0xff] }
0x1592   :  { %v7462_v35 = vpack.i.bf16 %v7736_v32, %v7735_v61 }
0x1593   :  { %v2196_v28 = vadd.f32 %v7938_v37, %v2193_v22  ;;  %v2287_v29 = vpop.f32.mrb[22].mxu1  ;;  %v68_v22 = vld [vmem:[#allocation2 + $0x120] sm:$0xff] }
0x1594   :  { %v2291_v23 = vadd.f32 %v2287_v29, %v7892_v4  ;;  %v6893_v30 = vpop.f32.mrb[23].mxu1  ;;  %v7477_v25 = vpack.i.bf16 %v68_v22, %v67_v19 }
0x1595   :  { %7598 = vtanh.f32 %v2196_v28  ;;  %v6353_v26 = vmul.f32 -1.442695, %v2196_v28 }
0x1596   :  { %7600 = vtanh.f32 %v2291_v23  ;;  %v6355_v27 = vmul.f32 -1.442695, %v2291_v23 }
0x1597   :  { %7602 = vpow2.f32 %v6353_v26 }
0x1598   :  { %7604 = vpow2.f32 %v6355_v27 }
0x159f   :  { %v7599_v31 = vpop.eup %7598 }
0x15a0   :  { %v7601_v33 = vpop.eup %7600  ;;  %2206 = vrot.lane.b32.xlu0 %v7599_v31, %s7801_s1 }
0x15a1   :  { %2301 = vrot.lane.b32.xlu1 %v7601_v33, %s7801_s1  ;;  %v7603_v34 = vpop.eup %7602 }
0x15a2   :  { %v7605_v40 = vpop.eup %7604  ;;  %v2200_v41 = vadd.f32 1.0, %v7603_v34 }
0x15a3   :  { %v2295_v37 = vadd.f32 1.0, %v7605_v40 }
0x15a4   :  { %7606 = vrcp.f32 %v2200_v41 }
0x15a5   :  { %7608 = vrcp.f32 %v2295_v37 }
0x15ae   :  { %v7607_v4 = vpop.eup %7606 }
0x15af   :  { %v7609_v60 = vpop.eup %7608  ;;  %v2204_v46 = vmul.f32 %v7607_v4, %v8190_v6 }
0x15b0   :  { %v2299_v47 = vmul.f32 %v7609_v60, %v8194_v8 }
0x1612   :  { %v2207_v39 = vpop.permute.xlu0 %2206 }
0x1613   :  { %v2302_v42 = vpop.permute.xlu1 %2301  ;;  %v2209_v43 = vmul.f32 %v7607_v4, %v2207_v39 }
0x1614   :  { %v2304_v45 = vmul.f32 %v7609_v60, %v2302_v42 }
0x1615   :  { %2211 = vrot.lane.b32.xlu0 %v2209_v43, %s7802_s7 }
0x1616   :  { %2306 = vrot.lane.b32.xlu1 %v2304_v45, %s7802_s7 }
0x1687   :  { %v2212_v48 = vpop.permute.xlu0 %2211 }
0x1688   :  { %v2307_v49 = vpop.permute.xlu1 %2306  ;;  %v2214_v50 = vadd.f32 %v2212_v48, %v2204_v46 }
0x1689   :  { %v8240_v51 = vadd.f32 %v2307_v49, %v2299_v47 }
0x168a   :  { %7610 = vtanh.f32 %v2214_v50 }
0x168b   :  { %9874 = vst [vmem:[#allocation8_spill] sm:$0xff] %v8240_v51  ;;  %7612 = vtanh.f32 %v8240_v51 }
0x1694   :  { %v7611_v52 = vpop.eup %7610 }
0x1695   :  { %v7613_v53 = vpop.eup %7612  ;;  %2217 = vrot.lane.b32.xlu0 %v7611_v52, %s7801_s1 }
0x1696   :  { %2312 = vrot.lane.b32.xlu1 %v7613_v53, %s7801_s1 }
0x1707   :  { %v2218_v54 = vpop.permute.xlu0 %2217 }
0x1708   :  { %v2313_v56 = vpop.permute.xlu1 %2312  ;;  %v8245_v57 = vmul.f32 %v7607_v4, %v2218_v54 }
0x1709   :  { %v2315_v3 = vmul.f32 %v7609_v60, %v2313_v56 }
0x170a   :  { %2317 = vrot.lane.b32.xlu0 %v8245_v57, %s7802_s7  ;;  %v2528_v58 = vrot.slane %v8245_v57, 3  ;;  %v2501_v59 = vrot.slane %v8245_v57, 2 }
0x170b   :  { %2392 = vrot.lane.b32.xlu1 %v2315_v3, %s7802_s7  ;;  %v53_v3 = vld [vmem:[#allocation2 + $0xa0] sm:$0xff] }
0x170c   :  { %v8253_v0 = vsel %vm2515_vm11, %v8206_v62, %v2528_v58  ;;  %v8256_v1 = vsel %vm2515_vm11, %v8209_v18, %v2501_v59  ;;  %v54_v58 = vld [vmem:[#allocation2 + $0xa8] sm:$0xff] }
0x170d   :  { %v8297_v59 = vpack.c.bf16 %v54_v58, %v53_v3 }
0x170f   :  { %9878 = vst [vmem:[#allocation12_spill] sm:$0xff] %v8297_v59 }
0x177c   :  { %v2318_v2 = vpop.permute.xlu0 %2317 }
0x177d   :  { %v8258_v5 = vpop.permute.xlu1 %2392  ;;  %6903 = vmatmul.mubr.msk.f32.vlgmr.msra.gmra.mrb[24].mxu0 %vm209_vm5, %v2318_v2  ;;  %v56_v2 = vld [vmem:[#allocation2 + $0xb8] sm:$0xff] }
0x177e   :  { %6914 = vmatmul.mubr.msk.f32.vlgmr.msra.gmra.mrb[24].mxu1 %vm209_vm5, %v8258_v5 }
0x177f   :  { %6935 = vmatprep.mubr.msk.f32.mxu1 %vm7799_vm4, %v9681_v36 }
0x1850   :  { %v2387_v6 = vpop.f32.mrb[24].mxu0 }
0x1851   :  { %v2462_v63 = vpop.f32.mrb[24].mxu1  ;;  %v6904_v7 = vpop.f32.mrb[25].mxu0 }
0x1852   :  { %v2463_v8 = vadd.f32 %v2462_v63, %v2387_v6  ;;  %v6915_v9 = vpop.f32.mrb[25].mxu1  ;;  %v57_v7 = vld [vmem:[#allocation2 + $0xe0] sm:$0xff] }
0x1854   :  { %v2466_v11 = vadd.f32 %v7734_v10, %v2463_v8  ;;  %v58_v8 = vld [vmem:[#allocation2 + $0xe8] sm:$0xff]  ;;  %v59_v10 = vld [vmem:[#allocation2 + $0xf0] sm:$0xff] }
0x1855   :  { %v8308_v9 = vpack.c.bf16 %v58_v8, %v57_v7  ;;  %v7805_v8 = vmov 0  }
0x1856   :  { %7614 = vtanh.f32 %v2466_v11  ;;  %v6358_v16 = vmul.f32 -1.442695, %v2466_v11  ;;  %v60_v11 = vld [vmem:[#allocation2 + $0xf8] sm:$0xff]  ;;  %7483 = vset.pattern.permute.xlu1 %v7805_v8  ;;  %7482 = vset.pattern.permute.xlu0 %v7805_v8 }
0x1857   :  { %9880 = vst [vmem:[#allocation14_spill] sm:$0xff] %v8308_v9 }
0x1858   :  { %7616 = vpow2.f32 %v6358_v16 }
0x1860   :  { %v7615_v14 = vpop.eup %7614 }
0x1861   :  { %2476 = vrot.lane.b32.xlu0 %v7615_v14, %s7801_s1  ;;  %v8314_v14 = vpack.c.bf16 %v60_v11, %v59_v10 }
0x1862   :  { %v7617_v17 = vpop.eup %7616 }
0x1863   :  { %v2470_v62 = vadd.f32 1.0, %v7617_v17  ;;  %9881 = vst [vmem:[#allocation15_spill] sm:$0xff] %v8314_v14  ;;  %v2730_v17 = vlaneseq }
0x1865   :  { %7618 = vrcp.f32 %v2470_v62  ;;  %v8377_v58 = vand.u32 127, %v2730_v17 }
0x1867   :  { %9891 = vst [vmem:[#allocation25_spill] sm:$0xff] %v8377_v58 }
0x186f   :  { %v7619_v18 = vpop.eup %7618 }
0x1870   :  { %v2474_v28 = vmul.f32 %v7619_v18, %v2214_v50 }
0x18d3   :  { %v2477_v20 = vpop.permute.xlu0 %2476 }
0x18d4   :  { %v2479_v21 = vmul.f32 %v7619_v18, %v2477_v20 }
0x18d6   :  { %2481 = vrot.lane.b32.xlu1 %v2479_v21, %s7802_s7 }
0x18da   :  { %7463 = vrot.lane.b32.xlu1 %v7462_v35, %s7801_s1 }
0x18de   :  { %7473 = vrot.lane.b32.xlu1 %v7462_v35, %s7803_s8 }
0x18e2   :  { %7478 = vrot.lane.b32.xlu1 %v7477_v25, %s7803_s8 }
0x1948   :  { %v2482_v29 = vpop.permute.xlu1 %2481 }
0x1949   :  { %v8270_v23 = vadd.f32 %v2482_v29, %v2474_v28 }
0x194b   :  { %9875 = vst [vmem:[#allocation9_spill] sm:$0xff] %v8270_v23  ;;  %7620 = vtanh.f32 %v8270_v23 }
0x194c   :  { %v7464_v30 = vpop.permute.xlu1 %7463 }
0x194d   :  { %v7466_v31 = vunpack.i.h.bf16 %v7464_v30  ;;  %v7465_v33 = vunpack.i.l.bf16 %v7464_v30 }
0x194f   :  { %v8273_v26 = vpack.c.bf16 %v7466_v31, %v7465_v33 }
0x1950   :  { %v7474_v27 = vpop.permute.xlu1 %7473 }
0x1951   :  { %9876 = vst [vmem:[#allocation10_spill] sm:$0xff] %v8273_v26  ;;  %v7476_v34 = vunpack.i.h.bf16 %v7474_v27  ;;  %v7475_v40 = vunpack.i.l.bf16 %v7474_v27  ;;  %7324 = vmatpush3.bf16.msra.mxu1 %v8273_v26 }
0x1952   :  { %7325 = vmatprep.subr.bf16.mxu1 %v9683_v15 }
0x1953   :  { %v7314_v37 = vpack.c.bf16 %v7476_v34, %v7475_v40 }
0x1954   :  { %v7479_v4 = vpop.permute.xlu1 %7478 }
0x1955   :  { %v7621_v41 = vpop.eup %7620  ;;  %7315 = vmatprep.subr.bf16.mxu0 %v7314_v37  ;;  %v7481_v39 = vunpack.i.h.bf16 %v7479_v4  ;;  %v7480_v60 = vunpack.i.l.bf16 %v7479_v4 }
0x1956   :  { %2487 = vrot.lane.b32.xlu0 %v7621_v41, %s7801_s1  ;;  %7317 = vmatpush3.bf16.msra.mxu0 %v7314_v37  ;;  %v8349_v41 = vld [vmem:[#allocation2 + $0x128] ss:$0 sm:$0xff] }
0x1957   :  { %v7318_v42 = vpack.c.bf16 %v7481_v39, %v7480_v60  ;;  %9888 = vst [vmem:[#allocation22_spill] sm:$0xff] %v8349_v41 }
0x1959   :  { %7319 = vmatprep.subr.bf16.mxu0 %v7318_v42 }
0x195a   :  { %7468 = vrot.lane.b32.xlu0 %v7477_v25, %s7801_s1  ;;  %7321 = vmatpush3.bf16.msra.mxu0 %v7318_v42 }
0x195b   :  { %7328 = vmatprep.subr.bf16.mxu0 %v9683_v15 }
0x19c8   :  { %v2488_v43 = vpop.permute.xlu0 %2487 }
0x19c9   :  { %v8280_v45 = vmul.f32 %v7619_v18, %v2488_v43  ;;  %v8328_v18 = vshrl.u32 %v2730_v17, 7 }
0x19cb   :  { %2640 = vrot.lane.b32.xlu0 %v8280_v45, %s7802_s7  ;;  %v2530_v46 = vrot.slane %v8280_v45, 2  ;;  %v2504_v47 = vrot.slane %v8280_v45, 1  ;;  %9882 = vst [vmem:[#allocation16_spill] sm:$0xff] %v8328_v18  ;;  %v8336_v22 = vsub.s32 0, %v8328_v18 }
0x19cc   :  { %v7469_v48 = vpop.permute.xlu0 %7468 }
0x19cd   :  { %v2538_v49 = vsel %vm79_vm12, %v8253_v0, %v2530_v46  ;;  %v2517_v50 = vsel %vm79_vm12, %v8256_v1, %v2504_v47  ;;  %v7471_v52 = vunpack.i.h.bf16 %v7469_v48  ;;  %v7470_v53 = vunpack.i.l.bf16 %v7469_v48  ;;  %v55_v1 = vld [vmem:[#allocation2 + $0xb0] sm:$0xff]  ;;  %9884 = vst [vmem:[#allocation18_spill] sm:$0xff] %v8336_v22 }
0x19ce   :  { %2543 = vrot.lane.b32.xlu1 %v2538_v49, %s7802_s7  ;;  %v8302_v63 = vpack.c.bf16 %v56_v2, %v55_v1  ;;  %v8358_v48 = vsub.s32 1, %v8328_v18 }
0x19cf   :  { %2541 = vrot.lane.b32.xlu0 %v2517_v50, %s7802_s7  ;;  %v8290_v54 = vpack.c.bf16 %v7471_v52, %v7470_v53  ;;  %v2858_v50 = vrot.slane %v7955_v12, %v8336_v22  ;;  %v2922_v52 = vrot.slane %v7997_v55, %v8336_v22  ;;  %v2994_v53 = vrot.slane %v8040_v44, %v8336_v22 }
0x19d0   :  { %9879 = vst [vmem:[#allocation13_spill] sm:$0xff] %v8302_v63  ;;  %9890 = vst [vmem:[#allocation24_spill] sm:$0xff] %v8358_v48  ;;  %v2878_v49 = vrot.slane %v7955_v12, %v8358_v48  ;;  %v3066_v12 = vrot.slane %v8095_v38, %v8336_v22  ;;  %v8374_v3 = vrot.slane %v8095_v38, %v8358_v48 }
0x19d1   :  { %9877 = vst [vmem:[#allocation11_spill] sm:$0xff] %v8290_v54  ;;  %7327 = vmatpush3.bf16.msra.mxu1 %v8290_v54  ;;  %v2942_v10 = vrot.slane %v7997_v55, %v8358_v48  ;;  %v3138_v55 = vrot.slane %v8147_v24, %v8336_v22 }
0x19d2   :  { %7334 = vmatprep.subr.bf16.mxu1 %v9683_v15 }
0x1a3d   :  { %v2641_v56 = vpop.permute.xlu0 %2640 }
0x1a3e   :  { %6936 = vmatmul.mubr.msk.f32.vlgmr.msra.gmra.mrb[26].mxu1 %vm209_vm5, %v2641_v56 }
0x1a3f   :  { %6957 = vmatprep.mubr.msk.f32.mxu1 %vm7799_vm4, %v9681_v36 }
0x1a40   :  { %v2544_v6 = vpop.permute.xlu1 %2543 }
0x1a41   :  { %v2542_v0 = vpop.permute.xlu0 %2541 }
0x1a42   :  { %6924 = vmatprep.mubr.msk.f32.mxu0 %vm209_vm5, %v2542_v0  ;;  %v8381_v0 = vsub.s32 %v8377_v58, %v8328_v18 }
0x1a43   :  { %6925 = vmatmul.mubr.msk.f32.vlgmr.msra.gmra.mrb[26].mxu0 %vm209_vm5, %v2544_v6 }
0x1a44   :  { %7330 = vmatpush3.bf16.msra.mxu0 %v8297_v59  ;;  %6946 = vmatprep.mubr.msk.f32.mxu0 %vm7799_vm4, %v9681_v36  ;;  %9892 = vst [vmem:[#allocation26_spill] sm:$0xff] %v8381_v0 }
0x1a45   :  { %7331 = vmatprep.subr.bf16.mxu0 %v9683_v15 }
0x1a48   :  { %7333 = vmatpush3.bf16.msra.mxu0 %v8302_v63 }
0x1a49   :  { %7340 = vmatprep.subr.bf16.mxu0 %v9683_v15 }
0x1a4b   :  { %6947 = vmatmul.mubr.msk.f32.vlgmr.msra.gmra.mrb[28].mxu0 %vm209_vm5, %v8258_v5  ;;  %v7804_v5 = vmov 1966171168  }
0x1a4c   :  { %7342 = vmatpush3.bf16.msra.mxu0 %v8308_v9  ;;  %6968 = vmatprep.mubr.msk.f32.mxu0 %vm7799_vm4, %v9681_v36  ;;  %v2728_v16 = vunpack.c.l.s4 %v7804_v5 }
0x1a4d   :  { %7343 = vmatprep.subr.bf16.mxu0 %v9683_v15 }
0x1a4e   :  { %v2729_v62 = vunpack.c.0.s8 %v2728_v16 }
0x1a50   :  { %7345 = vmatpush3.bf16.msra.mxu0 %v8314_v14  ;;  %v8331_v20 = vsub.s32 %v2729_v62, %v8328_v18 }
0x1a51   :  { %7352 = vmatprep.subr.bf16.mxu0 %v9683_v15 }
0x1a52   :  { %9883 = vst [vmem:[#allocation17_spill] sm:$0xff] %v8331_v20 }
0x1a53   :  { %6969 = vmatmul.mubr.msk.f32.vlgmr.msra.gmra.mrb[30].mxu0 %vm209_vm5, %v2641_v56  ;;  %v3014_v56 = vrot.slane %v8040_v44, %v8358_v48 }
0x1a54   :  { %7354 = vmatpush3.bf16.msra.mxu0 %v8273_v26  ;;  %6990 = vmatprep.mubr.msk.f32.mxu0 %vm7799_vm4, %v9681_v36 }
0x1a55   :  { %7355 = vmatprep.subr.bf16.mxu0 %v9683_v15 }
0x1a58   :  { %7357 = vmatpush3.bf16.msra.mxu0 %v8290_v54 }
0x1a59   :  { %7364 = vmatprep.subr.bf16.mxu0 %v9683_v15 }
0x1b11   :  { %v2722_v21 = vpop.f32.mrb[26].mxu1 }
0x1b12   :  { %v2733_v61 = vrot.slane %v2722_v21, %v8331_v20  ;;  %v6937_v32 = vpop.f32.mrb[27].mxu1 }
0x1b14   :  { %v2734_v35 = vcombine.high %v2733_v61, %v2733_v61  ;;  %v2741_v19 = vrot.slane %v2733_v61, %v8331_v20 }
0x1b16   :  { %v2748_v25 = vrot.slane %v2734_v35, %v8331_v20  ;;  %v2752_v28 = vrot.slane %v2741_v19, %v8336_v22  ;;  %v8340_v29 = vpop.f32.mrb[26].mxu0  ;;  %v3158_v19 = vrot.slane %v8147_v24, %v8358_v48  ;;  %v3282_v24 = vrot.slane %v8245_v57, %v8336_v22 }
0x1b17   :  { %9885 = vst [vmem:[#allocation19_spill] sm:$0xff] %v8340_v29  ;;  %v8342_v30 = vpop.f32.mrb[27].mxu0 }
0x1b18   :  { %9886 = vst [vmem:[#allocation20_spill] sm:$0xff] %v8342_v30  ;;  %v2756_v31 = vrot.slane %v2748_v25, %v8336_v22  ;;  %v2759_v33 = vadd.f32 %v2752_v28, %v8342_v30  ;;  %v3210_v25 = vrot.slane %v8199_v13, %v8336_v22  ;;  %v3230_v28 = vrot.slane %v8199_v13, %v8358_v48 }
0x1b1a   :  { %v2760_v27 = vadd.f32 %v8340_v29, %v2756_v31  ;;  %7622 = vtanh.f32 %v2759_v33  ;;  %v3302_v31 = vrot.slane %v8245_v57, %v8358_v48 }
0x1b1c   :  { %7624 = vtanh.f32 %v2760_v27 }
0x1b1e   :  { %v8347_v34 = vpop.f32.mrb[28].mxu0 }
0x1b1f   :  { %9887 = vst [vmem:[#allocation21_spill] sm:$0xff] %v8347_v34  ;;  %v6948_v40 = vpop.f32.mrb[29].mxu0 }
0x1b24   :  { %v7623_v37 = vpop.eup %7622 }
0x1b25   :  { %v2767_v4 = vmul.f32 %v7623_v37, %v8349_v41 }
0x1b26   :  { %v7625_v39 = vpop.eup %7624  ;;  %v8352_v60 = vpop.f32.mrb[30].mxu0 }
0x1b27   :  { %9889 = vst [vmem:[#allocation23_spill] sm:$0xff] %v8352_v60  ;;  %v6970_v42 = vpop.f32.mrb[31].mxu0  ;;  %v2769_v43 = vsel %vm209_vm5, %v2767_v4, 0.0  ;;  %v2768_v46 = vmul.f32 %v7625_v39, %v8349_v41 }
0x1b28   :  { %2770 = vadd.xlane.f32.xlu0 %v2769_v43 }
0x1b29   :  { %v2772_v47 = vsel %vm209_vm5, %v2768_v46, 0.0  ;;  %v3354_v46 = vrot.slane %v8280_v45, %v8336_v22 }
0x1b2a   :  { %2773 = vadd.xlane.f32.xlu1 %v2772_v47 }
0x1b3b   :  { %2885 = vbcast.lane.b32.xlu1 %v2878_v49, 360 }
0x1b3f   :  { %2869 = vbcast.lane.b32.xlu1 %v2858_v50, 368 }
0x1b43   :  { %2933 = vbcast.lane.b32.xlu1 %v2922_v52, 368 }
0x1b47   :  { %2873 = vbcast.lane.b32.xlu1 %v2858_v50, 376 }
0x1b4b   :  { %2937 = vbcast.lane.b32.xlu1 %v2922_v52, 376 }
0x1b4f   :  { %2997 = vbcast.lane.b32.xlu1 %v2994_v53, 352 }
0x1b53   :  { %3017 = vbcast.lane.b32.xlu1 %v3014_v56, 352 }
0x1b57   :  { %3005 = vbcast.lane.b32.xlu1 %v2994_v53, 368 }
0x1b5b   :  { %3009 = vbcast.lane.b32.xlu1 %v2994_v53, 376 }
0x1b5f   :  { %3069 = vbcast.lane.b32.xlu1 %v3066_v12, 352 }
0x1b63   :  { %3089 = vbcast.lane.b32.xlu1 %v8374_v3, 352 }
0x1b67   :  { %3077 = vbcast.lane.b32.xlu1 %v3066_v12, 368 }
0x1bb5   :  { %v2771_v44 = vpop.xlane.xlu0 %2770 }
0x1bb6   :  { %v2782_v2 = vrot.slane %v2771_v44, %v8381_v0 }
0x1bb7   :  { %v2774_v1 = vpop.xlane.xlu1 %2773 }
0x1bb8   :  { %v2786_v6 = vrot.slane %v2774_v1, %v8381_v0 }
0x1bba   :  { %v2788_v38 = vsel %vm2787_vm13, %v2786_v6, %v2782_v2 }
0x1bbb   :  { %v2791_v7 = vsel %vm2790_vm14, %v2788_v38, -inf  ;;  %v8412_v13 = vpop.permute.xlu1 %2885 }
0x1bbc   :  { %2792 = vmax.xlane.f32.xlu0 %v2791_v7  ;;  %9893 = vst [vmem:[#allocation27_spill] sm:$0xff] %v8412_v13 }
0x1bbf   :  { %v8414_v33 = vpop.permute.xlu1 %2869 }
0x1bc3   :  { %v8416_v27 = vpop.permute.xlu1 %2933 }
0x1bc4   :  { %9894 = vst [vmem:[#allocation28_spill] sm:$0xff] %v8416_v27 }
0x1bc7   :  { %v8418_v57 = vpop.permute.xlu1 %2873 }
0x1bc8   :  { %9895 = vst [vmem:[#allocation29_spill] sm:$0xff] %v8418_v57 }
0x1bcb   :  { %v8420_v40 = vpop.permute.xlu1 %2937 }
0x1bcc   :  { %9896 = vst [vmem:[#allocation30_spill] sm:$0xff] %v8420_v40 }
0x1bcf   :  { %v8422_v37 = vpop.permute.xlu1 %2997 }
0x1bd0   :  { %9897 = vst [vmem:[#allocation31_spill] sm:$0xff] %v8422_v37 }
0x1bd2   :  { %2861 = vbcast.lane.b32.xlu0 %v2858_v50, 352 }
0x1bd3   :  { %v8426_v39 = vpop.permute.xlu1 %3017 }
0x1bd4   :  { %9899 = vst [vmem:[#allocation33_spill] sm:$0xff] %v8426_v39 }
0x1bd6   :  { %2865 = vbcast.lane.b32.xlu0 %v2858_v50, 360  ;;  %v3374_v50 = vrot.slane %v8280_v45, %v8358_v48 }
0x1bd7   :  { %v8430_v43 = vpop.permute.xlu1 %3005 }
0x1bd8   :  { %9901 = vst [vmem:[#allocation35_spill] sm:$0xff] %v8430_v43 }
0x1bda   :  { %2881 = vbcast.lane.b32.xlu0 %v2878_v49, 352 }
0x1bde   :  { %2925 = vbcast.lane.b32.xlu0 %v2922_v52, 352 }
0x1be2   :  { %2929 = vbcast.lane.b32.xlu0 %v2922_v52, 360 }
0x1be6   :  { %2945 = vbcast.lane.b32.xlu0 %v2942_v10, 352 }
0x1c49   :  { %v2793_v11 = vpop.xlane.xlu0 %2792 }
0x1c4a   :  { %v2798_v5 = vrot.slane %v2793_v11, %v8336_v22  ;;  %v2802_v16 = vrot.slane %v2793_v11, %v8358_v48 }
0x1c4c   :  { %v2805_v17 = vsub.f32 %v2771_v44, %v2798_v5  ;;  %v2806_v62 = vsub.f32 %v2774_v1, %v2802_v16 }
0x1c4d   :  { %v8424_v4 = vpop.permute.xlu0 %2861 }
0x1c4e   :  { %v2807_v21 = vmul.f32 1.442695, %v2805_v17  ;;  %v2809_v61 = vmul.f32 1.442695, %v2806_v62  ;;  %9898 = vst [vmem:[#allocation32_spill] sm:$0xff] %v8424_v4 }
0x1c50   :  { %7626 = vpow2.f32 %v2807_v21 }
0x1c51   :  { %7628 = vpow2.f32 %v2809_v61  ;;  %v8428_v42 = vpop.permute.xlu0 %2865 }
0x1c52   :  { %9900 = vst [vmem:[#allocation34_spill] sm:$0xff] %v8428_v42 }
0x1c55   :  { %v8434_v47 = vpop.permute.xlu0 %2881 }
0x1c56   :  { %9902 = vst [vmem:[#allocation36_spill] sm:$0xff] %v8434_v47 }
0x1c59   :  { %v8440_v52 = vpop.permute.xlu0 %2925 }
0x1c5a   :  { %v8391_v32 = vpop.eup %7626  ;;  %9904 = vst [vmem:[#allocation38_spill] sm:$0xff] %v8440_v52 }
0x1c5b   :  { %v8393_v35 = vpop.eup %7628  ;;  %2814 = vperm.xlu0 %7482, %v8391_v32  }
0x1c5c   :  { %2817 = vperm.xlu1 %7483, %v8393_v35  }
0x1c5f   :  { %2949 = vbcast.lane.b32.xlu0 %v2942_v10, 360 }
0x1c60   :  { %3081 = vbcast.lane.b32.xlu1 %v3066_v12, 376 }
0x1c63   :  { %2889 = vbcast.lane.b32.xlu0 %v2878_v49, 368 }
0x1c64   :  { %3141 = vbcast.lane.b32.xlu1 %v3138_v55, 352 }
0x1c67   :  { %2953 = vbcast.lane.b32.xlu0 %v2942_v10, 368 }
0x1c68   :  { %3161 = vbcast.lane.b32.xlu1 %v3158_v19, 352 }
0x1c6b   :  { %2893 = vbcast.lane.b32.xlu0 %v2878_v49, 376  ;;  %v8436_v49 = vpop.permute.xlu1 %3009 }
0x1c6c   :  { %3149 = vbcast.lane.b32.xlu1 %v3138_v55, 368  ;;  %9903 = vst [vmem:[#allocation37_spill] sm:$0xff] %v8436_v49 }
0x1c6f   :  { %2957 = vbcast.lane.b32.xlu0 %v2942_v10, 376 }
0x1c70   :  { %3153 = vbcast.lane.b32.xlu1 %v3138_v55, 376 }
0x1c73   :  { %3001 = vbcast.lane.b32.xlu0 %v2994_v53, 360  ;;  %v8442_v53 = vpop.permute.xlu1 %3069 }
0x1c74   :  { %3213 = vbcast.lane.b32.xlu1 %v3210_v25, 352  ;;  %9905 = vst [vmem:[#allocation39_spill] sm:$0xff] %v8442_v53 }
0x1c77   :  { %3021 = vbcast.lane.b32.xlu0 %v3014_v56, 360 }
0x1c78   :  { %3233 = vbcast.lane.b32.xlu1 %v3230_v28, 352 }
0x1c7b   :  { %3025 = vbcast.lane.b32.xlu0 %v3014_v56, 368 }
0x1c7c   :  { %3221 = vbcast.lane.b32.xlu1 %v3210_v25, 368 }
0x1c7f   :  { %3029 = vbcast.lane.b32.xlu0 %v3014_v56, 376  ;;  %v8444_v56 = vpop.permute.xlu0 %2929 }
0x1c80   :  { %3225 = vbcast.lane.b32.xlu1 %v3210_v25, 376  ;;  %9906 = vst [vmem:[#allocation40_spill] sm:$0xff] %v8444_v56 }
0x1c83   :  { %3073 = vbcast.lane.b32.xlu0 %v3066_v12, 360  ;;  %v8446_v12 = vpop.permute.xlu1 %3089 }
0x1c84   :  { %3285 = vbcast.lane.b32.xlu1 %v3282_v24, 352 }
0x1c87   :  { %3093 = vbcast.lane.b32.xlu0 %v8374_v3, 360  ;;  %v8450_v44 = vpop.permute.xlu1 %3077 }
0x1c88   :  { %3305 = vbcast.lane.b32.xlu1 %v3302_v31, 352  ;;  %9908 = vst [vmem:[#allocation42_spill] sm:$0xff] %v8450_v44 }
0x1c8b   :  { %3097 = vbcast.lane.b32.xlu0 %v8374_v3, 368 }
0x1c8c   :  { %3293 = vbcast.lane.b32.xlu1 %v3282_v24, 368 }
0x1c8f   :  { %3101 = vbcast.lane.b32.xlu0 %v8374_v3, 376  ;;  %v8448_v3 = vpop.permute.xlu0 %2945 }
0x1c90   :  { %3297 = vbcast.lane.b32.xlu1 %v3282_v24, 376  ;;  %9907 = vst [vmem:[#allocation41_spill] sm:$0xff] %v8448_v3 }
0x1c93   :  { %3145 = vbcast.lane.b32.xlu0 %v3138_v55, 360 }
0x1c97   :  { %3165 = vbcast.lane.b32.xlu0 %v3158_v19, 360 }
0x1c9b   :  { %3169 = vbcast.lane.b32.xlu0 %v3158_v19, 368 }
0x1c9f   :  { %3173 = vbcast.lane.b32.xlu0 %v3158_v19, 376 }
0x1ca3   :  { %3217 = vbcast.lane.b32.xlu0 %v3210_v25, 360 }
0x1ca7   :  { %3237 = vbcast.lane.b32.xlu0 %v3230_v28, 360 }
0x1cab   :  { %3241 = vbcast.lane.b32.xlu0 %v3230_v28, 368 }
0x1caf   :  { %3245 = vbcast.lane.b32.xlu0 %v3230_v28, 376 }
0x1cb3   :  { %3289 = vbcast.lane.b32.xlu0 %v3282_v24, 360 }
0x1cb7   :  { %3309 = vbcast.lane.b32.xlu0 %v3302_v31, 360 }
0x1cbb   :  { %3313 = vbcast.lane.b32.xlu0 %v3302_v31, 368 }
0x1cbf   :  { %3317 = vbcast.lane.b32.xlu0 %v3302_v31, 376 }
0x1cc3   :  { %3361 = vbcast.lane.b32.xlu0 %v3354_v46, 360 }
0x1cc7   :  { %3381 = vbcast.lane.b32.xlu0 %v3374_v50, 360 }
0x1ccb   :  { %3385 = vbcast.lane.b32.xlu0 %v3374_v50, 368 }
0x1ccf   :  { %3389 = vbcast.lane.b32.xlu0 %v3374_v50, 376 }
0x1cda   :  { %v2815_v1 = vpop.permute.xlu0 %2814 }
0x1cdb   :  { %v2818_v2 = vpop.permute.xlu1 %2817  ;;  %v2822_v6 = vrot.slane %v2815_v1, %v8381_v0 }
0x1cdc   :  { %v2826_v45 = vrot.slane %v2818_v2, %v8381_v0  ;;  %v8531_v0 = vsub.s32 7, %v8328_v18 }
0x1cde   :  { %v2827_v38 = vsel %vm2787_vm13, %v2826_v45, %v2822_v6  ;;  %v8456_v8 = vpop.permute.xlu0 %2949  ;;  %9939 = vst [vmem:[#allocation73_spill] sm:$0xff] %v8531_v0 }
0x1cdf   :  { %v2829_v7 = vsel %vm2790_vm14, %v2827_v38, 0.0  ;;  %v8472_v61 = vpop.permute.xlu1 %3081 }
0x1ce0   :  { %2830 = vadd.xlane.f32.xlu1 %v2829_v7  ;;  %9914 = vst [vmem:[#allocation48_spill] sm:$0xff] %v8472_v61 }
0x1ce2   :  { %v8458_v10 = vpop.permute.xlu0 %2889 }
0x1ce3   :  { %9909 = vst [vmem:[#allocation43_spill] sm:$0xff] %v8458_v10  ;;  %v8476_v19 = vpop.permute.xlu1 %3141 }
0x1ce4   :  { %9916 = vst [vmem:[#allocation50_spill] sm:$0xff] %v8476_v19 }
0x1ce6   :  { %v8460_v11 = vpop.permute.xlu0 %2953 }
0x1ce7   :  { %v8480_v28 = vpop.permute.xlu1 %3161 }
0x1cea   :  { %v8462_v5 = vpop.permute.xlu0 %2893 }
0x1ceb   :  { %9910 = vst [vmem:[#allocation44_spill] sm:$0xff] %v8462_v5  ;;  %v8484_v31 = vpop.permute.xlu1 %3149 }
0x1cec   :  { %9918 = vst [vmem:[#allocation52_spill] sm:$0xff] %v8484_v31 }
0x1cee   :  { %v8464_v16 = vpop.permute.xlu0 %2957 }
0x1cef   :  { %9911 = vst [vmem:[#allocation45_spill] sm:$0xff] %v8464_v16 }
0x1cf1   :  { %3357 = vbcast.lane.b32.xlu1 %v3354_v46, 352 }
0x1cf2   :  { %v8466_v17 = vpop.permute.xlu0 %3001 }
0x1cf3   :  { %9912 = vst [vmem:[#allocation46_spill] sm:$0xff] %v8466_v17 }
0x1cf5   :  { %3377 = vbcast.lane.b32.xlu1 %v3374_v50, 352  ;;  %v8488_v50 = vpop.permute.xlu1 %3153 }
0x1cf6   :  { %v8468_v62 = vpop.permute.xlu0 %3021  ;;  %9920 = vst [vmem:[#allocation54_spill] sm:$0xff] %v8488_v50 }
0x1cf9   :  { %3365 = vbcast.lane.b32.xlu1 %v3354_v46, 368  ;;  %v8492_v2 = vpop.permute.xlu1 %3213 }
0x1cfa   :  { %v8470_v21 = vpop.permute.xlu0 %3025  ;;  %9922 = vst [vmem:[#allocation56_spill] sm:$0xff] %v8492_v2 }
0x1cfb   :  { %9913 = vst [vmem:[#allocation47_spill] sm:$0xff] %v8470_v21 }
0x1cfd   :  { %3369 = vbcast.lane.b32.xlu1 %v3354_v46, 376  ;;  %v8496_v45 = vpop.permute.xlu1 %3233 }
0x1cfe   :  { %v8474_v55 = vpop.permute.xlu0 %3029 }
0x1cff   :  { %9915 = vst [vmem:[#allocation49_spill] sm:$0xff] %v8474_v55 }
0x1d01   :  { %v8500_v7 = vpop.permute.xlu1 %3221 }
0x1d02   :  { %v8478_v25 = vpop.permute.xlu0 %3073  ;;  %9925 = vst [vmem:[#allocation59_spill] sm:$0xff] %v8500_v7 }
0x1d03   :  { %9917 = vst [vmem:[#allocation51_spill] sm:$0xff] %v8478_v25 }
0x1d05   :  { %v8504_v15 = vpop.permute.xlu1 %3225 }
0x1d06   :  { %v8482_v24 = vpop.permute.xlu0 %3093  ;;  %9927 = vst [vmem:[#allocation61_spill] sm:$0xff] %v8504_v15 }
0x1d09   :  { %v8508_v29 = vpop.permute.xlu1 %3285 }
0x1d0a   :  { %v8486_v46 = vpop.permute.xlu0 %3097  ;;  %9929 = vst [vmem:[#allocation63_spill] sm:$0xff] %v8508_v29 }
0x1d0b   :  { %9919 = vst [vmem:[#allocation53_spill] sm:$0xff] %v8486_v46 }
0x1d0d   :  { %v8512_v20 = vpop.permute.xlu1 %3305 }
0x1d0e   :  { %v8490_v1 = vpop.permute.xlu0 %3101  ;;  %9931 = vst [vmem:[#allocation65_spill] sm:$0xff] %v8512_v20 }
0x1d0f   :  { %9921 = vst [vmem:[#allocation55_spill] sm:$0xff] %v8490_v1 }
0x1d11   :  { %v8516_v26 = vpop.permute.xlu1 %3293 }
0x1d12   :  { %v8494_v6 = vpop.permute.xlu0 %3145  ;;  %9933 = vst [vmem:[#allocation67_spill] sm:$0xff] %v8516_v26 }
0x1d13   :  { %9923 = vst [vmem:[#allocation57_spill] sm:$0xff] %v8494_v6 }
0x1d15   :  { %v8520_v60 = vpop.permute.xlu1 %3297 }
0x1d16   :  { %v8498_v38 = vpop.permute.xlu0 %3165  ;;  %9935 = vst [vmem:[#allocation69_spill] sm:$0xff] %v8520_v60 }
0x1d17   :  { %9924 = vst [vmem:[#allocation58_spill] sm:$0xff] %v8498_v38 }
0x1d1a   :  { %v8502_v36 = vpop.permute.xlu0 %3169 }
0x1d1b   :  { %9926 = vst [vmem:[#allocation60_spill] sm:$0xff] %v8502_v36 }
0x1d1e   :  { %v8506_v41 = vpop.permute.xlu0 %3173 }
0x1d1f   :  { %9928 = vst [vmem:[#allocation62_spill] sm:$0xff] %v8506_v41  ;;  %v8534_v41 = vsub.s32 2, %v8328_v18 }
0x1d21   :  { %9940 = vst [vmem:[#allocation74_spill] sm:$0xff] %v8534_v41 }
0x1d22   :  { %v8510_v30 = vpop.permute.xlu0 %3217 }
0x1d23   :  { %9930 = vst [vmem:[#allocation64_spill] sm:$0xff] %v8510_v30 }
0x1d26   :  { %v8514_v54 = vpop.permute.xlu0 %3237 }
0x1d27   :  { %9932 = vst [vmem:[#allocation66_spill] sm:$0xff] %v8514_v54 }
0x1d2a   :  { %v8518_v23 = vpop.permute.xlu0 %3241 }
0x1d2b   :  { %9934 = vst [vmem:[#allocation68_spill] sm:$0xff] %v8518_v23 }
0x1d2e   :  { %v8522_v14 = vpop.permute.xlu0 %3245 }
0x1d2f   :  { %9936 = vst [vmem:[#allocation70_spill] sm:$0xff] %v8522_v14 }
0x1d32   :  { %v8526_v51 = vpop.permute.xlu0 %3289 }
0x1d33   :  { %9937 = vst [vmem:[#allocation71_spill] sm:$0xff] %v8526_v51 }
0x1d36   :  { %v8528_v34 = vpop.permute.xlu0 %3309 }
0x1d37   :  { %9938 = vst [vmem:[#allocation72_spill] sm:$0xff] %v8528_v34 }
0x1d3a   :  { %v8536_v14 = vpop.permute.xlu0 %3313 }
0x1d3b   :  { %9941 = vst [vmem:[#allocation75_spill] sm:$0xff] %v8536_v14 }
0x1d6d   :  { %v2831_v9 = vpop.xlane.xlu1 %2830 }
0x1d6e   :  { %v2836_v63 = vrot.slane %v2831_v9, %v8336_v22  ;;  %v2840_v59 = vrot.slane %v2831_v9, %v8358_v48  ;;  %v8542_v9 = vsub.s32 3, %v8328_v18 }
0x1d70   :  { %7630 = vrcp.f32 %v2836_v63  ;;  %9943 = vst [vmem:[#allocation77_spill] sm:$0xff] %v8542_v9  ;;  %v8548_v63 = vsub.s32 5, %v8328_v18 }
0x1d71   :  { %7632 = vrcp.f32 %v2840_v59  ;;  %v8539_v15 = vpop.permute.xlu1 %3357  ;;  %v8545_v59 = vsub.s32 4, %v8328_v18 }
0x1d72   :  { %9942 = vst [vmem:[#allocation76_spill] sm:$0xff] %v8539_v15  ;;  %9945 = vst [vmem:[#allocation79_spill] sm:$0xff] %v8548_v63 }
0x1d73   :  { %9944 = vst [vmem:[#allocation78_spill] sm:$0xff] %v8545_v59 }
0x1d75   :  { %v8586_v49 = vpop.permute.xlu1 %3377 }
0x1d76   :  { %9947 = vst [vmem:[#allocation81_spill] sm:$0xff] %v8586_v49 }
0x1d7a   :  { %v7631_v58 = vpop.eup %7630 }
0x1d7b   :  { %v7633_v60 = vpop.eup %7632  ;;  %v2844_v1 = vmul.f32 %v7631_v58, %v8391_v32  ;;  %v8561_v32 = vsub.s32 6, %v8328_v18 }
0x1d7c   :  { %v2846_v55 = vmul.f32 %v7633_v60, %v8393_v35 }
0x1d7d   :  { %v8552_v50 = vrot.slane %v2844_v1, %v8531_v0  ;;  %v8555_v14 = vrot.slane %v2844_v1, %v8336_v22  ;;  %v8558_v58 = vrot.slane %v2844_v1, %v8358_v48  ;;  %v8567_v16 = vrot.slane %v2844_v1, %v8534_v41 }
0x1d7e   :  { %v8564_v23 = vrot.slane %v2846_v55, %v8531_v0  ;;  %v8572_v35 = vrot.slane %v2844_v1, %v8542_v9  ;;  %v8575_v5 = vrot.slane %v2844_v1, %v8545_v59  ;;  %v8578_v61 = vrot.slane %v2844_v1, %v8548_v63  ;;  %v8582_v0 = vpop.permute.xlu0 %3317 }
0x1d7f   :  { %v2903_v60 = vmul.f32 %v8424_v4, %v8555_v14  ;;  %v2967_v18 = vmul.f32 %v8440_v52, %v8558_v58  ;;  %9946 = vst [vmem:[#allocation80_spill] sm:$0xff] %v8582_v0  ;;  %v3399_v36 = vmul.f32 %v8539_v15, %v8552_v50  ;;  %v8589_v4 = vrot.slane %v2844_v1, %v8561_v32 }
0x1d80   :  { %v2904_v26 = vmul.f32 %v8428_v42, %v8555_v14  ;;  %v8595_v40 = vmul.f32 %v8586_v49, %v8564_v23  ;;  %v3039_v52 = vmul.f32 %v8422_v37, %v8567_v16  ;;  %v2968_v0 = vmul.f32 %v8444_v56, %v8558_v58 }
0x1d81   :  { %v2975_v57 = vadd.f32 %v2967_v18, %v2903_v60  ;;  %v3111_v15 = vmul.f32 %v8442_v53, %v8572_v35  ;;  %v3183_v1 = vmul.f32 %v8476_v19, %v8575_v5  ;;  %v3255_v42 = vmul.f32 %v8492_v2, %v8578_v61 }
0x1d82   :  { %9948 = vst [vmem:[#allocation82_spill] sm:$0xff] %v8595_v40  ;;  %v3040_v49 = vmul.f32 %v8466_v17, %v8567_v16  ;;  %v2976_v18 = vadd.f32 %v2968_v0, %v2904_v26  ;;  %v3112_v60 = vmul.f32 %v8478_v25, %v8572_v35  ;;  %v8612_v37 = vrot.slane %v2846_v55, %v8336_v22  ;;  %v8629_v25 = vpop.permute.xlu0 %3361 }
0x1d83   :  { %v3047_v40 = vadd.f32 %v3039_v52, %v2975_v57  ;;  %v3327_v53 = vmul.f32 %v8508_v29, %v8589_v4  ;;  %v3184_v19 = vmul.f32 %v8494_v6, %v8575_v5  ;;  %v8619_v56 = vrot.slane %v2846_v55, %v8358_v48  ;;  %9949 = vst [vmem:[#allocation83_spill] sm:$0xff] %v8629_v25 }
0x1d84   :  { %v8622_v2 = vrot.slane %v2846_v55, %v8534_v41  ;;  %v3048_v26 = vadd.f32 %v3040_v49, %v2976_v18  ;;  %v2907_v0 = vmul.f32 %v8434_v47, %v8612_v37  ;;  %v8627_v52 = vrot.slane %v2846_v55, %v8542_v9 }
0x1d85   :  { %v3119_v57 = vadd.f32 %v3111_v15, %v3047_v40  ;;  %v3256_v29 = vmul.f32 %v8510_v30, %v8578_v61  ;;  %v3328_v6 = vmul.f32 %v8526_v51, %v8589_v4  ;;  %v2971_v17 = vmul.f32 %v8448_v3, %v8619_v56 }
0x1d86   :  { %v8638_v15 = vrot.slane %v2846_v55, %v8545_v59  ;;  %v3120_v49 = vadd.f32 %v3112_v60, %v3048_v26  ;;  %v3400_v18 = vmul.f32 %v8629_v25, %v8552_v50  ;;  %v8643_v47 = vrot.slane %v2846_v55, %v8548_v63 }
0x1d87   :  { %v3191_v40 = vadd.f32 %v3183_v1, %v3119_v57  ;;  %v2979_v9 = vadd.f32 %v2971_v17, %v2907_v0  ;;  %v3043_v30 = vmul.f32 %v8426_v39, %v8622_v2  ;;  %v2908_v51 = vmul.f32 %v8412_v13, %v8612_v37 }
0x1d88   :  { %v2972_v3 = vmul.f32 %v8456_v8, %v8619_v56  ;;  %v3192_v41 = vadd.f32 %v3184_v19, %v3120_v49  ;;  %v3115_v1 = vmul.f32 %v8446_v12, %v8627_v52  ;;  %v8654_v60 = vrot.slane %v2846_v55, %v8561_v32 }
0x1d89   :  { %v3263_v59 = vadd.f32 %v3255_v42, %v3191_v40  ;;  %v3051_v57 = vadd.f32 %v3043_v30, %v2979_v9  ;;  %v3187_v17 = vmul.f32 %v8480_v28, %v8638_v15  ;;  %v3044_v0 = vmul.f32 %v8468_v62, %v8622_v2 }
0x1d8a   :  { %v2980_v26 = vadd.f32 %v2972_v3, %v2908_v51  ;;  %v3264_v13 = vadd.f32 %v3256_v29, %v3192_v41  ;;  %v3259_v42 = vmul.f32 %v8496_v45, %v8643_v47  ;;  %v3116_v19 = vmul.f32 %v8482_v24, %v8627_v52 }
0x1d8b   :  { %v3335_v25 = vadd.f32 %v3327_v53, %v3263_v59  ;;  %v3123_v40 = vadd.f32 %v3115_v1, %v3051_v57  ;;  %v2905_v30 = vmul.f32 %v8414_v33, %v8555_v14  ;;  %v2969_v55 = vmul.f32 %v8416_v27, %v8558_v58 }
0x1d8c   :  { %v3052_v49 = vadd.f32 %v3044_v0, %v2980_v26  ;;  %v3336_v3 = vadd.f32 %v3328_v6, %v3264_v13  ;;  %v3331_v53 = vmul.f32 %v8512_v20, %v8654_v60  ;;  %v3188_v29 = vmul.f32 %v8498_v38, %v8638_v15 }
0x1d8d   :  { %v3407_v51 = vadd.f32 %v3399_v36, %v3335_v25  ;;  %v3195_v41 = vadd.f32 %v3187_v17, %v3123_v40  ;;  %v2977_v59 = vadd.f32 %v2969_v55, %v2905_v30  ;;  %v3041_v1 = vmul.f32 %v8430_v43, %v8567_v16  ;;  %v8680_v25 = vpop.permute.xlu0 %3381 }
0x1d8e   :  { %v3124_v9 = vadd.f32 %v3116_v19, %v3052_v49  ;;  %v3408_v57 = vadd.f32 %v3400_v18, %v3336_v3  ;;  %v3260_v26 = vmul.f32 %v8514_v54, %v8643_v47  ;;  %v3113_v36 = vmul.f32 %v8450_v44, %v8572_v35  ;;  %9950 = vst [vmem:[#allocation84_spill] sm:$0xff] %v8680_v25 }
0x1d8f   :  { %3494 = vperm.xlu1 %7483, %v3407_v51   ;;  %v2909_v13 = vmul.f32 %v8458_v10, %v8612_v37  ;;  %v3267_v6 = vadd.f32 %v3259_v42, %v3195_v41  ;;  %v3049_v0 = vadd.f32 %v3041_v1, %v2977_v59  ;;  %v2973_v19 = vmul.f32 %v8460_v11, %v8619_v56  ;;  %v9952_v1 = vld [vmem:[#allocation30_spill] sm:$0xff] }
0x1d90   :  { %v3196_v17 = vadd.f32 %v3188_v29, %v3124_v9  ;;  %3497 = vperm.xlu0 %7482, %v3408_v57   ;;  %v3332_v18 = vmul.f32 %v8528_v34, %v8654_v60  ;;  %v3404_v40 = vmul.f32 %v8680_v25, %v8564_v23  ;;  %v3185_v49 = vmul.f32 %v8484_v31, %v8575_v5  ;;  %v9951_v9 = vld [vmem:[#allocation29_spill] sm:$0xff]  ;;  %v9953_v25 = vld [vmem:[#allocation82_spill] sm:$0xff] }
0x1d91   :  { %v3045_v30 = vmul.f32 %v8470_v21, %v8622_v2  ;;  %v3339_v55 = vadd.f32 %v3331_v53, %v3267_v6  ;;  %v3121_v51 = vadd.f32 %v3113_v36, %v3049_v0  ;;  %v2981_v3 = vadd.f32 %v2973_v19, %v2909_v13  ;;  %v9955_v6 = vld [vmem:[#allocation37_spill] sm:$0xff]  ;;  %v8705_v0 = vpop.permute.xlu1 %3365 }
0x1d92   :  { %v3268_v42 = vadd.f32 %v3260_v26, %v3196_v17  ;;  %v3257_v29 = vmul.f32 %v8500_v7, %v8578_v61  ;;  %v3117_v41 = vmul.f32 %v8486_v46, %v8627_v52  ;;  %v2906_v59 = vmul.f32 %v9951_v9, %v8555_v14  ;;  %v9954_v26 = vld [vmem:[#allocation67_spill] sm:$0xff]  ;;  %9956 = vst [vmem:[#allocation82_spill] sm:$0xff] %v8705_v0 }
0x1d93   :  { %v2970_v57 = vmul.f32 %v9952_v1, %v8558_v58  ;;  %v3411_v31 = vadd.f32 %v9953_v25, %v3339_v55  ;;  %v3193_v21 = vadd.f32 %v3185_v49, %v3121_v51  ;;  %v3053_v53 = vadd.f32 %v3045_v30, %v2981_v3  ;;  %v9957_v58 = vld [vmem:[#allocation60_spill] sm:$0xff] }
0x1d94   :  { %v3340_v34 = vadd.f32 %v3332_v18, %v3268_v42  ;;  %v3329_v36 = vmul.f32 %v9954_v26, %v8589_v4  ;;  %v3042_v17 = vmul.f32 %v9955_v6, %v8567_v16  ;;  %v3189_v1 = vmul.f32 %v9957_v58, %v8638_v15  ;;  %v9958_v18 = vld [vmem:[#allocation48_spill] sm:$0xff]  ;;  %v9960_v42 = vld [vmem:[#allocation45_spill] sm:$0xff] }
0x1d95   :  { %v2978_v13 = vadd.f32 %v2970_v57, %v2906_v59  ;;  %3506 = vperm.xlu1 %7483, %v3411_v31   ;;  %v3265_v14 = vadd.f32 %v3257_v29, %v3193_v21  ;;  %v3125_v9 = vadd.f32 %v3117_v41, %v3053_v53  ;;  %v3114_v49 = vmul.f32 %v9958_v18, %v8572_v35  ;;  %v9959_v30 = vld [vmem:[#allocation44_spill] sm:$0xff]  ;;  %v9962_v29 = vld [vmem:[#allocation54_spill] sm:$0xff]  ;;  %v9963_v59 = vld [vmem:[#allocation49_spill] sm:$0xff] }
0x1d96   :  { %v3412_v19 = vadd.f32 %v3404_v40, %v3340_v34  ;;  %v2910_v55 = vmul.f32 %v9959_v30, %v8612_v37  ;;  %v2974_v51 = vmul.f32 %v9960_v42, %v8619_v56  ;;  %v3401_v16 = vmul.f32 %v8705_v0, %v8552_v50  ;;  %v9961_v31 = vld [vmem:[#allocation68_spill] sm:$0xff]  ;;  %v9964_v56 = vld [vmem:[#allocation75_spill] sm:$0xff] }
0x1d97   :  { %v3050_v25 = vadd.f32 %v3042_v17, %v2978_v13  ;;  %v3337_v34 = vadd.f32 %v3329_v36, %v3265_v14  ;;  %v3197_v21 = vadd.f32 %v3189_v1, %v3125_v9  ;;  %v3261_v40 = vmul.f32 %v9961_v31, %v8643_v47  ;;  %v8725_v17 = vpop.permute.xlu0 %3385  ;;  %v9966_v9 = vld [vmem:[#allocation61_spill] sm:$0xff]  ;;  %v9967_v14 = vld [vmem:[#allocation55_spill] sm:$0xff] }
0x1d98   :  { %3509 = vperm.xlu0 %7482, %v3412_v19   ;;  %v3186_v41 = vmul.f32 %v9962_v29, %v8575_v5  ;;  %v2982_v35 = vadd.f32 %v2974_v51, %v2910_v55  ;;  %v3046_v37 = vmul.f32 %v9963_v59, %v8622_v2  ;;  %v3333_v13 = vmul.f32 %v9964_v56, %v8654_v60  ;;  %v8731_v5 = vpop.permute.xlu1 %3369  ;;  %v9969_v51 = vld [vmem:[#allocation69_spill] sm:$0xff] }
0x1d99   :  { %v3122_v3 = vadd.f32 %v3114_v49, %v3050_v25  ;;  %v3409_v57 = vadd.f32 %v3401_v16, %v3337_v34  ;;  %v3269_v53 = vadd.f32 %v3261_v40, %v3197_v21  ;;  %9965 = vst [vmem:[#allocation67_spill] sm:$0xff] %v8725_v17  ;;  %v3258_v1 = vmul.f32 %v9966_v9, %v8578_v61  ;;  %v9970_v21 = vld [vmem:[#allocation62_spill] sm:$0xff]  ;;  %v10020_v9 = vld [vmem:[#allocation63_spill] sm:$0xff]  ;;  %v10024_v29 = vld [vmem:[#allocation57_spill] sm:$0xff] }
0x1d9a   :  { %v3054_v19 = vadd.f32 %v3046_v37, %v2982_v35  ;;  %v3118_v25 = vmul.f32 %v9967_v14, %v8627_v52  ;;  %9968 = vst [vmem:[#allocation37_spill] sm:$0xff] %v8731_v5  ;;  %v3405_v2 = vmul.f32 %v8725_v17, %v8564_v23  ;;  %v3330_v16 = vmul.f32 %v9969_v51, %v8589_v4  ;;  %v9971_v35 = vld [vmem:[#allocation70_spill] sm:$0xff]  ;;  %v10025_v56 = vld [vmem:[#allocation41_spill] sm:$0xff] }
0x1d9b   :  { %v3194_v36 = vadd.f32 %v3186_v41, %v3122_v3  ;;  %3500 = vperm.xlu1 %7483, %v3409_v57   ;;  %v3341_v49 = vadd.f32 %v3333_v13, %v3269_v53  ;;  %v3190_v40 = vmul.f32 %v9970_v21, %v8638_v15  ;;  %v3402_v3 = vmul.f32 %v8731_v5, %v8552_v50  ;;  %v9972_v13 = vld [vmem:[#allocation80_spill] sm:$0xff]  ;;  %v8745_v4 = vpop.permute.xlu0 %3389 }
0x1d9c   :  { %v3126_v34 = vadd.f32 %v3118_v25, %v3054_v19  ;;  %v3262_v37 = vmul.f32 %v9971_v35, %v8643_v47  ;;  %9973 = vst [vmem:[#allocation60_spill] sm:$0xff] %v8745_v4  ;;  %v46_v19 = vld [vmem:[#allocation2 + $0x88] sm:$0xff]  ;;  %v3406_v50 = vmul.f32 %v8745_v4, %v8564_v23  ;;  %v9975_v47 = vmov 0.0|0.0   ;;  %v9977_v23 = vld [vmem:[#allocation25_spill] sm:$0xff] }
0x1d9d   :  { %v3266_v55 = vadd.f32 %v3258_v1, %v3194_v36  ;;  %v3413_v61 = vadd.f32 %v3405_v2, %v3341_v49  ;;  %v3334_v36 = vmul.f32 %v9972_v13, %v8654_v60  ;;  %v45_v1 = vld [vmem:[#allocation2 + $0x80] sm:$0xff]  ;;  %v47_v2 = vld [vmem:[#allocation2 + $0x90] sm:$0xff] }
0x1d9e   :  { %v3198_v41 = vadd.f32 %v3190_v40, %v3126_v34  ;;  %v8749_v25 = vpack.c.bf16 %v46_v19, %v45_v1  ;;  %v10017_v35 = vld [vmem:[#allocation73_spill] sm:$0xff] }
0x1d9f   :  { %v3338_v52 = vadd.f32 %v3330_v16, %v3266_v55  ;;  %3512 = vperm.xlu0 %7482, %v3413_v61   ;;  %v48_v55 = vld [vmem:[#allocation2 + $0x98] sm:$0xff]  ;;  %v3521_v61 = vadd.s32 4294967288, %v9977_v23 }
0x1da0   :  { %v3270_v53 = vadd.f32 %v3262_v37, %v3198_v41  ;;  %9974 = vst [vmem:[#allocation48_spill] sm:$0xff] %v8749_v25  ;;  %7336 = vmatpush3.bf16.msra.mxu1 %v8749_v25  ;;  %v8753_v60 = vpack.c.bf16 %v48_v55, %v47_v2  ;;  %v3535_v41 = vadd.s32 4294967272, %v9977_v23 }
0x1da1   :  { %v3410_v57 = vadd.f32 %v3402_v3, %v3338_v52  ;;  %7337 = vmatprep.subr.bf16.mxu1 %v9975_v47  ;;  %v3528_v52 = vadd.s32 4294967280, %v9977_v23 }
0x1da2   :  { %v3342_v15 = vadd.f32 %v3334_v36, %v3270_v53  ;;  %9976 = vst [vmem:[#allocation44_spill] sm:$0xff] %v8753_v60 }
0x1da3   :  { %3503 = vperm.xlu1 %7483, %v3410_v57   ;;  %v9978_v57 = vld [vmem:[#allocation16_spill] sm:$0xff] }
0x1da4   :  { %v3414_v49 = vadd.f32 %v3406_v50, %v3342_v15  ;;  %7339 = vmatpush3.bf16.msra.mxu1 %v8753_v60  ;;  %v8761_v53 = vsub.s32 %v3521_v61, %v9978_v57  ;;  %v8764_v36 = vsub.s32 %v3528_v52, %v9978_v57  ;;  %v8767_v1 = vsub.s32 %v3535_v41, %v9978_v57  ;;  %v9982_v15 = vld [vmem:[#allocation26_spill] sm:$0xff] }
0x1da5   :  { %7346 = vmatprep.subr.bf16.mxu1 %v9975_v47 }
0x1da6   :  { %3515 = vperm.xlu0 %7482, %v3414_v49   ;;  %9979 = vst [vmem:[#allocation45_spill] sm:$0xff] %v8761_v53  ;;  %9980 = vst [vmem:[#allocation68_spill] sm:$0xff] %v8764_v36 }
0x1da7   :  { %9981 = vst [vmem:[#allocation25_spill] sm:$0xff] %v8767_v1 }
0x1e0e   :  { %v3495_v16 = vpop.permute.xlu1 %3494 }
0x1e0f   :  { %v3498_v34 = vpop.permute.xlu0 %3497  ;;  %v3520_v50 = vrot.slane %v3495_v16, %v9982_v15 }
0x1e10   :  { %v3525_v49 = vrot.slane %v3498_v34, %v8761_v53 }
0x1e12   :  { %v3527_v41 = vsel %vm3526_vm15, %v3525_v49, %v3520_v50  ;;  %v8787_v50 = vld [vmem:[#allocation2 + $0x102] ss:$0 sm:$0xff] }
0x1e13   :  { %9984 = vst [vmem:[#allocation16_spill] sm:$0xff] %v8787_v50 }
0x1e14   :  { %v3507_v40 = vpop.permute.xlu1 %3506 }
0x1e15   :  { %v3545_v23 = vrot.slane %v3507_v40, %v9982_v15 }
0x1e17   :  { %v3510_v3 = vpop.permute.xlu0 %3509 }
0x1e18   :  { %v3549_v61 = vrot.slane %v3510_v3, %v8761_v53 }
0x1e1a   :  { %v3501_v37 = vpop.permute.xlu1 %3500  ;;  %v3550_v34 = vsel %vm3526_vm15, %v3549_v61, %v3545_v23 }
0x1e1b   :  { %v3532_v2 = vrot.slane %v3501_v37, %v8764_v36 }
0x1e1d   :  { %v3534_v16 = vsel %vm3533_vm0, %v3532_v2, %v3527_v41  ;;  %v9985_v2 = vld [vmem:[#allocation21_spill] sm:$0xff] }
0x1e1e   :  { %v3513_v19 = vpop.permute.xlu0 %3512 }
0x1e1f   :  { %v3554_v4 = vrot.slane %v3513_v19, %v8764_v36  ;;  %v9983_v19 = vmov 0.0  }
0x1e21   :  { %v3555_v40 = vsel %vm3533_vm0, %v3554_v4, %v3550_v34 }
0x1e22   :  { %v3504_v55 = vpop.permute.xlu1 %3503 }
0x1e23   :  { %v3539_v52 = vrot.slane %v3504_v55, %v8767_v1 }
0x1e25   :  { %v3516_v57 = vpop.permute.xlu0 %3515  ;;  %v3541_v37 = vsel %vm3540_vm1, %v3539_v52, %v3534_v16 }
0x1e26   :  { %v3559_v13 = vrot.slane %v3516_v57, %v8767_v1 }
0x1e28   :  { %v3560_v3 = vsel %vm3540_vm1, %v3559_v13, %v3555_v40  ;;  %v9986_v40 = vld [vmem:[#allocation8_spill] sm:$0xff] }
0x1e29   :  { %v3561_v55 = vsel %vm2787_vm13, %v3560_v3, %v3541_v37 }
0x1e2a   :  { %6958 = vmatmul.mubr.msk.f32.vlgmr.msra.gmra.mrb[28].mxu1 %vm209_vm5, %v3561_v55 }
0x1e2b   :  { %6979 = vmatprep.mubr.msk.f32.mxu1 %vm7799_vm4, %v9983_v19 }
0x1efd   :  { %v3630_v49 = vpop.f32.mrb[28].mxu1 }
0x1efe   :  { %v3631_v23 = vadd.f32 %v3630_v49, %v9985_v2  ;;  %v6959_v61 = vpop.f32.mrb[29].mxu1  ;;  %v49_v2 = vld [vmem:[#allocation2 + $0xc0] sm:$0xff] }
0x1eff   :  { %v51_v61 = vld [vmem:[#allocation2 + $0xd0] sm:$0xff] }
0x1f00   :  { %v3638_v52 = vadd.f32 %v8787_v50, %v3631_v23  ;;  %v50_v23 = vld [vmem:[#allocation2 + $0xc8] sm:$0xff] }
0x1f02   :  { %7634 = vtanh.f32 %v3638_v52  ;;  %v6366_v13 = vmul.f32 -1.442695, %v3638_v52  ;;  %v8797_v52 = vpack.c.bf16 %v50_v23, %v49_v2  ;;  %v8821_v2 = vld [vmem:[#allocation2 + $0x103] ss:$0 sm:$0xff] }
0x1f03   :  { %9994 = vst [vmem:[#allocation86_spill] sm:$0xff] %v8821_v2 }
0x1f04   :  { %7636 = vpow2.f32 %v6366_v13  ;;  %9988 = vst [vmem:[#allocation8_spill] sm:$0xff] %v8797_v52  ;;  %7348 = vmatpush3.bf16.msra.mxu1 %v8797_v52  ;;  %v10012_v52 = vld [vmem:[#allocation31_spill] sm:$0xff] }
0x1f05   :  { %7349 = vmatprep.subr.bf16.mxu1 %v9975_v47 }
0x1f0c   :  { %v7635_v41 = vpop.eup %7634 }
0x1f0d   :  { %3648 = vrot.lane.b32.xlu1 %v7635_v41, %s7801_s1  ;;  %v52_v41 = vld [vmem:[#allocation2 + $0xd8] sm:$0xff] }
0x1f0e   :  { %v7637_v4 = vpop.eup %7636  ;;  %v8800_v13 = vpack.c.bf16 %v52_v41, %v51_v61  ;;  %v9995_v61 = vld [vmem:[#allocation23_spill] sm:$0xff] }
0x1f0f   :  { %v3642_v16 = vadd.f32 1.0, %v7637_v4 }
0x1f10   :  { %9989 = vst [vmem:[#allocation85_spill] sm:$0xff] %v8800_v13  ;;  %7351 = vmatpush3.bf16.msra.mxu1 %v8800_v13 }
0x1f11   :  { %7638 = vrcp.f32 %v3642_v16  ;;  %7358 = vmatprep.subr.bf16.mxu1 %v9975_v47 }
0x1f1b   :  { %v7639_v57 = vpop.eup %7638 }
0x1f1c   :  { %v3646_v3 = vmul.f32 %v7639_v57, %v9986_v40  ;;  %v9990_v40 = vld [vmem:[#allocation12_spill] sm:$0xff] }
0x1f7f   :  { %v3649_v34 = vpop.permute.xlu1 %3648 }
0x1f80   :  { %v3651_v37 = vmul.f32 %v7639_v57, %v3649_v34 }
0x1f82   :  { %3653 = vrot.lane.b32.xlu0 %v3651_v37, %s7802_s7 }
0x1ff4   :  { %v3654_v55 = vpop.permute.xlu0 %3653 }
0x1ff5   :  { %v8794_v49 = vadd.f32 %v3654_v55, %v3646_v3  ;;  %v9991_v3 = vld [vmem:[#allocation13_spill] sm:$0xff]  ;;  %v9992_v55 = vld [vmem:[#allocation14_spill] sm:$0xff] }
0x1ff7   :  { %9987 = vst [vmem:[#allocation21_spill] sm:$0xff] %v8794_v49  ;;  %7640 = vtanh.f32 %v8794_v49 }
0x2001   :  { %v7641_v4 = vpop.eup %7640 }
0x2002   :  { %3659 = vrot.lane.b32.xlu1 %v7641_v4, %s7801_s1 }
0x2074   :  { %v3660_v16 = vpop.permute.xlu1 %3659 }
0x2075   :  { %v3662_v34 = vmul.f32 %v7639_v57, %v3660_v16  ;;  %v9993_v57 = vld [vmem:[#allocation15_spill] sm:$0xff] }
0x2077   :  { %3734 = vrot.lane.b32.xlu0 %v3662_v34, %s7802_s7 }
0x20e9   :  { %v3735_v37 = vpop.permute.xlu0 %3734 }
0x20ea   :  { %6980 = vmatmul.mubr.msk.f32.vlgmr.msra.gmra.mrb[30].mxu1 %vm209_vm5, %v3735_v37 }
0x20eb   :  { %7360 = vmatpush3.bf16.msra.mxu1 %v9990_v40  ;;  %7001 = vmatprep.mubr.msk.f32.mxu1 %vm7799_vm4, %v9983_v19 }
0x20ec   :  { %7361 = vmatprep.subr.bf16.mxu1 %v9975_v47 }
0x20ef   :  { %7363 = vmatpush3.bf16.msra.mxu1 %v9991_v3 }
0x20f0   :  { %7370 = vmatprep.subr.bf16.mxu1 %v9975_v47 }
0x20f2   :  { %7002 = vmatmul.mubr.msk.f32.vlgmr.msra.gmra.mrb[32].mxu1 %vm209_vm5, %v3735_v37 }
0x20f3   :  { %7372 = vmatpush3.bf16.msra.mxu1 %v9992_v55  ;;  %7023 = vmatprep.mubr.msk.f32.mxu1 %vm7799_vm4, %v9983_v19 }
0x20f4   :  { %7373 = vmatprep.subr.bf16.mxu1 %v9975_v47 }
0x20f7   :  { %7375 = vmatpush3.bf16.msra.mxu1 %v9993_v57 }
0x20f8   :  { %7382 = vmatprep.subr.bf16.mxu1 %v9975_v47 }
0x21bd   :  { %v3804_v23 = vpop.f32.mrb[30].mxu1 }
0x21be   :  { %v3805_v41 = vadd.f32 %v3804_v23, %v9995_v61  ;;  %v6981_v4 = vpop.f32.mrb[31].mxu1  ;;  %v9997_v23 = vld [vmem:[#allocation9_spill] sm:$0xff] }
0x21c0   :  { %v3812_v16 = vadd.f32 %v8821_v2, %v3805_v41 }
0x21c2   :  { %7642 = vtanh.f32 %v3812_v16  ;;  %v6370_v3 = vmul.f32 -1.442695, %v3812_v16  ;;  %v10003_v16 = vld [vmem:[#allocation17_spill] sm:$0xff] }
0x21c4   :  { %7644 = vpow2.f32 %v6370_v3 }
0x21c5   :  { %v8825_v34 = vpop.f32.mrb[32].mxu1 }
0x21c6   :  { %9996 = vst [vmem:[#allocation23_spill] sm:$0xff] %v8825_v34  ;;  %v7003_v37 = vpop.f32.mrb[33].mxu1 }
0x21cc   :  { %v7643_v55 = vpop.eup %7642 }
0x21cd   :  { %3822 = vrot.lane.b32.xlu1 %v7643_v55, %s7801_s1 }
0x21ce   :  { %v7645_v57 = vpop.eup %7644 }
0x21cf   :  { %v3816_v40 = vadd.f32 1.0, %v7645_v57 }
0x21d1   :  { %7646 = vrcp.f32 %v3816_v40 }
0x21db   :  { %v7647_v49 = vpop.eup %7646 }
0x21dc   :  { %v3820_v61 = vmul.f32 %v7647_v49, %v9997_v23 }
0x223f   :  { %v3823_v50 = vpop.permute.xlu1 %3822 }
0x2240   :  { %v3825_v13 = vmul.f32 %v7647_v49, %v3823_v50  ;;  %v10000_v50 = vld [vmem:[#allocation10_spill] sm:$0xff] }
0x2242   :  { %3827 = vrot.lane.b32.xlu0 %v3825_v13, %s7802_s7 }
0x22b4   :  { %v3828_v41 = vpop.permute.xlu0 %3827 }
0x22b5   :  { %v8830_v4 = vadd.f32 %v3828_v41, %v3820_v61 }
0x22b7   :  { %9998 = vst [vmem:[#allocation9_spill] sm:$0xff] %v8830_v4  ;;  %7648 = vtanh.f32 %v8830_v4 }
0x22c1   :  { %v7649_v37 = vpop.eup %7648 }
0x22c2   :  { %3833 = vrot.lane.b32.xlu1 %v7649_v37, %s7801_s1 }
0x2334   :  { %v3834_v55 = vpop.permute.xlu1 %3833 }
0x2335   :  { %v8834_v3 = vmul.f32 %v7647_v49, %v3834_v55  ;;  %v10001_v49 = vld [vmem:[#allocation11_spill] sm:$0xff] }
0x2337   :  { %9999 = vst [vmem:[#allocation87_spill] sm:$0xff] %v8834_v3  ;;  %3838 = vrot.lane.b32.xlu0 %v8834_v3, %s7802_s7 }
0x23a9   :  { %v3839_v40 = vpop.permute.xlu0 %3838 }
0x23aa   :  { %6991 = vmatmul.mubr.msk.f32.vlgmr.msra.gmra.mrb[32].mxu0 %vm209_vm5, %v3839_v40  ;;  %7024 = vmatmul.mubr.msk.f32.vlgmr.msra.gmra.mrb[34].mxu1 %vm209_vm5, %v3839_v40 }
0x23ab   :  { %7384 = vmatpush3.bf16.msra.mxu1 %v10000_v50  ;;  %7366 = vmatpush3.bf16.msra.mxu0 %v8749_v25  ;;  %v10005_v50 = vld [vmem:[#allocation19_spill] sm:$0xff] }
0x23ac   :  { %7385 = vmatprep.subr.bf16.mxu1 %v9975_v47  ;;  %7367 = vmatprep.subr.bf16.mxu0 %v9975_v47 }
0x23ad   :  { %7012 = vmatprep.mubr.msk.f32.mxu0 %vm7799_vm4, %v9983_v19  ;;  %7045 = vmatprep.mubr.msk.f32.mxu1 %vm7799_vm4, %v9983_v19 }
0x23af   :  { %7387 = vmatpush3.bf16.msra.mxu1 %v10001_v49  ;;  %7369 = vmatpush3.bf16.msra.mxu0 %v8753_v60  ;;  %v10004_v49 = vld [vmem:[#allocation20_spill] sm:$0xff] }
0x23b0   :  { %7376 = vmatprep.subr.bf16.mxu0 %v9975_v47  ;;  %7394 = vmatprep.subr.bf16.mxu1 %v9975_v47 }
0x247d   :  { %v3908_v13 = vpop.f32.mrb[32].mxu0  ;;  %v8852_v57 = vpop.f32.mrb[34].mxu1 }
0x247e   :  { %10002 = vst [vmem:[#allocation88_spill] sm:$0xff] %v8852_v57  ;;  %v3919_v23 = vrot.slane %v3908_v13, %v10003_v16  ;;  %v6992_v61 = vpop.f32.mrb[33].mxu0  ;;  %v7025_v41 = vpop.f32.mrb[35].mxu1  ;;  %v10006_v57 = vld [vmem:[#allocation22_spill] sm:$0xff] }
0x2480   :  { %v3920_v37 = vcombine.high %v3919_v23, %v3919_v23  ;;  %v3927_v55 = vrot.slane %v3919_v23, %v10003_v16 }
0x2482   :  { %v3934_v40 = vrot.slane %v3920_v37, %v10003_v16  ;;  %v3938_v3 = vrot.slane %v3927_v55, %v8336_v22 }
0x2484   :  { %v3942_v60 = vrot.slane %v3934_v40, %v8336_v22  ;;  %v3945_v25 = vadd.f32 %v3938_v3, %v10004_v49 }
0x2486   :  { %v3946_v4 = vadd.f32 %v10005_v50, %v3942_v60  ;;  %7650 = vtanh.f32 %v3945_v25 }
0x2488   :  { %7652 = vtanh.f32 %v3946_v4 }
0x2490   :  { %v7651_v2 = vpop.eup %7650 }
0x2491   :  { %v3949_v13 = vmul.f32 %v7651_v2, %v10006_v57 }
0x2492   :  { %v7653_v61 = vpop.eup %7652 }
0x2493   :  { %v3951_v41 = vsel %vm209_vm5, %v3949_v13, 0.0  ;;  %v3950_v23 = vmul.f32 %v7653_v61, %v10006_v57 }
0x2494   :  { %3952 = vadd.xlane.f32.xlu1 %v3951_v41 }
0x2495   :  { %v3954_v37 = vsel %vm209_vm5, %v3950_v23, 0.0 }
0x2496   :  { %3955 = vadd.xlane.f32.xlu0 %v3954_v37 }
0x2521   :  { %v3953_v55 = vpop.xlane.xlu1 %3952 }
0x2522   :  { %v3962_v3 = vrot.slane %v3953_v55, %v9982_v15 }
0x2523   :  { %v3956_v40 = vpop.xlane.xlu0 %3955 }
0x2524   :  { %v3966_v60 = vrot.slane %v3956_v40, %v9982_v15 }
0x2526   :  { %v3967_v25 = vsel %vm2787_vm13, %v3966_v60, %v3962_v3 }
0x2527   :  { %v3969_v4 = vsel %vm2790_vm14, %v3967_v25, -inf }
0x2528   :  { %3970 = vmax.xlane.f32.xlu0 %v3969_v4 }
0x25b5   :  { %v3971_v2 = vpop.xlane.xlu0 %3970 }
0x25b6   :  { %v3976_v13 = vrot.slane %v3971_v2, %v8336_v22  ;;  %v3980_v57 = vrot.slane %v3971_v2, %v8358_v48 }
0x25b8   :  { %v3983_v61 = vsub.f32 %v3953_v55, %v3976_v13  ;;  %v3984_v41 = vsub.f32 %v3956_v40, %v3980_v57 }
0x25ba   :  { %v3985_v23 = vmul.f32 1.442695, %v3983_v61  ;;  %v3987_v37 = vmul.f32 1.442695, %v3984_v41 }
0x25bc   :  { %7654 = vpow2.f32 %v3985_v23 }
0x25bd   :  { %7656 = vpow2.f32 %v3987_v37  ;;  %v10007_v37 = vld [vmem:[#allocation74_spill] sm:$0xff] }
0x25c6   :  { %v7655_v50 = vpop.eup %7654 }
0x25c7   :  { %v7657_v49 = vpop.eup %7656  ;;  %3992 = vperm.xlu0 %7482, %v7655_v50  }
0x25c8   :  { %3995 = vperm.xlu1 %7483, %v7657_v49  }
0x2646   :  { %v3993_v16 = vpop.permute.xlu0 %3992 }
0x2647   :  { %v3996_v3 = vpop.permute.xlu1 %3995  ;;  %v4000_v60 = vrot.slane %v3993_v16, %v9982_v15 }
0x2648   :  { %v4004_v25 = vrot.slane %v3996_v3, %v9982_v15  ;;  %v10013_v15 = vld [vmem:[#allocation34_spill] sm:$0xff] }
0x264a   :  { %v4005_v4 = vsel %vm2787_vm13, %v4004_v25, %v4000_v60  ;;  %v10008_v60 = vld [vmem:[#allocation77_spill] sm:$0xff] }
0x264b   :  { %v4007_v2 = vsel %vm2790_vm14, %v4005_v4, 0.0  ;;  %v10009_v4 = vld [vmem:[#allocation78_spill] sm:$0xff] }
0x264c   :  { %4008 = vadd.xlane.f32.xlu1 %v4007_v2 }
0x26d9   :  { %v4009_v55 = vpop.xlane.xlu1 %4008 }
0x26da   :  { %v4014_v40 = vrot.slane %v4009_v55, %v8336_v22  ;;  %v4018_v13 = vrot.slane %v4009_v55, %v8358_v48 }
0x26dc   :  { %7658 = vrcp.f32 %v4014_v40  ;;  %v10010_v40 = vld [vmem:[#allocation32_spill] sm:$0xff] }
0x26dd   :  { %7660 = vrcp.f32 %v4018_v13  ;;  %v10011_v13 = vld [vmem:[#allocation38_spill] sm:$0xff] }
0x26e6   :  { %v7659_v57 = vpop.eup %7658 }
0x26e7   :  { %v4022_v61 = vmul.f32 %v7659_v57, %v7655_v50  ;;  %v7661_v41 = vpop.eup %7660 }
0x26e8   :  { %v4024_v55 = vmul.f32 %v7661_v41, %v7657_v49  ;;  %v10014_v49 = vld [vmem:[#allocation40_spill] sm:$0xff] }
0x26e9   :  { %v8878_v23 = vrot.slane %v4022_v61, %v8336_v22  ;;  %v8881_v16 = vrot.slane %v4022_v61, %v8358_v48  ;;  %v8884_v3 = vrot.slane %v4022_v61, %v10007_v37  ;;  %v8887_v25 = vrot.slane %v4022_v61, %v10008_v60 }
0x26ea   :  { %v8890_v2 = vrot.slane %v4022_v61, %v10009_v4  ;;  %v8897_v34 = vrot.slane %v4022_v61, %v8548_v63  ;;  %v8900_v47 = vrot.slane %v4022_v61, %v8561_v32  ;;  %v8913_v51 = vrot.slane %v4022_v61, %v10017_v35 }
0x26eb   :  { %v4033_v50 = vmul.f32 %v8878_v23, %v10010_v40  ;;  %v4049_v57 = vmul.f32 %v8881_v16, %v10011_v13  ;;  %v4073_v1 = vmul.f32 %v8884_v3, %v10012_v52  ;;  %v4034_v36 = vmul.f32 %v8878_v23, %v10013_v15  ;;  %v10015_v40 = vld [vmem:[#allocation39_spill] sm:$0xff]  ;;  %v10016_v13 = vld [vmem:[#allocation50_spill] sm:$0xff]  ;;  %v10019_v15 = vld [vmem:[#allocation56_spill] sm:$0xff] }
0x26ec   :  { %v4050_v41 = vmul.f32 %v8881_v16, %v10014_v49  ;;  %v4097_v53 = vmul.f32 %v8887_v25, %v10015_v40  ;;  %v4121_v5 = vmul.f32 %v8890_v2, %v10016_v13  ;;  %v8918_v21 = vrot.slane %v4024_v55, %v8336_v22  ;;  %v10023_v22 = vld [vmem:[#allocation76_spill] sm:$0xff] }
0x26ed   :  { %v4057_v19 = vadd.f32 %v4049_v57, %v4033_v50  ;;  %v10018_v57 = vld [vmem:[#allocation46_spill] sm:$0xff]  ;;  %v4145_v49 = vmul.f32 %v8897_v34, %v10019_v15  ;;  %v4169_v40 = vmul.f32 %v8900_v47, %v10020_v9  ;;  %v8925_v14 = vrot.slane %v4024_v55, %v8358_v48 }
0x26ee   :  { %v4058_v50 = vadd.f32 %v4050_v41, %v4034_v36  ;;  %v4074_v52 = vmul.f32 %v8884_v3, %v10018_v57  ;;  %v8928_v61 = vrot.slane %v4024_v55, %v10007_v37  ;;  %v10022_v57 = vld [vmem:[#allocation36_spill] sm:$0xff]  ;;  %v4193_v15 = vmul.f32 %v8913_v51, %v10023_v22 }
0x26ef   :  { %v4081_v17 = vadd.f32 %v4073_v1, %v4057_v19  ;;  %v10021_v19 = vld [vmem:[#allocation51_spill] sm:$0xff]  ;;  %v4037_v13 = vmul.f32 %v8918_v21, %v10022_v57  ;;  %v4122_v9 = vmul.f32 %v8890_v2, %v10024_v29  ;;  %v4053_v48 = vmul.f32 %v8925_v14, %v10025_v56 }
0x26f0   :  { %v4082_v36 = vadd.f32 %v4074_v52, %v4058_v50  ;;  %v4098_v41 = vmul.f32 %v8887_v25, %v10021_v19  ;;  %v8941_v37 = vrot.slane %v4024_v55, %v10008_v60  ;;  %v8944_v52 = vrot.slane %v4024_v55, %v10009_v4  ;;  %v10026_v19 = vld [vmem:[#allocation27_spill] sm:$0xff] }
0x26f1   :  { %v4105_v1 = vadd.f32 %v4097_v53, %v4081_v17  ;;  %v8947_v50 = vrot.slane %v4024_v55, %v8548_v63  ;;  %v4061_v57 = vadd.f32 %v4053_v48, %v4037_v13  ;;  %v4077_v22 = vmul.f32 %v8928_v61, %v8426_v39 }
0x26f2   :  { %v4106_v53 = vadd.f32 %v4098_v41, %v4082_v36  ;;  %v4038_v29 = vmul.f32 %v8918_v21, %v10026_v19  ;;  %v4054_v56 = vmul.f32 %v8925_v14, %v8456_v8  ;;  %v10028_v36 = vld [vmem:[#allocation71_spill] sm:$0xff]  ;;  %v4101_v48 = vmul.f32 %v8941_v37, %v8446_v12 }
0x26f3   :  { %v4129_v17 = vadd.f32 %v4121_v5, %v4105_v1  ;;  %v10027_v5 = vld [vmem:[#allocation64_spill] sm:$0xff]  ;;  %v4170_v41 = vmul.f32 %v8900_v47, %v10028_v36  ;;  %v4085_v63 = vadd.f32 %v4077_v22, %v4061_v57  ;;  %v4078_v39 = vmul.f32 %v8928_v61, %v8468_v62 }
0x26f4   :  { %v4130_v59 = vadd.f32 %v4122_v9, %v4106_v53  ;;  %v4146_v1 = vmul.f32 %v8897_v34, %v10027_v5  ;;  %v4062_v13 = vadd.f32 %v4054_v56, %v4038_v29  ;;  %v8966_v9 = vrot.slane %v4024_v55, %v8561_v32 }
0x26f5   :  { %v4153_v60 = vadd.f32 %v4145_v49, %v4129_v17  ;;  %v4125_v49 = vmul.f32 %v8944_v52, %v8480_v28  ;;  %v4109_v17 = vadd.f32 %v4101_v48, %v4085_v63  ;;  %v4149_v53 = vmul.f32 %v8947_v50, %v8496_v45 }
0x26f6   :  { %v4154_v4 = vadd.f32 %v4146_v1, %v4130_v59  ;;  %v4086_v22 = vadd.f32 %v4078_v39, %v4062_v13  ;;  %v4102_v57 = vmul.f32 %v8941_v37, %v8482_v24  ;;  %v4051_v59 = vmul.f32 %v8881_v16, %v8416_v27  ;;  %v10029_v39 = vld [vmem:[#allocation83_spill] sm:$0xff] }
0x26f7   :  { %v4177_v19 = vadd.f32 %v4169_v40, %v4153_v60  ;;  %v4035_v60 = vmul.f32 %v8878_v23, %v8414_v33  ;;  %v4133_v40 = vadd.f32 %v4125_v49, %v4109_v17  ;;  %v8977_v1 = vrot.slane %v4024_v55, %v10017_v35 }
0x26f8   :  { %v4178_v56 = vadd.f32 %v4170_v41, %v4154_v4  ;;  %v4110_v63 = vadd.f32 %v4102_v57, %v4086_v22  ;;  %v4126_v48 = vmul.f32 %v8944_v52, %v8498_v38  ;;  %v4194_v13 = vmul.f32 %v8913_v51, %v10029_v39 }
0x26f9   :  { %v4201_v29 = vadd.f32 %v4193_v15, %v4177_v19  ;;  %v4173_v15 = vmul.f32 %v8966_v9, %v8512_v20  ;;  %v4059_v4 = vadd.f32 %v4051_v59, %v4035_v60  ;;  %v4075_v19 = vmul.f32 %v8884_v3, %v8430_v43  ;;  %v10030_v59 = vld [vmem:[#allocation81_spill] sm:$0xff] }
0x26fa   :  { %v4157_v41 = vadd.f32 %v4149_v53, %v4133_v40  ;;  %v4134_v49 = vadd.f32 %v4126_v48, %v4110_v63  ;;  %v4150_v55 = vmul.f32 %v8947_v50, %v8514_v54  ;;  %v4099_v17 = vmul.f32 %v8887_v25, %v8450_v44  ;;  %v10031_v40 = vld [vmem:[#allocation72_spill] sm:$0xff] }
0x26fb   :  { %4288 = vperm.xlu0 %7482, %v4201_v29   ;;  %v4202_v22 = vadd.f32 %v4194_v13, %v4178_v56  ;;  %v4083_v57 = vadd.f32 %v4075_v19, %v4059_v4  ;;  %v4039_v29 = vmul.f32 %v8918_v21, %v8458_v10  ;;  %v4055_v20 = vmul.f32 %v8925_v14, %v8460_v11  ;;  %v10032_v54 = vld [vmem:[#allocation52_spill] sm:$0xff]  ;;  %v10033_v4 = vld [vmem:[#allocation47_spill] sm:$0xff] }
0x26fc   :  { %v4181_v60 = vadd.f32 %v4173_v15, %v4157_v41  ;;  %v4197_v43 = vmul.f32 %v8977_v1, %v10030_v59  ;;  %v4158_v53 = vadd.f32 %v4150_v55, %v4134_v49  ;;  %v4174_v63 = vmul.f32 %v8966_v9, %v10031_v40  ;;  %v10034_v49 = vld [vmem:[#allocation29_spill] sm:$0xff] }
0x26fd   :  { %v4107_v48 = vadd.f32 %v4099_v17, %v4083_v57  ;;  %v4123_v56 = vmul.f32 %v8890_v2, %v10032_v54  ;;  %v4063_v13 = vadd.f32 %v4055_v20, %v4039_v29  ;;  %v4079_v19 = vmul.f32 %v8928_v61, %v10033_v4  ;;  %v10035_v57 = vld [vmem:[#allocation30_spill] sm:$0xff]  ;;  %v10036_v20 = vld [vmem:[#allocation84_spill] sm:$0xff] }
0x26fe   :  { %v4182_v10 = vadd.f32 %v4174_v63, %v4158_v53  ;;  %v4147_v15 = vmul.f32 %v8897_v34, %v8500_v7  ;;  %v4103_v41 = vmul.f32 %v8941_v37, %v8486_v46  ;;  %v4036_v55 = vmul.f32 %v8878_v23, %v10034_v49 }
0x26ff   :  { %4291 = vperm.xlu0 %7482, %v4202_v22   ;;  %v4205_v40 = vadd.f32 %v4197_v43, %v4181_v60  ;;  %v4131_v22 = vadd.f32 %v4123_v56, %v4107_v48  ;;  %v4087_v17 = vadd.f32 %v4079_v19, %v4063_v13  ;;  %v4052_v54 = vmul.f32 %v8881_v16, %v10035_v57 }
0x2700   :  { %v4198_v29 = vmul.f32 %v8977_v1, %v10036_v20  ;;  %v4171_v53 = vmul.f32 %v8900_v47, %v9954_v26  ;;  %v4127_v63 = vmul.f32 %v8944_v52, %v9957_v58  ;;  %v4076_v43 = vmul.f32 %v8884_v3, %v9955_v6 }
0x2701   :  { %v4155_v46 = vadd.f32 %v4147_v15, %v4131_v22  ;;  %v4111_v7 = vadd.f32 %v4103_v41, %v4087_v17  ;;  %v4060_v4 = vadd.f32 %v4052_v54, %v4036_v55  ;;  %v4151_v16 = vmul.f32 %v8947_v50, %v9961_v31  ;;  %v10038_v55 = vld [vmem:[#allocation75_spill] sm:$0xff] }
0x2702   :  { %v4206_v23 = vadd.f32 %v4198_v29, %v4182_v10  ;;  %v4040_v60 = vmul.f32 %v8918_v21, %v9959_v30  ;;  %v4056_v48 = vmul.f32 %v8925_v14, %v9960_v42  ;;  %v4195_v54 = vmul.f32 %v8913_v51, %v8705_v0  ;;  %v10037_v10 = vld [vmem:[#allocation49_spill] sm:$0xff]  ;;  %v10039_v14 = vld [vmem:[#allocation54_spill] sm:$0xff] }
0x2703   :  { %4300 = vperm.xlu0 %7482, %v4205_v40   ;;  %v4179_v56 = vadd.f32 %v4171_v53, %v4155_v46  ;;  %v4135_v13 = vadd.f32 %v4127_v63, %v4111_v7  ;;  %v4084_v19 = vadd.f32 %v4076_v43, %v4060_v4  ;;  %v4100_v40 = vmul.f32 %v8887_v25, %v9958_v18  ;;  %v10040_v4 = vld [vmem:[#allocation55_spill] sm:$0xff]  ;;  %v10041_v63 = vld [vmem:[#allocation61_spill] sm:$0xff] }
0x2704   :  { %v4064_v3 = vadd.f32 %v4056_v48, %v4040_v60  ;;  %v4080_v15 = vmul.f32 %v8928_v61, %v10037_v10  ;;  %v4175_v21 = vmul.f32 %v8966_v9, %v10038_v55  ;;  %v4124_v46 = vmul.f32 %v8890_v2, %v10039_v14  ;;  %v10043_v60 = vld [vmem:[#allocation67_spill] sm:$0xff]  ;;  %v10044_v2 = vld [vmem:[#allocation69_spill] sm:$0xff] }
0x2705   :  { %v4159_v41 = vadd.f32 %v4151_v16, %v4135_v13  ;;  %v4108_v22 = vadd.f32 %v4100_v40, %v4084_v19  ;;  %v4104_v25 = vmul.f32 %v8941_v37, %v10040_v4  ;;  %v4203_v17 = vadd.f32 %v4195_v54, %v4179_v56  ;;  %v10045_v37 = vld [vmem:[#allocation70_spill] sm:$0xff]  ;;  %v10099_v14 = vld [vmem:[#allocation57_spill] sm:$0xff]  ;;  %v10102_v10 = vld [vmem:[#allocation27_spill] sm:$0xff] }
0x2706   :  { %v4088_v7 = vadd.f32 %v4080_v15, %v4064_v3  ;;  %v4148_v43 = vmul.f32 %v8897_v34, %v10041_v63  ;;  %v4199_v48 = vmul.f32 %v8977_v1, %v10043_v60  ;;  %v4172_v19 = vmul.f32 %v8900_v47, %v10044_v2  ;;  %v10046_v34 = vld [vmem:[#allocation37_spill] sm:$0xff]  ;;  %v10095_v63 = vld [vmem:[#allocation63_spill] sm:$0xff] }
0x2707   :  { %4303 = vperm.xlu0 %7482, %v4206_v23   ;;  %v4183_v29 = vadd.f32 %v4175_v21, %v4159_v41  ;;  %v4132_v53 = vadd.f32 %v4124_v46, %v4108_v22  ;;  %v10042_v23 = vld [vmem:[#allocation62_spill] sm:$0xff]  ;;  %v4152_v56 = vmul.f32 %v8947_v50, %v10045_v37  ;;  %v4196_v41 = vmul.f32 %v8913_v51, %v10046_v34  ;;  %v10100_v55 = vld [vmem:[#allocation41_spill] sm:$0xff] }
0x2708   :  { %v4112_v61 = vadd.f32 %v4104_v25, %v4088_v7  ;;  %v4128_v16 = vmul.f32 %v8944_v52, %v10042_v23  ;;  %v10047_v52 = vld [vmem:[#allocation80_spill] sm:$0xff] }
0x2709   :  { %v4156_v13 = vadd.f32 %v4148_v43, %v4132_v53  ;;  %v4207_v54 = vadd.f32 %v4199_v48, %v4183_v29  ;;  %v4176_v21 = vmul.f32 %v8966_v9, %v10047_v52  ;;  %v10048_v7 = vld [vmem:[#allocation60_spill] sm:$0xff]  ;;  %v10049_v48 = vld [vmem:[#allocation45_spill] sm:$0xff] }
0x270a   :  { %v4136_v40 = vadd.f32 %v4128_v16, %v4112_v61  ;;  %v4200_v47 = vmul.f32 %v8977_v1, %v10048_v7  ;;  %v10050_v9 = vld [vmem:[#allocation68_spill] sm:$0xff]  ;;  %v10089_v7 = vld [vmem:[#allocation34_spill] sm:$0xff] }
0x270b   :  { %4294 = vperm.xlu0 %7482, %v4203_v17   ;;  %v4180_v3 = vadd.f32 %v4172_v19, %v4156_v13 }
0x270c   :  { %v4160_v15 = vadd.f32 %v4152_v56, %v4136_v40  ;;  %v10051_v56 = vld [vmem:[#allocation26_spill] sm:$0xff] }
0x270d   :  { %v4204_v22 = vadd.f32 %v4196_v41, %v4180_v3  ;;  %v10052_v3 = vld [vmem:[#allocation25_spill] sm:$0xff] }
0x270e   :  { %v4184_v46 = vadd.f32 %v4176_v21, %v4160_v15 }
0x270f   :  { %4306 = vperm.xlu0 %7482, %v4207_v54  }
0x2710   :  { %v4208_v25 = vadd.f32 %v4200_v47, %v4184_v46 }
0x2713   :  { %4297 = vperm.xlu0 %7482, %v4204_v22  }
0x2717   :  { %4309 = vperm.xlu0 %7482, %v4208_v25  }
0x277a   :  { %v4289_v17 = vpop.permute.xlu0 %4288 }
0x277b   :  { %v4314_v54 = vrot.slane %v4289_v17, %v10051_v56 }
0x277e   :  { %v4292_v50 = vpop.permute.xlu0 %4291 }
0x277f   :  { %v4318_v51 = vrot.slane %v4292_v50, %v10049_v48 }
0x2781   :  { %v4319_v21 = vsel %vm3526_vm15, %v4318_v51, %v4314_v54  ;;  %v10058_v54 = vld [vmem:[#allocation16_spill] sm:$0xff] }
0x2782   :  { %v4301_v29 = vpop.permute.xlu0 %4300 }
0x2783   :  { %v4333_v1 = vrot.slane %v4301_v29, %v10051_v56  ;;  %v10053_v29 = vld [vmem:[#allocation8_spill] sm:$0xff] }
0x2786   :  { %v4304_v53 = vpop.permute.xlu0 %4303 }
0x2787   :  { %v4337_v13 = vrot.slane %v4304_v53, %v10049_v48 }
0x2789   :  { %v4338_v22 = vsel %vm3526_vm15, %v4337_v13, %v4333_v1  ;;  %v10057_v13 = vld [vmem:[#allocation23_spill] sm:$0xff] }
0x278a   :  { %v4295_v43 = vpop.permute.xlu0 %4294 }
0x278b   :  { %v4323_v19 = vrot.slane %v4295_v43, %v10050_v9  ;;  %v10054_v43 = vmov 0.0  }
0x278d   :  { %v4324_v47 = vsel %vm3533_vm0, %v4323_v19, %v4319_v21 }
0x278e   :  { %v4307_v61 = vpop.permute.xlu0 %4306 }
0x278f   :  { %v4342_v40 = vrot.slane %v4307_v61, %v10050_v9  ;;  %v10055_v61 = vmov 0.0|0.0   ;;  %v10088_v9 = vld [vmem:[#allocation31_spill] sm:$0xff] }
0x2791   :  { %v4343_v25 = vsel %vm3533_vm0, %v4342_v40, %v4338_v22 }
0x2792   :  { %v4298_v16 = vpop.permute.xlu0 %4297 }
0x2793   :  { %v4328_v15 = vrot.slane %v4298_v16, %v10052_v3  ;;  %v10056_v16 = vld [vmem:[#allocation85_spill] sm:$0xff] }
0x2795   :  { %v4329_v50 = vsel %vm3540_vm1, %v4328_v15, %v4324_v47 }
0x2796   :  { %v4310_v41 = vpop.permute.xlu0 %4309 }
0x2797   :  { %v4347_v46 = vrot.slane %v4310_v41, %v10052_v3 }
0x2799   :  { %v4348_v53 = vsel %vm3540_vm1, %v4347_v46, %v4343_v25 }
0x279a   :  { %v4349_v17 = vsel %vm2787_vm13, %v4348_v53, %v4329_v50  ;;  %v10059_v50 = vld [vmem:[#allocation21_spill] sm:$0xff] }
0x279b   :  { %7013 = vmatmul.mubr.msk.f32.vlgmr.msra.gmra.mrb[34].mxu0 %vm209_vm5, %v4349_v17 }
0x279c   :  { %7378 = vmatpush3.bf16.msra.mxu0 %v10053_v29  ;;  %7034 = vmatprep.mubr.msk.f32.mxu0 %vm7799_vm4, %v10054_v43 }
0x279d   :  { %7379 = vmatprep.subr.bf16.mxu0 %v10055_v61 }
0x27a0   :  { %7381 = vmatpush3.bf16.msra.mxu0 %v10056_v16  ;;  %v9137_v16 = vld [vmem:[#allocation2 + $0x128] ss:$0 sm:$0xff] }
0x27a1   :  { %7388 = vmatprep.subr.bf16.mxu0 %v10055_v61  ;;  %10080 = vst [vmem:[#allocation30_spill] sm:$0xff] %v9137_v16 }
0x286e   :  { %v4418_v51 = vpop.f32.mrb[34].mxu0 }
0x286f   :  { %v4419_v19 = vadd.f32 %v4418_v51, %v10057_v13  ;;  %v7014_v40 = vpop.f32.mrb[35].mxu0 }
0x2871   :  { %v4422_v1 = vadd.f32 %v10058_v54, %v4419_v19 }
0x2873   :  { %7662 = vtanh.f32 %v4422_v1  ;;  %v6374_v41 = vmul.f32 -1.442695, %v4422_v1  ;;  %v10061_v1 = vld [vmem:[#allocation12_spill] sm:$0xff] }
0x2875   :  { %7664 = vpow2.f32 %v6374_v41  ;;  %v10063_v41 = vld [vmem:[#allocation14_spill] sm:$0xff] }
0x287d   :  { %v7663_v15 = vpop.eup %7662 }
0x287e   :  { %4432 = vrot.lane.b32.xlu1 %v7663_v15, %s7801_s1  ;;  %v10062_v15 = vld [vmem:[#allocation13_spill] sm:$0xff] }
0x287f   :  { %v7665_v21 = vpop.eup %7664 }
0x2880   :  { %v4426_v22 = vadd.f32 1.0, %v7665_v21  ;;  %v10064_v21 = vld [vmem:[#allocation15_spill] sm:$0xff] }
0x2882   :  { %7666 = vrcp.f32 %v4426_v22 }
0x288c   :  { %v7667_v46 = vpop.eup %7666 }
0x288d   :  { %v4430_v53 = vmul.f32 %v7667_v46, %v10059_v50  ;;  %v10066_v50 = vld [vmem:[#allocation86_spill] sm:$0xff] }
0x28f0   :  { %v4433_v47 = vpop.permute.xlu1 %4432 }
0x28f1   :  { %v4435_v25 = vmul.f32 %v7667_v46, %v4433_v47 }
0x28f3   :  { %4437 = vrot.lane.b32.xlu0 %v4435_v25, %s7802_s7 }
0x2965   :  { %v4438_v17 = vpop.permute.xlu0 %4437 }
0x2966   :  { %v9080_v51 = vadd.f32 %v4438_v17, %v4430_v53 }
0x2968   :  { %10060 = vst [vmem:[#allocation22_spill] sm:$0xff] %v9080_v51  ;;  %7668 = vtanh.f32 %v9080_v51  ;;  %v10079_v51 = vld [vmem:[#allocation19_spill] sm:$0xff] }
0x2972   :  { %v7669_v13 = vpop.eup %7668 }
0x2973   :  { %4443 = vrot.lane.b32.xlu0 %v7669_v13, %s7801_s1 }
0x29e5   :  { %v4444_v19 = vpop.permute.xlu0 %4443 }
0x29e6   :  { %v4446_v40 = vmul.f32 %v7667_v46, %v4444_v19  ;;  %v10065_v46 = vld [vmem:[#allocation88_spill] sm:$0xff] }
0x29e8   :  { %4518 = vrot.lane.b32.xlu0 %v4446_v40, %s7802_s7 }
0x2a5a   :  { %v4519_v54 = vpop.permute.xlu0 %4518 }
0x2a5b   :  { %7035 = vmatmul.mubr.msk.f32.vlgmr.msra.gmra.mrb[36].mxu0 %vm209_vm5, %v4519_v54 }
0x2a5c   :  { %7390 = vmatpush3.bf16.msra.mxu0 %v10061_v1  ;;  %7056 = vmatprep.mubr.msk.f32.mxu0 %vm7799_vm4, %v10054_v43 }
0x2a5d   :  { %7391 = vmatprep.subr.bf16.mxu0 %v10055_v61 }
0x2a60   :  { %7393 = vmatpush3.bf16.msra.mxu0 %v10062_v15 }
0x2a61   :  { %7400 = vmatprep.subr.bf16.mxu0 %v10055_v61 }
0x2a63   :  { %7057 = vmatmul.mubr.msk.f32.vlgmr.msra.gmra.mrb[38].mxu0 %vm209_vm5, %v4519_v54 }
0x2a64   :  { %7402 = vmatpush3.bf16.msra.mxu0 %v10063_v41  ;;  %7078 = vmatprep.mubr.msk.f32.mxu0 %vm7799_vm4, %v10054_v43 }
0x2a65   :  { %7403 = vmatprep.subr.bf16.mxu0 %v10055_v61 }
0x2a68   :  { %7405 = vmatpush3.bf16.msra.mxu0 %v10064_v21 }
0x2a69   :  { %7412 = vmatprep.subr.bf16.mxu0 %v10055_v61 }
0x2b2e   :  { %v4588_v22 = vpop.f32.mrb[36].mxu0 }
0x2b2f   :  { %v4589_v47 = vadd.f32 %v4588_v22, %v10065_v46  ;;  %v7036_v25 = vpop.f32.mrb[37].mxu0  ;;  %v10068_v22 = vld [vmem:[#allocation9_spill] sm:$0xff] }
0x2b31   :  { %v4592_v53 = vadd.f32 %v10066_v50, %v4589_v47 }
0x2b33   :  { %7670 = vtanh.f32 %v4592_v53  ;;  %v6377_v40 = vmul.f32 -1.442695, %v4592_v53 }
0x2b35   :  { %7672 = vpow2.f32 %v6377_v40 }
0x2b36   :  { %v9101_v17 = vpop.f32.mrb[38].mxu0 }
0x2b37   :  { %10067 = vst [vmem:[#allocation73_spill] sm:$0xff] %v9101_v17  ;;  %v7058_v13 = vpop.f32.mrb[39].mxu0 }
0x2b3d   :  { %v7671_v19 = vpop.eup %7670 }
0x2b3e   :  { %4602 = vrot.lane.b32.xlu0 %v7671_v19, %s7801_s1  ;;  %v10074_v19 = vld [vmem:[#allocation44_spill] sm:$0xff] }
0x2b3f   :  { %v7673_v54 = vpop.eup %7672 }
0x2b40   :  { %v4596_v41 = vadd.f32 1.0, %v7673_v54 }
0x2b42   :  { %7674 = vrcp.f32 %v4596_v41 }
0x2b4c   :  { %v7675_v21 = vpop.eup %7674 }
0x2b4d   :  { %v4600_v46 = vmul.f32 %v7675_v21, %v10068_v22  ;;  %v10076_v22 = vld [vmem:[#allocation17_spill] sm:$0xff] }
0x2bb0   :  { %v4603_v15 = vpop.permute.xlu0 %4602 }
0x2bb1   :  { %v4605_v1 = vmul.f32 %v7675_v21, %v4603_v15  ;;  %v10072_v15 = vld [vmem:[#allocation48_spill] sm:$0xff] }
0x2bb3   :  { %4607 = vrot.lane.b32.xlu0 %v4605_v1, %s7802_s7  ;;  %v10071_v1 = vld [vmem:[#allocation10_spill] sm:$0xff] }
0x2c25   :  { %v4608_v47 = vpop.permute.xlu0 %4607 }
0x2c26   :  { %v9106_v25 = vadd.f32 %v4608_v47, %v4600_v46 }
0x2c28   :  { %10069 = vst [vmem:[#allocation64_spill] sm:$0xff] %v9106_v25  ;;  %7676 = vtanh.f32 %v9106_v25 }
0x2c32   :  { %v7677_v50 = vpop.eup %7676 }
0x2c33   :  { %4613 = vrot.lane.b32.xlu1 %v7677_v50, %s7801_s1 }
0x2ca5   :  { %v4614_v53 = vpop.permute.xlu1 %4613 }
0x2ca6   :  { %v9110_v13 = vmul.f32 %v7675_v21, %v4614_v53  ;;  %v10073_v21 = vld [vmem:[#allocation11_spill] sm:$0xff] }
0x2ca8   :  { %10070 = vst [vmem:[#allocation71_spill] sm:$0xff] %v9110_v13  ;;  %4618 = vrot.lane.b32.xlu0 %v9110_v13, %s7802_s7  ;;  %v10078_v13 = vld [vmem:[#allocation20_spill] sm:$0xff] }
0x2d1a   :  { %v4619_v41 = vpop.permute.xlu0 %4618 }
0x2d1b   :  { %7046 = vmatmul.mubr.msk.f32.vlgmr.msra.gmra.mrb[36].mxu1 %vm209_vm5, %v4619_v41  ;;  %7079 = vmatmul.mubr.msk.f32.vlgmr.msra.gmra.mrb[40].mxu0 %vm209_vm5, %v4619_v41 }
0x2d1c   :  { %7414 = vmatpush3.bf16.msra.mxu0 %v10071_v1  ;;  %7396 = vmatpush3.bf16.msra.mxu1 %v10072_v15  ;;  %v10077_v15 = vld [vmem:[#allocation18_spill] sm:$0xff] }
0x2d1d   :  { %7415 = vmatprep.subr.bf16.mxu0 %v10055_v61  ;;  %7397 = vmatprep.subr.bf16.mxu1 %v10055_v61 }
0x2d1e   :  { %7067 = vmatprep.mubr.msk.f32.mxu1 %vm7799_vm4, %v10054_v43  ;;  %7100 = vmatprep.mubr.msk.f32.mxu0 %vm7799_vm4, %v10054_v43  ;;  %v10087_v43 = vld [vmem:[#allocation79_spill] sm:$0xff] }
0x2d20   :  { %7417 = vmatpush3.bf16.msra.mxu0 %v10073_v21  ;;  %7399 = vmatpush3.bf16.msra.mxu1 %v10074_v19 }
0x2d21   :  { %7406 = vmatprep.subr.bf16.mxu1 %v10055_v61  ;;  %7424 = vmatprep.subr.bf16.mxu0 %v10055_v61 }
0x2dee   :  { %v4688_v40 = vpop.f32.mrb[36].mxu1  ;;  %v9128_v54 = vpop.f32.mrb[40].mxu0 }
0x2def   :  { %10075 = vst [vmem:[#allocation29_spill] sm:$0xff] %v9128_v54  ;;  %v4699_v46 = vrot.slane %v4688_v40, %v10076_v22  ;;  %v7047_v47 = vpop.f32.mrb[37].mxu1  ;;  %v7080_v50 = vpop.f32.mrb[41].mxu0 }
0x2df1   :  { %v4700_v53 = vcombine.high %v4699_v46, %v4699_v46  ;;  %v4707_v41 = vrot.slane %v4699_v46, %v10076_v22 }
0x2df3   :  { %v4714_v1 = vrot.slane %v4700_v53, %v10076_v22  ;;  %v4718_v21 = vrot.slane %v4707_v41, %v10077_v15 }
0x2df5   :  { %v4722_v19 = vrot.slane %v4714_v1, %v10077_v15  ;;  %v4725_v25 = vadd.f32 %v4718_v21, %v10078_v13 }
0x2df7   :  { %v4726_v17 = vadd.f32 %v10079_v51, %v4722_v19  ;;  %7678 = vtanh.f32 %v4725_v25  ;;  %v10081_v51 = vld [vmem:[#allocation24_spill] sm:$0xff] }
0x2df9   :  { %7680 = vtanh.f32 %v4726_v17 }
0x2e01   :  { %v7679_v54 = vpop.eup %7678 }
0x2e02   :  { %v4729_v40 = vmul.f32 %v9137_v16, %v7679_v54 }
0x2e03   :  { %v7681_v47 = vpop.eup %7680 }
0x2e04   :  { %v4731_v46 = vsel %vm209_vm5, %v4729_v40, 0.0  ;;  %v4730_v50 = vmul.f32 %v9137_v16, %v7681_v47 }
0x2e05   :  { %4732 = vadd.xlane.f32.xlu1 %v4731_v46 }
0x2e06   :  { %v4734_v53 = vsel %vm209_vm5, %v4730_v50, 0.0 }
0x2e07   :  { %4735 = vadd.xlane.f32.xlu0 %v4734_v53 }
0x2e92   :  { %v4733_v41 = vpop.xlane.xlu1 %4732 }
0x2e93   :  { %v4742_v19 = vrot.slane %v4733_v41, %v10051_v56 }
0x2e94   :  { %v4736_v1 = vpop.xlane.xlu0 %4735 }
0x2e95   :  { %v4746_v17 = vrot.slane %v4736_v1, %v10051_v56 }
0x2e97   :  { %v4747_v25 = vsel %vm2787_vm13, %v4746_v17, %v4742_v19 }
0x2e98   :  { %v4749_v21 = vsel %vm2790_vm14, %v4747_v25, -inf }
0x2e99   :  { %4750 = vmax.xlane.f32.xlu0 %v4749_v21 }
0x2f26   :  { %v4751_v54 = vpop.xlane.xlu0 %4750 }
0x2f27   :  { %v4756_v40 = vrot.slane %v4751_v54, %v10077_v15  ;;  %v4760_v47 = vrot.slane %v4751_v54, %v10081_v51 }
0x2f29   :  { %v4763_v46 = vsub.f32 %v4733_v41, %v4756_v40  ;;  %v4764_v16 = vsub.f32 %v4736_v1, %v4760_v47 }
0x2f2b   :  { %v4765_v50 = vmul.f32 1.442695, %v4763_v46  ;;  %v4767_v53 = vmul.f32 1.442695, %v4764_v16 }
0x2f2d   :  { %7682 = vpow2.f32 %v4765_v50 }
0x2f2e   :  { %7684 = vpow2.f32 %v4767_v53  ;;  %v10082_v53 = vld [vmem:[#allocation74_spill] sm:$0xff] }
0x2f37   :  { %v7683_v13 = vpop.eup %7682 }
0x2f38   :  { %v7685_v22 = vpop.eup %7684  ;;  %4772 = vperm.xlu1 %7483, %v7683_v13  }
0x2f39   :  { %4775 = vperm.xlu0 %7482, %v7685_v22  }
0x2fb7   :  { %v4773_v61 = vpop.permute.xlu1 %4772 }
0x2fb8   :  { %v4776_v19 = vpop.permute.xlu0 %4775  ;;  %v4780_v17 = vrot.slane %v4773_v61, %v10051_v56 }
0x2fb9   :  { %v4784_v25 = vrot.slane %v4776_v19, %v10051_v56 }
0x2fbb   :  { %v4785_v21 = vsel %vm2787_vm13, %v4784_v25, %v4780_v17  ;;  %v10083_v17 = vld [vmem:[#allocation77_spill] sm:$0xff] }
0x2fbc   :  { %v4787_v54 = vsel %vm2790_vm14, %v4785_v21, 0.0  ;;  %v10084_v21 = vld [vmem:[#allocation78_spill] sm:$0xff] }
0x2fbd   :  { %4788 = vadd.xlane.f32.xlu1 %v4787_v54 }
0x304a   :  { %v4789_v41 = vpop.xlane.xlu1 %4788 }
0x304b   :  { %v4794_v16 = vrot.slane %v4789_v41, %v10077_v15  ;;  %v4798_v1 = vrot.slane %v4789_v41, %v10081_v51 }
0x304d   :  { %7686 = vrcp.f32 %v4794_v16  ;;  %v10085_v16 = vld [vmem:[#allocation32_spill] sm:$0xff] }
0x304e   :  { %7688 = vrcp.f32 %v4798_v1  ;;  %v10086_v1 = vld [vmem:[#allocation38_spill] sm:$0xff] }
0x3057   :  { %v7687_v40 = vpop.eup %7686 }
0x3058   :  { %v4802_v47 = vmul.f32 %v7687_v40, %v7683_v13  ;;  %v7689_v46 = vpop.eup %7688 }
0x3059   :  { %v4804_v41 = vmul.f32 %v7689_v46, %v7685_v22  ;;  %v10090_v22 = vld [vmem:[#allocation40_spill] sm:$0xff] }
0x305a   :  { %v9156_v50 = vrot.slane %v4802_v47, %v10077_v15  ;;  %v9159_v61 = vrot.slane %v4802_v47, %v10081_v51  ;;  %v9162_v19 = vrot.slane %v4802_v47, %v10082_v53  ;;  %v9165_v25 = vrot.slane %v4802_v47, %v10083_v17 }
0x305b   :  { %v9168_v54 = vrot.slane %v4802_v47, %v10084_v21  ;;  %v9175_v29 = vrot.slane %v4802_v47, %v10087_v43  ;;  %v9178_v3 = vrot.slane %v4802_v47, %v8561_v32  ;;  %v9191_v2 = vrot.slane %v4802_v47, %v10017_v35 }
0x305c   :  { %v4813_v13 = vmul.f32 %v9156_v50, %v10085_v16  ;;  %v4829_v40 = vmul.f32 %v9159_v61, %v10086_v1  ;;  %v4853_v48 = vmul.f32 %v9162_v19, %v10088_v9  ;;  %v4814_v52 = vmul.f32 %v9156_v50, %v10089_v7  ;;  %v10091_v16 = vld [vmem:[#allocation39_spill] sm:$0xff]  ;;  %v10092_v1 = vld [vmem:[#allocation50_spill] sm:$0xff]  ;;  %v10094_v7 = vld [vmem:[#allocation56_spill] sm:$0xff] }
0x305d   :  { %v4830_v46 = vmul.f32 %v9159_v61, %v10090_v22  ;;  %v4877_v34 = vmul.f32 %v9165_v25, %v10091_v16  ;;  %v4901_v37 = vmul.f32 %v9168_v54, %v10092_v1  ;;  %v9196_v23 = vrot.slane %v4804_v41, %v10077_v15  ;;  %v10098_v15 = vld [vmem:[#allocation76_spill] sm:$0xff] }
0x305e   :  { %v4837_v56 = vadd.f32 %v4829_v40, %v4813_v13  ;;  %v10093_v40 = vld [vmem:[#allocation46_spill] sm:$0xff]  ;;  %v4925_v22 = vmul.f32 %v9175_v29, %v10094_v7  ;;  %v4949_v16 = vmul.f32 %v9178_v3, %v10095_v63  ;;  %v9203_v4 = vrot.slane %v4804_v41, %v10081_v51 }
0x305f   :  { %v4838_v13 = vadd.f32 %v4830_v46, %v4814_v52  ;;  %v4854_v9 = vmul.f32 %v9162_v19, %v10093_v40  ;;  %v9206_v47 = vrot.slane %v4804_v41, %v10082_v53  ;;  %v10097_v40 = vld [vmem:[#allocation36_spill] sm:$0xff]  ;;  %v4973_v7 = vmul.f32 %v9191_v2, %v10098_v15 }
0x3060   :  { %v4861_v60 = vadd.f32 %v4853_v48, %v4837_v56  ;;  %v10096_v56 = vld [vmem:[#allocation51_spill] sm:$0xff]  ;;  %v4817_v1 = vmul.f32 %v9196_v23, %v10097_v40  ;;  %v4902_v63 = vmul.f32 %v9168_v54, %v10099_v14  ;;  %v4833_v51 = vmul.f32 %v9203_v4, %v10100_v55 }
0x3061   :  { %v4862_v52 = vadd.f32 %v4854_v9, %v4838_v13  ;;  %v4878_v46 = vmul.f32 %v9165_v25, %v10096_v56  ;;  %v9219_v53 = vrot.slane %v4804_v41, %v10083_v17  ;;  %v9222_v9 = vrot.slane %v4804_v41, %v10084_v21  ;;  %v10101_v56 = vld [vmem:[#allocation33_spill] sm:$0xff] }
0x3062   :  { %v4885_v48 = vadd.f32 %v4877_v34, %v4861_v60  ;;  %v9225_v13 = vrot.slane %v4804_v41, %v10087_v43  ;;  %v4841_v40 = vadd.f32 %v4833_v51, %v4817_v1  ;;  %v4857_v15 = vmul.f32 %v9206_v47, %v10101_v56 }
0x3063   :  { %v4886_v34 = vadd.f32 %v4878_v46, %v4862_v52  ;;  %v4818_v14 = vmul.f32 %v9196_v23, %v10102_v10  ;;  %v4834_v55 = vmul.f32 %v9203_v4, %v8456_v8  ;;  %v4881_v51 = vmul.f32 %v9219_v53, %v8446_v12 }
0x3064   :  { %v4909_v60 = vadd.f32 %v4901_v37, %v4885_v48  ;;  %v4926_v37 = vmul.f32 %v9175_v29, %v10027_v5  ;;  %v4950_v48 = vmul.f32 %v9178_v3, %v10028_v36  ;;  %v4865_v52 = vadd.f32 %v4857_v15, %v4841_v40 }
0x3065   :  { %v4910_v0 = vadd.f32 %v4902_v63, %v4886_v34  ;;  %v4842_v1 = vadd.f32 %v4834_v55, %v4818_v14  ;;  %v4858_v46 = vmul.f32 %v9206_v47, %v8468_v62  ;;  %v9244_v63 = vrot.slane %v4804_v41, %v8561_v32 }
0x3066   :  { %v4933_v17 = vadd.f32 %v4925_v22, %v4909_v60  ;;  %v4905_v22 = vmul.f32 %v9222_v9, %v8480_v28  ;;  %v4889_v60 = vadd.f32 %v4881_v51, %v4865_v52  ;;  %v4929_v34 = vmul.f32 %v9225_v13, %v8496_v45 }
0x3067   :  { %v4934_v56 = vadd.f32 %v4926_v37, %v4910_v0  ;;  %v4866_v15 = vadd.f32 %v4858_v46, %v4842_v1  ;;  %v4882_v40 = vmul.f32 %v9219_v53, %v8482_v24  ;;  %v4831_v0 = vmul.f32 %v9159_v61, %v8416_v27 }
0x3068   :  { %v4957_v10 = vadd.f32 %v4949_v16, %v4933_v17  ;;  %v4815_v17 = vmul.f32 %v9156_v50, %v8414_v33  ;;  %v4913_v16 = vadd.f32 %v4905_v22, %v4889_v60  ;;  %v9255_v37 = vrot.slane %v4804_v41, %v10017_v35  ;;  %v10105_v60 = vld [vmem:[#allocation66_spill] sm:$0xff] }
0x3069   :  { %v4958_v14 = vadd.f32 %v4950_v48, %v4934_v56  ;;  %v4890_v52 = vadd.f32 %v4882_v40, %v4866_v15  ;;  %v4906_v51 = vmul.f32 %v9222_v9, %v8498_v38  ;;  %v4974_v1 = vmul.f32 %v9191_v2, %v10029_v39  ;;  %v10104_v48 = vld [vmem:[#allocation35_spill] sm:$0xff] }
0x306a   :  { %v4981_v55 = vadd.f32 %v4973_v7, %v4957_v10  ;;  %v10103_v10 = vld [vmem:[#allocation65_spill] sm:$0xff]  ;;  %v4839_v56 = vadd.f32 %v4831_v0, %v4815_v17  ;;  %v4855_v46 = vmul.f32 %v9162_v19, %v10104_v48  ;;  %v4937_v27 = vadd.f32 %v4929_v34, %v4913_v16  ;;  %v10106_v38 = vld [vmem:[#allocation43_spill] sm:$0xff]  ;;  %v10107_v16 = vld [vmem:[#allocation72_spill] sm:$0xff] }
0x306b   :  { %v4953_v7 = vmul.f32 %v9244_v63, %v10103_v10  ;;  %v4914_v22 = vadd.f32 %v4906_v51, %v4890_v52  ;;  %v4930_v41 = vmul.f32 %v9225_v13, %v10105_v60  ;;  %v4879_v15 = vmul.f32 %v9165_v25, %v8450_v44  ;;  %v10108_v60 = vld [vmem:[#allocation52_spill] sm:$0xff]  ;;  %v10110_v44 = vld [vmem:[#allocation59_spill] sm:$0xff] }
0x306c   :  { %5068 = vperm.xlu0 %7482, %v4981_v55   ;;  %v4982_v40 = vadd.f32 %v4974_v1, %v4958_v14  ;;  %v4863_v55 = vadd.f32 %v4855_v46, %v4839_v56  ;;  %v4819_v39 = vmul.f32 %v9196_v23, %v10106_v38  ;;  %v4835_v10 = vmul.f32 %v9203_v4, %v8460_v11  ;;  %v10109_v56 = vld [vmem:[#allocation47_spill] sm:$0xff] }
0x306d   :  { %v4961_v17 = vadd.f32 %v4953_v7, %v4937_v27  ;;  %v4977_v0 = vmul.f32 %v9255_v37, %v10030_v59  ;;  %v4938_v34 = vadd.f32 %v4930_v41, %v4914_v22  ;;  %v4954_v52 = vmul.f32 %v9244_v63, %v10107_v16  ;;  %v10111_v7 = vld [vmem:[#allocation53_spill] sm:$0xff] }
0x306e   :  { %v4887_v51 = vadd.f32 %v4879_v15, %v4863_v55  ;;  %v4903_v14 = vmul.f32 %v9168_v54, %v10108_v60  ;;  %v4843_v1 = vadd.f32 %v4835_v10, %v4819_v39  ;;  %v4859_v46 = vmul.f32 %v9206_v47, %v10109_v56 }
0x306f   :  { %v4962_v38 = vadd.f32 %v4954_v52, %v4938_v34  ;;  %v4927_v27 = vmul.f32 %v9175_v29, %v10110_v44  ;;  %v4883_v59 = vmul.f32 %v9219_v53, %v10111_v7  ;;  %v4816_v22 = vmul.f32 %v9156_v50, %v10034_v49 }
0x3070   :  { %5071 = vperm.xlu0 %7482, %v4982_v40   ;;  %v4985_v41 = vadd.f32 %v4977_v0, %v4961_v17  ;;  %v4911_v40 = vadd.f32 %v4903_v14, %v4887_v51  ;;  %v4867_v15 = vadd.f32 %v4859_v46, %v4843_v1  ;;  %v4832_v55 = vmul.f32 %v9159_v61, %v10035_v57 }
0x3071   :  { %v4978_v39 = vmul.f32 %v9255_v37, %v10036_v20  ;;  %v4951_v10 = vmul.f32 %v9178_v3, %v9954_v26  ;;  %v4907_v34 = vmul.f32 %v9222_v9, %v9957_v58  ;;  %v4856_v50 = vmul.f32 %v9162_v19, %v9955_v6 }
0x3072   :  { %v4935_v52 = vadd.f32 %v4927_v27, %v4911_v40  ;;  %v4891_v7 = vadd.f32 %v4883_v59, %v4867_v15  ;;  %v4840_v44 = vadd.f32 %v4832_v55, %v4816_v22  ;;  %v4931_v61 = vmul.f32 %v9225_v13, %v9961_v31  ;;  %v10112_v27 = vld [vmem:[#allocation82_spill] sm:$0xff]  ;;  %v10114_v15 = vld [vmem:[#allocation75_spill] sm:$0xff] }
0x3073   :  { %v4986_v17 = vadd.f32 %v4978_v39, %v4962_v38  ;;  %v4820_v0 = vmul.f32 %v9196_v23, %v9959_v30  ;;  %v4836_v51 = vmul.f32 %v9203_v4, %v9960_v42  ;;  %v4880_v59 = vmul.f32 %v9165_v25, %v9958_v18  ;;  %v10113_v38 = vld [vmem:[#allocation49_spill] sm:$0xff]  ;;  %v10115_v4 = vld [vmem:[#allocation54_spill] sm:$0xff]  ;;  %v10116_v39 = vld [vmem:[#allocation55_spill] sm:$0xff] }
0x3074   :  { %5080 = vperm.xlu0 %7482, %v4985_v41   ;;  %v4959_v14 = vadd.f32 %v4951_v10, %v4935_v52  ;;  %v4915_v1 = vadd.f32 %v4907_v34, %v4891_v7  ;;  %v4864_v46 = vadd.f32 %v4856_v50, %v4840_v44  ;;  %v4975_v22 = vmul.f32 %v9191_v2, %v10112_v27  ;;  %v10117_v50 = vld [vmem:[#allocation61_spill] sm:$0xff] }
0x3075   :  { %v4844_v19 = vadd.f32 %v4836_v51, %v4820_v0  ;;  %v4860_v41 = vmul.f32 %v9206_v47, %v10113_v38  ;;  %v4955_v23 = vmul.f32 %v9244_v63, %v10114_v15  ;;  %v4904_v7 = vmul.f32 %v9168_v54, %v10115_v4  ;;  %v10119_v51 = vld [vmem:[#allocation67_spill] sm:$0xff]  ;;  %v10120_v54 = vld [vmem:[#allocation69_spill] sm:$0xff] }
0x3076   :  { %v4939_v40 = vadd.f32 %v4931_v61, %v4915_v1  ;;  %v4888_v55 = vadd.f32 %v4880_v59, %v4864_v46  ;;  %v4884_v25 = vmul.f32 %v9219_v53, %v10116_v39  ;;  %v4983_v10 = vadd.f32 %v4975_v22, %v4959_v14  ;;  %v10121_v53 = vld [vmem:[#allocation70_spill] sm:$0xff]  ;;  %v10174_v39 = vld [vmem:[#allocation57_spill] sm:$0xff]  ;;  %v10177_v15 = vld [vmem:[#allocation27_spill] sm:$0xff] }
0x3077   :  { %v4868_v44 = vadd.f32 %v4860_v41, %v4844_v19  ;;  %v4928_v0 = vmul.f32 %v9175_v29, %v10117_v50  ;;  %v4979_v1 = vmul.f32 %v9255_v37, %v10119_v51  ;;  %v4952_v59 = vmul.f32 %v9178_v3, %v10120_v54  ;;  %v10122_v29 = vld [vmem:[#allocation37_spill] sm:$0xff] }
0x3078   :  { %5083 = vperm.xlu0 %7482, %v4986_v17   ;;  %v4963_v34 = vadd.f32 %v4955_v23, %v4939_v40  ;;  %v4912_v52 = vadd.f32 %v4904_v7, %v4888_v55  ;;  %v10118_v17 = vld [vmem:[#allocation62_spill] sm:$0xff]  ;;  %v4932_v14 = vmul.f32 %v9225_v13, %v10121_v53  ;;  %v4976_v23 = vmul.f32 %v9191_v2, %v10122_v29  ;;  %v10175_v4 = vld [vmem:[#allocation41_spill] sm:$0xff] }
0x3079   :  { %v4892_v47 = vadd.f32 %v4884_v25, %v4868_v44  ;;  %v4908_v61 = vmul.f32 %v9222_v9, %v10118_v17  ;;  %v10123_v9 = vld [vmem:[#allocation80_spill] sm:$0xff]  ;;  %v10170_v17 = vld [vmem:[#allocation63_spill] sm:$0xff] }
0x307a   :  { %v4936_v46 = vadd.f32 %v4928_v0, %v4912_v52  ;;  %v4987_v22 = vadd.f32 %v4979_v1, %v4963_v34  ;;  %v4956_v55 = vmul.f32 %v9244_v63, %v10123_v9  ;;  %v10124_v25 = vld [vmem:[#allocation60_spill] sm:$0xff] }
0x307b   :  { %v4916_v19 = vadd.f32 %v4908_v61, %v4892_v47  ;;  %v4980_v3 = vmul.f32 %v9255_v37, %v10124_v25  ;;  %v10126_v63 = vld [vmem:[#allocation68_spill] sm:$0xff] }
0x307c   :  { %5074 = vperm.xlu0 %7482, %v4983_v10   ;;  %v4960_v41 = vadd.f32 %v4952_v59, %v4936_v46  ;;  %v10125_v46 = vld [vmem:[#allocation45_spill] sm:$0xff] }
0x307d   :  { %v4940_v40 = vadd.f32 %v4932_v14, %v4916_v19 }
0x307e   :  { %v4984_v7 = vadd.f32 %v4976_v23, %v4960_v41 }
0x307f   :  { %v4964_v44 = vadd.f32 %v4956_v55, %v4940_v40  ;;  %v10128_v40 = vld [vmem:[#allocation25_spill] sm:$0xff] }
0x3080   :  { %5086 = vperm.xlu0 %7482, %v4987_v22   ;;  %v10127_v22 = vld [vmem:[#allocation26_spill] sm:$0xff] }
0x3081   :  { %v4988_v10 = vadd.f32 %v4980_v3, %v4964_v44 }
0x3084   :  { %5077 = vperm.xlu0 %7482, %v4984_v7  }
0x3088   :  { %5089 = vperm.xlu0 %7482, %v4988_v10  }
0x30eb   :  { %v5069_v52 = vpop.permute.xlu0 %5068 }
0x30ec   :  { %v5094_v41 = vrot.slane %v5069_v52, %v10127_v22 }
0x30ef   :  { %v5072_v13 = vpop.permute.xlu0 %5071 }
0x30f0   :  { %v5098_v2 = vrot.slane %v5072_v13, %v10125_v46 }
0x30f2   :  { %v5099_v7 = vsel %vm3526_vm15, %v5098_v2, %v5094_v41  ;;  %v10132_v2 = vld [vmem:[#allocation85_spill] sm:$0xff] }
0x30f3   :  { %v5081_v34 = vpop.permute.xlu0 %5080 }
0x30f4   :  { %v5113_v37 = vrot.slane %v5081_v34, %v10127_v22  ;;  %v10129_v34 = vld [vmem:[#allocation8_spill] sm:$0xff] }
0x30f7   :  { %v5084_v0 = vpop.permute.xlu0 %5083 }
0x30f8   :  { %v5117_v59 = vrot.slane %v5084_v0, %v10125_v46  ;;  %v10164_v46 = vld [vmem:[#allocation34_spill] sm:$0xff] }
0x30fa   :  { %v5118_v44 = vsel %vm3526_vm15, %v5117_v59, %v5113_v37  ;;  %v9354_v37 = vld [vmem:[#allocation2 + $0x102] ss:$0 sm:$0xff] }
0x30fb   :  { %v5075_v47 = vpop.permute.xlu0 %5074  ;;  %10134 = vst [vmem:[#allocation84_spill] sm:$0xff] %v9354_v37 }
0x30fc   :  { %v5103_v19 = vrot.slane %v5075_v47, %v10126_v63 }
0x30fe   :  { %v5104_v10 = vsel %vm3533_vm0, %v5103_v19, %v5099_v7  ;;  %v10133_v19 = vld [vmem:[#allocation73_spill] sm:$0xff] }
0x30ff   :  { %v5087_v61 = vpop.permute.xlu0 %5086 }
0x3100   :  { %v5122_v14 = vrot.slane %v5087_v61, %v10126_v63  ;;  %v10130_v61 = vmov 0.0  }
0x3102   :  { %v5123_v13 = vsel %vm3533_vm0, %v5122_v14, %v5118_v44 }
0x3103   :  { %v5078_v1 = vpop.permute.xlu0 %5077 }
0x3104   :  { %v5108_v23 = vrot.slane %v5078_v1, %v10128_v40  ;;  %v10131_v1 = vmov 0.0|0.0  }
0x3106   :  { %v5109_v0 = vsel %vm3540_vm1, %v5108_v23, %v5104_v10 }
0x3107   :  { %v5090_v55 = vpop.permute.xlu0 %5089 }
0x3108   :  { %v5127_v3 = vrot.slane %v5090_v55, %v10128_v40 }
0x310a   :  { %v5128_v47 = vsel %vm3540_vm1, %v5127_v3, %v5123_v13 }
0x310b   :  { %v5129_v52 = vsel %vm2787_vm13, %v5128_v47, %v5109_v0  ;;  %v10135_v47 = vld [vmem:[#allocation22_spill] sm:$0xff] }
0x310c   :  { %7068 = vmatmul.mubr.msk.f32.vlgmr.msra.gmra.mrb[38].mxu1 %vm209_vm5, %v5129_v52 }
0x310d   :  { %7408 = vmatpush3.bf16.msra.mxu1 %v10129_v34  ;;  %7089 = vmatprep.mubr.msk.f32.mxu1 %vm7799_vm4, %v10130_v61 }
0x310e   :  { %7409 = vmatprep.subr.bf16.mxu1 %v10131_v1 }
0x3111   :  { %7411 = vmatpush3.bf16.msra.mxu1 %v10132_v2 }
0x3112   :  { %7418 = vmatprep.subr.bf16.mxu1 %v10131_v1 }
0x31df   :  { %v5198_v59 = vpop.f32.mrb[38].mxu1 }
0x31e0   :  { %v5199_v14 = vadd.f32 %v5198_v59, %v10133_v19  ;;  %v7069_v41 = vpop.f32.mrb[39].mxu1 }
0x31e2   :  { %v5202_v23 = vadd.f32 %v9354_v37, %v5199_v14 }
0x31e4   :  { %7690 = vtanh.f32 %v5202_v23  ;;  %v6381_v7 = vmul.f32 -1.442695, %v5202_v23 }
0x31e6   :  { %7692 = vpow2.f32 %v6381_v7  ;;  %v10137_v7 = vld [vmem:[#allocation12_spill] sm:$0xff] }
0x31ee   :  { %v7691_v55 = vpop.eup %7690 }
0x31ef   :  { %5212 = vrot.lane.b32.xlu1 %v7691_v55, %s7801_s1 }
0x31f0   :  { %v7693_v44 = vpop.eup %7692 }
0x31f1   :  { %v5206_v3 = vadd.f32 1.0, %v7693_v44  ;;  %v10138_v44 = vld [vmem:[#allocation13_spill] sm:$0xff] }
0x31f3   :  { %7694 = vrcp.f32 %v5206_v3  ;;  %v10139_v3 = vld [vmem:[#allocation14_spill] sm:$0xff] }
0x31fd   :  { %v7695_v10 = vpop.eup %7694 }
0x31fe   :  { %v5210_v52 = vmul.f32 %v7695_v10, %v10135_v47 }
0x3261   :  { %v5213_v13 = vpop.permute.xlu1 %5212 }
0x3262   :  { %v5215_v0 = vmul.f32 %v7695_v10, %v5213_v13 }
0x3264   :  { %5217 = vrot.lane.b32.xlu0 %v5215_v0, %s7802_s7  ;;  %v10141_v0 = vld [vmem:[#allocation29_spill] sm:$0xff] }
0x32d6   :  { %v5218_v59 = vpop.permute.xlu0 %5217 }
0x32d7   :  { %v9360_v19 = vadd.f32 %v5218_v59, %v5210_v52  ;;  %v9380_v59 = vld [vmem:[#allocation2 + $0x103] ss:$0 sm:$0xff] }
0x32d8   :  { %10142 = vst [vmem:[#allocation16_spill] sm:$0xff] %v9380_v59 }
0x32d9   :  { %10136 = vst [vmem:[#allocation23_spill] sm:$0xff] %v9360_v19  ;;  %7696 = vtanh.f32 %v9360_v19 }
0x32e3   :  { %v7697_v14 = vpop.eup %7696 }
0x32e4   :  { %5223 = vrot.lane.b32.xlu0 %v7697_v14, %s7801_s1 }
0x3356   :  { %v5224_v41 = vpop.permute.xlu0 %5223 }
0x3357   :  { %v5226_v23 = vmul.f32 %v7695_v10, %v5224_v41  ;;  %v10140_v10 = vld [vmem:[#allocation15_spill] sm:$0xff] }
0x3359   :  { %5298 = vrot.lane.b32.xlu0 %v5226_v23, %s7802_s7 }
0x33cb   :  { %v5299_v55 = vpop.permute.xlu0 %5298 }
0x33cc   :  { %7090 = vmatmul.mubr.msk.f32.vlgmr.msra.gmra.mrb[40].mxu1 %vm209_vm5, %v5299_v55 }
0x33cd   :  { %7420 = vmatpush3.bf16.msra.mxu1 %v10137_v7  ;;  %7111 = vmatprep.mubr.msk.f32.mxu1 %vm7799_vm4, %v10130_v61 }
0x33ce   :  { %7421 = vmatprep.subr.bf16.mxu1 %v10131_v1 }
0x33d1   :  { %7423 = vmatpush3.bf16.msra.mxu1 %v10138_v44 }
0x33d2   :  { %7430 = vmatprep.subr.bf16.mxu1 %v10131_v1 }
0x33d4   :  { %7112 = vmatmul.mubr.msk.f32.vlgmr.msra.gmra.mrb[42].mxu1 %vm209_vm5, %v5299_v55 }
0x33d5   :  { %7432 = vmatpush3.bf16.msra.mxu1 %v10139_v3  ;;  %7133 = vmatprep.mubr.msk.f32.mxu1 %vm7799_vm4, %v10130_v61 }
0x33d6   :  { %7433 = vmatprep.subr.bf16.mxu1 %v10131_v1 }
0x33d9   :  { %7435 = vmatpush3.bf16.msra.mxu1 %v10140_v10 }
0x33da   :  { %7442 = vmatprep.subr.bf16.mxu1 %v10131_v1 }
0x349f   :  { %v5368_v13 = vpop.f32.mrb[40].mxu1 }
0x34a0   :  { %v5369_v47 = vadd.f32 %v5368_v13, %v10141_v0  ;;  %v7091_v52 = vpop.f32.mrb[41].mxu1  ;;  %v10144_v0 = vld [vmem:[#allocation64_spill] sm:$0xff] }
0x34a2   :  { %v5372_v14 = vadd.f32 %v9380_v59, %v5369_v47 }
0x34a4   :  { %7698 = vtanh.f32 %v5372_v14  ;;  %v6384_v7 = vmul.f32 -1.442695, %v5372_v14  ;;  %v10146_v14 = vld [vmem:[#allocation71_spill] sm:$0xff] }
0x34a6   :  { %7700 = vpow2.f32 %v6384_v7 }
0x34a7   :  { %v9383_v41 = vpop.f32.mrb[42].mxu1 }
0x34a8   :  { %10143 = vst [vmem:[#allocation21_spill] sm:$0xff] %v9383_v41  ;;  %v7113_v23 = vpop.f32.mrb[43].mxu1 }
0x34ae   :  { %v7699_v55 = vpop.eup %7698 }
0x34af   :  { %5382 = vrot.lane.b32.xlu0 %v7699_v55, %s7801_s1  ;;  %v6177_v55 = vrot.slane %v10146_v14, 7 }
0x34b0   :  { %v7701_v44 = vpop.eup %7700 }
0x34b1   :  { %v5376_v3 = vadd.f32 1.0, %v7701_v44 }
0x34b3   :  { %7702 = vrcp.f32 %v5376_v3  ;;  %v10147_v3 = vld [vmem:[#allocation87_spill] sm:$0xff] }
0x34b4   :  { %v6187_v37 = vrot.slane %v10147_v3, 1 }
0x34bd   :  { %v7703_v10 = vpop.eup %7702 }
0x34be   :  { %v5380_v52 = vmul.f32 %v7703_v10, %v10144_v0  ;;  %v6193_v0 = vsel %vm75_vm6, %v6187_v37, %v10146_v14  ;;  %v10151_v37 = vld [vmem:[#allocation44_spill] sm:$0xff] }
0x3521   :  { %v5383_v19 = vpop.permute.xlu0 %5382 }
0x3522   :  { %v5385_v13 = vmul.f32 %v7703_v10, %v5383_v19 }
0x3524   :  { %5387 = vrot.lane.b32.xlu1 %v5385_v13, %s7802_s7  ;;  %v6184_v13 = vsel %vm75_vm6, %v10147_v3, %v6177_v55  ;;  %v10153_v55 = vld [vmem:[#allocation17_spill] sm:$0xff] }
0x3596   :  { %v5388_v47 = vpop.permute.xlu1 %5387 }
0x3597   :  { %v9388_v59 = vadd.f32 %v5388_v47, %v5380_v52 }
0x3599   :  { %10145 = vst [vmem:[#allocation88_spill] sm:$0xff] %v9388_v59  ;;  %7704 = vtanh.f32 %v9388_v59  ;;  %v10156_v59 = vld [vmem:[#allocation19_spill] sm:$0xff] }
0x35a3   :  { %v7705_v23 = vpop.eup %7704 }
0x35a4   :  { %5393 = vrot.lane.b32.xlu0 %v7705_v23, %s7801_s1 }
0x3616   :  { %v5394_v7 = vpop.permute.xlu0 %5393 }
0x3617   :  { %v5396_v44 = vmul.f32 %v7703_v10, %v5394_v7  ;;  %v10150_v10 = vld [vmem:[#allocation48_spill] sm:$0xff] }
0x3619   :  { %v6179_v41 = vrot.slane %v5396_v44, 6  ;;  %v6189_v19 = vrot.slane %v5396_v44, 7  ;;  %5398 = vrot.lane.b32.xlu1 %v5396_v44, %s7802_s7 }
0x361b   :  { %v9400_v52 = vsel %vm2507_vm7, %v6193_v0, %v6189_v19  ;;  %v9403_v47 = vsel %vm2507_vm7, %v6184_v13, %v6179_v41 }
0x361c   :  { %10148 = vst [vmem:[#allocation86_spill] sm:$0xff] %v9400_v52  ;;  %10149 = vst [vmem:[#allocation9_spill] sm:$0xff] %v9403_v47  ;;  %v10155_v52 = vld [vmem:[#allocation20_spill] sm:$0xff] }
0x368b   :  { %v5399_v23 = vpop.permute.xlu1 %5398 }
0x368c   :  { %7101 = vmatmul.mubr.msk.f32.vlgmr.msra.gmra.mrb[42].mxu0 %vm209_vm5, %v5399_v23  ;;  %7134 = vmatmul.mubr.msk.f32.vlgmr.msra.gmra.mrb[44].mxu1 %vm209_vm5, %v5399_v23  ;;  %v10154_v23 = vld [vmem:[#allocation18_spill] sm:$0xff] }
0x368d   :  { %7426 = vmatpush3.bf16.msra.mxu0 %v10150_v10  ;;  %7122 = vmatprep.mubr.msk.f32.mxu0 %vm7799_vm4, %v10130_v61 }
0x368e   :  { %7427 = vmatprep.subr.bf16.mxu0 %v10131_v1  ;;  %7155 = vmatprep.mubr.msk.f32.mxu1 %vm7799_vm4, %v10130_v61 }
0x3691   :  { %7429 = vmatpush3.bf16.msra.mxu0 %v10151_v37 }
0x3692   :  { %7436 = vmatprep.subr.bf16.mxu0 %v10131_v1  ;;  %v10157_v1 = vld [vmem:[#allocation30_spill] sm:$0xff] }
0x375f   :  { %v5468_v41 = vpop.f32.mrb[42].mxu0  ;;  %v9415_v14 = vpop.f32.mrb[44].mxu1 }
0x3760   :  { %10152 = vst [vmem:[#allocation10_spill] sm:$0xff] %v9415_v14  ;;  %v5479_v7 = vrot.slane %v5468_v41, %v10153_v55  ;;  %v7102_v44 = vpop.f32.mrb[43].mxu0  ;;  %v7135_v3 = vpop.f32.mrb[45].mxu1 }
0x3762   :  { %v5480_v19 = vcombine.high %v5479_v7, %v5479_v7  ;;  %v5487_v13 = vrot.slane %v5479_v7, %v10153_v55 }
0x3764   :  { %v5494_v0 = vrot.slane %v5480_v19, %v10153_v55  ;;  %v5498_v10 = vrot.slane %v5487_v13, %v10154_v23 }
0x3766   :  { %v5502_v47 = vrot.slane %v5494_v0, %v10154_v23  ;;  %v5505_v37 = vadd.f32 %v5498_v10, %v10155_v52  ;;  %v10158_v10 = vld [vmem:[#allocation24_spill] sm:$0xff] }
0x3768   :  { %v5506_v2 = vadd.f32 %v10156_v59, %v5502_v47  ;;  %7706 = vtanh.f32 %v5505_v37 }
0x376a   :  { %7708 = vtanh.f32 %v5506_v2 }
0x3772   :  { %v7707_v14 = vpop.eup %7706 }
0x3773   :  { %v5509_v41 = vmul.f32 %v10157_v1, %v7707_v14 }
0x3774   :  { %v7709_v44 = vpop.eup %7708 }
0x3775   :  { %v5511_v3 = vsel %vm209_vm5, %v5509_v41, 0.0  ;;  %v5510_v7 = vmul.f32 %v10157_v1, %v7709_v44 }
0x3776   :  { %5512 = vadd.xlane.f32.xlu0 %v5511_v3 }
0x3777   :  { %v5514_v55 = vsel %vm209_vm5, %v5510_v7, 0.0 }
0x3778   :  { %5515 = vadd.xlane.f32.xlu1 %v5514_v55 }
0x3803   :  { %v5513_v19 = vpop.xlane.xlu0 %5512 }
0x3804   :  { %v5522_v52 = vrot.slane %v5513_v19, %v10127_v22 }
0x3805   :  { %v5516_v13 = vpop.xlane.xlu1 %5515 }
0x3806   :  { %v5526_v59 = vrot.slane %v5516_v13, %v10127_v22 }
0x3808   :  { %v5527_v2 = vsel %vm2787_vm13, %v5526_v59, %v5522_v52 }
0x3809   :  { %v5529_v47 = vsel %vm2790_vm14, %v5527_v2, -inf }
0x380a   :  { %5530 = vmax.xlane.f32.xlu0 %v5529_v47 }
0x3897   :  { %v5531_v14 = vpop.xlane.xlu0 %5530 }
0x3898   :  { %v5536_v0 = vrot.slane %v5531_v14, %v10154_v23  ;;  %v5540_v1 = vrot.slane %v5531_v14, %v10158_v10 }
0x389a   :  { %v5543_v37 = vsub.f32 %v5513_v19, %v5536_v0  ;;  %v5544_v41 = vsub.f32 %v5516_v13, %v5540_v1 }
0x389c   :  { %v5545_v44 = vmul.f32 1.442695, %v5543_v37  ;;  %v5547_v3 = vmul.f32 1.442695, %v5544_v41 }
0x389e   :  { %7710 = vpow2.f32 %v5545_v44 }
0x389f   :  { %7712 = vpow2.f32 %v5547_v3  ;;  %v10159_v3 = vld [vmem:[#allocation74_spill] sm:$0xff] }
0x38a8   :  { %v7711_v7 = vpop.eup %7710 }
0x38a9   :  { %v7713_v55 = vpop.eup %7712  ;;  %5552 = vperm.xlu0 %7482, %v7711_v7  }
0x38aa   :  { %5555 = vperm.xlu1 %7483, %v7713_v55  }
0x3928   :  { %v5553_v61 = vpop.permute.xlu0 %5552 }
0x3929   :  { %v5556_v52 = vpop.permute.xlu1 %5555  ;;  %v5560_v59 = vrot.slane %v5553_v61, %v10127_v22 }
0x392a   :  { %v5564_v2 = vrot.slane %v5556_v52, %v10127_v22  ;;  %v10163_v22 = vld [vmem:[#allocation31_spill] sm:$0xff] }
0x392c   :  { %v5565_v47 = vsel %vm2787_vm13, %v5564_v2, %v5560_v59  ;;  %v10160_v59 = vld [vmem:[#allocation77_spill] sm:$0xff] }
0x392d   :  { %v5567_v14 = vsel %vm2790_vm14, %v5565_v47, 0.0 }
0x392e   :  { %5568 = vadd.xlane.f32.xlu1 %v5567_v14 }
0x39bb   :  { %v5569_v19 = vpop.xlane.xlu1 %5568 }
0x39bc   :  { %v5574_v13 = vrot.slane %v5569_v19, %v10154_v23  ;;  %v5578_v0 = vrot.slane %v5569_v19, %v10158_v10  ;;  %v10161_v19 = vld [vmem:[#allocation32_spill] sm:$0xff] }
0x39be   :  { %7714 = vrcp.f32 %v5574_v13  ;;  %v10162_v13 = vld [vmem:[#allocation38_spill] sm:$0xff] }
0x39bf   :  { %7716 = vrcp.f32 %v5578_v0 }
0x39c8   :  { %v7715_v1 = vpop.eup %7714 }
0x39c9   :  { %v5582_v37 = vmul.f32 %v7715_v1, %v7711_v7  ;;  %v7717_v41 = vpop.eup %7716 }
0x39ca   :  { %v5584_v14 = vmul.f32 %v7717_v41, %v7713_v55  ;;  %v10165_v55 = vld [vmem:[#allocation40_spill] sm:$0xff] }
0x39cb   :  { %v9441_v44 = vrot.slane %v5582_v37, %v10154_v23  ;;  %v9444_v61 = vrot.slane %v5582_v37, %v10158_v10  ;;  %v9447_v52 = vrot.slane %v5582_v37, %v10159_v3  ;;  %v9450_v2 = vrot.slane %v5582_v37, %v10160_v59 }
0x39cc   :  { %v9453_v47 = vrot.slane %v5582_v37, %v10084_v21  ;;  %v9460_v1 = vrot.slane %v5582_v37, %v10087_v43  ;;  %v9463_v34 = vrot.slane %v5582_v37, %v8561_v32  ;;  %v9476_v53 = vrot.slane %v5582_v37, %v10017_v35 }
0x39cd   :  { %v5593_v7 = vmul.f32 %v9441_v44, %v10161_v19  ;;  %v5609_v0 = vmul.f32 %v9444_v61, %v10162_v13  ;;  %v5633_v63 = vmul.f32 %v9447_v52, %v10163_v22  ;;  %v5594_v25 = vmul.f32 %v9441_v44, %v10164_v46  ;;  %v10166_v19 = vld [vmem:[#allocation39_spill] sm:$0xff]  ;;  %v10167_v13 = vld [vmem:[#allocation50_spill] sm:$0xff]  ;;  %v10169_v46 = vld [vmem:[#allocation56_spill] sm:$0xff] }
0x39ce   :  { %v5610_v41 = vmul.f32 %v9444_v61, %v10165_v55  ;;  %v5657_v9 = vmul.f32 %v9450_v2, %v10166_v19  ;;  %v5681_v29 = vmul.f32 %v9453_v47, %v10167_v13  ;;  %v9481_v51 = vrot.slane %v5584_v14, %v10154_v23  ;;  %v10172_v13 = vld [vmem:[#allocation36_spill] sm:$0xff] }
0x39cf   :  { %v5617_v40 = vadd.f32 %v5609_v0, %v5593_v7  ;;  %v10168_v0 = vld [vmem:[#allocation46_spill] sm:$0xff]  ;;  %v5705_v55 = vmul.f32 %v9460_v1, %v10169_v46  ;;  %v5729_v19 = vmul.f32 %v9463_v34, %v10170_v17  ;;  %v9488_v50 = vrot.slane %v5584_v14, %v10158_v10 }
0x39d0   :  { %v5618_v7 = vadd.f32 %v5610_v41, %v5594_v25  ;;  %v5634_v22 = vmul.f32 %v9447_v52, %v10168_v0  ;;  %v9491_v37 = vrot.slane %v5584_v14, %v10159_v3  ;;  %v5597_v23 = vmul.f32 %v9481_v51, %v10172_v13  ;;  %v10173_v0 = vld [vmem:[#allocation76_spill] sm:$0xff]  ;;  %v10176_v13 = vld [vmem:[#allocation33_spill] sm:$0xff] }
0x39d1   :  { %v5641_v54 = vadd.f32 %v5633_v63, %v5617_v40  ;;  %v10171_v40 = vld [vmem:[#allocation51_spill] sm:$0xff]  ;;  %v5753_v46 = vmul.f32 %v9476_v53, %v10173_v0  ;;  %v5682_v17 = vmul.f32 %v9453_v47, %v10174_v39  ;;  %v5613_v10 = vmul.f32 %v9488_v50, %v10175_v4 }
0x39d2   :  { %v5642_v25 = vadd.f32 %v5634_v22, %v5618_v7  ;;  %v5658_v41 = vmul.f32 %v9450_v2, %v10171_v40  ;;  %v9504_v3 = vrot.slane %v5584_v14, %v10160_v59  ;;  %v9507_v7 = vrot.slane %v5584_v14, %v10084_v21 }
0x39d3   :  { %v5665_v63 = vadd.f32 %v5657_v9, %v5641_v54  ;;  %v9510_v22 = vrot.slane %v5584_v14, %v10087_v43  ;;  %v5621_v40 = vadd.f32 %v5613_v10, %v5597_v23  ;;  %v5637_v0 = vmul.f32 %v9491_v37, %v10176_v13  ;;  %v10180_v13 = vld [vmem:[#allocation83_spill] sm:$0xff] }
0x39d4   :  { %v5666_v9 = vadd.f32 %v5658_v41, %v5642_v25  ;;  %v5598_v39 = vmul.f32 %v9481_v51, %v10177_v15  ;;  %v5614_v4 = vmul.f32 %v9488_v50, %v8456_v8  ;;  %v5730_v21 = vmul.f32 %v9463_v34, %v10028_v36 }
0x39d5   :  { %v5689_v54 = vadd.f32 %v5681_v29, %v5665_v63  ;;  %v5706_v29 = vmul.f32 %v9460_v1, %v10027_v5  ;;  %v5645_v43 = vadd.f32 %v5637_v0, %v5621_v40  ;;  %v5661_v63 = vmul.f32 %v9504_v3, %v8446_v12  ;;  %v10179_v40 = vld [vmem:[#allocation58_spill] sm:$0xff] }
0x39d6   :  { %v5690_v38 = vadd.f32 %v5682_v17, %v5666_v9  ;;  %v5622_v25 = vadd.f32 %v5614_v4, %v5598_v39  ;;  %v5638_v41 = vmul.f32 %v9491_v37, %v8468_v62  ;;  %v5685_v8 = vmul.f32 %v9507_v7, %v8480_v28 }
0x39d7   :  { %v5713_v59 = vadd.f32 %v5705_v55, %v5689_v54  ;;  %v9529_v55 = vrot.slane %v5584_v14, %v8561_v32  ;;  %v5669_v5 = vadd.f32 %v5661_v63, %v5645_v43  ;;  %v5709_v36 = vmul.f32 %v9510_v22, %v8496_v45 }
0x39d8   :  { %v5714_v23 = vadd.f32 %v5706_v29, %v5690_v38  ;;  %v5646_v17 = vadd.f32 %v5638_v41, %v5622_v25  ;;  %v5662_v12 = vmul.f32 %v9504_v3, %v8482_v24  ;;  %v5595_v62 = vmul.f32 %v9441_v44, %v8414_v33  ;;  %v10178_v38 = vld [vmem:[#allocation28_spill] sm:$0xff]  ;;  %v10182_v29 = vld [vmem:[#allocation66_spill] sm:$0xff]  ;;  %v10184_v25 = vld [vmem:[#allocation43_spill] sm:$0xff] }
0x39d9   :  { %v5737_v15 = vadd.f32 %v5729_v19, %v5713_v59  ;;  %v5611_v19 = vmul.f32 %v9444_v61, %v10178_v38  ;;  %v5693_v28 = vadd.f32 %v5685_v8, %v5669_v5  ;;  %v9540_v32 = vrot.slane %v5584_v14, %v10017_v35  ;;  %v10183_v14 = vld [vmem:[#allocation42_spill] sm:$0xff]  ;;  %v10185_v8 = vld [vmem:[#allocation81_spill] sm:$0xff]  ;;  %v10186_v38 = vld [vmem:[#allocation59_spill] sm:$0xff] }
0x39da   :  { %v5738_v54 = vadd.f32 %v5730_v21, %v5714_v23  ;;  %v5670_v9 = vadd.f32 %v5662_v12, %v5646_v17  ;;  %v5686_v45 = vmul.f32 %v9507_v7, %v10179_v40  ;;  %v5754_v24 = vmul.f32 %v9476_v53, %v10180_v13 }
0x39db   :  { %v5761_v10 = vadd.f32 %v5753_v46, %v5737_v15  ;;  %v10181_v46 = vld [vmem:[#allocation65_spill] sm:$0xff]  ;;  %v5619_v39 = vadd.f32 %v5611_v19, %v5595_v62  ;;  %v5635_v33 = vmul.f32 %v9447_v52, %v10104_v48  ;;  %v5717_v4 = vadd.f32 %v5709_v36, %v5693_v28 }
0x39dc   :  { %v5733_v0 = vmul.f32 %v9529_v55, %v10181_v46  ;;  %v5694_v59 = vadd.f32 %v5686_v45, %v5670_v9  ;;  %v5710_v35 = vmul.f32 %v9510_v22, %v10182_v29  ;;  %v5659_v21 = vmul.f32 %v9450_v2, %v10183_v14  ;;  %v10187_v19 = vld [vmem:[#allocation53_spill] sm:$0xff] }
0x39dd   :  { %5848 = vperm.xlu0 %7482, %v5761_v10   ;;  %v5762_v43 = vadd.f32 %v5754_v24, %v5738_v54  ;;  %v5643_v63 = vadd.f32 %v5635_v33, %v5619_v39  ;;  %v5599_v41 = vmul.f32 %v9481_v51, %v10184_v25  ;;  %v5615_v15 = vmul.f32 %v9488_v50, %v8460_v11 }
0x39de   :  { %v5741_v23 = vadd.f32 %v5733_v0, %v5717_v4  ;;  %v5757_v48 = vmul.f32 %v9540_v32, %v10185_v8  ;;  %v5718_v5 = vadd.f32 %v5710_v35, %v5694_v59  ;;  %v5734_v36 = vmul.f32 %v9529_v55, %v10107_v16  ;;  %v10189_v35 = vld [vmem:[#allocation75_spill] sm:$0xff] }
0x39df   :  { %v5667_v17 = vadd.f32 %v5659_v21, %v5643_v63  ;;  %v5683_v12 = vmul.f32 %v9453_v47, %v10108_v60  ;;  %v5623_v10 = vadd.f32 %v5615_v15, %v5599_v41  ;;  %v5639_v54 = vmul.f32 %v9491_v37, %v10109_v56  ;;  %v10191_v21 = vld [vmem:[#allocation55_spill] sm:$0xff]  ;;  %v10192_v63 = vld [vmem:[#allocation61_spill] sm:$0xff]  ;;  %v10193_v41 = vld [vmem:[#allocation62_spill] sm:$0xff] }
0x39e0   :  { %v5742_v62 = vadd.f32 %v5734_v36, %v5718_v5  ;;  %v5707_v11 = vmul.f32 %v9460_v1, %v10186_v38  ;;  %v5663_v28 = vmul.f32 %v9504_v3, %v10187_v19  ;;  %v5596_v9 = vmul.f32 %v9441_v44, %v10034_v49 }
0x39e1   :  { %5851 = vperm.xlu0 %7482, %v5762_v43   ;;  %v5765_v16 = vadd.f32 %v5757_v48, %v5741_v23  ;;  %v5691_v40 = vadd.f32 %v5683_v12, %v5667_v17  ;;  %v5647_v45 = vadd.f32 %v5639_v54, %v5623_v10  ;;  %v5612_v60 = vmul.f32 %v9444_v61, %v10035_v57  ;;  %v10194_v23 = vld [vmem:[#allocation67_spill] sm:$0xff] }
0x39e2   :  { %v5758_v13 = vmul.f32 %v9540_v32, %v10036_v20  ;;  %v5731_v56 = vmul.f32 %v9463_v34, %v9954_v26  ;;  %v5687_v24 = vmul.f32 %v9507_v7, %v9957_v58  ;;  %v5636_v49 = vmul.f32 %v9447_v52, %v9955_v6  ;;  %v10188_v52 = vld [vmem:[#allocation49_spill] sm:$0xff] }
0x39e3   :  { %v5715_v46 = vadd.f32 %v5707_v11, %v5691_v40  ;;  %v5671_v0 = vadd.f32 %v5663_v28, %v5647_v45  ;;  %v5620_v39 = vadd.f32 %v5612_v60, %v5596_v9  ;;  %v5711_v57 = vmul.f32 %v9510_v22, %v9961_v31  ;;  %v10199_v28 = vld [vmem:[#allocation60_spill] sm:$0xff] }
0x39e4   :  { %v5766_v44 = vadd.f32 %v5758_v13, %v5742_v62  ;;  %v5600_v20 = vmul.f32 %v9481_v51, %v9959_v30  ;;  %v5616_v26 = vmul.f32 %v9488_v50, %v9960_v42  ;;  %v5660_v4 = vmul.f32 %v9450_v2, %v9958_v18  ;;  %v10190_v42 = vld [vmem:[#allocation54_spill] sm:$0xff] }
0x39e5   :  { %5860 = vperm.xlu0 %7482, %v5765_v16   ;;  %v5739_v61 = vadd.f32 %v5731_v56, %v5715_v46  ;;  %v5695_v33 = vadd.f32 %v5687_v24, %v5671_v0  ;;  %v5644_v58 = vadd.f32 %v5636_v49, %v5620_v39  ;;  %v5755_v59 = vmul.f32 %v9476_v53, %v10112_v27  ;;  %v10200_v24 = vld [vmem:[#allocation45_spill] sm:$0xff]  ;;  %v10202_v49 = vld [vmem:[#allocation26_spill] sm:$0xff] }
0x39e6   :  { %v5624_v6 = vadd.f32 %v5616_v26, %v5600_v20  ;;  %v5640_v29 = vmul.f32 %v9491_v37, %v10188_v52  ;;  %v5735_v30 = vmul.f32 %v9529_v55, %v10189_v35  ;;  %v5684_v50 = vmul.f32 %v9453_v47, %v10190_v42  ;;  %v10195_v47 = vld [vmem:[#allocation69_spill] sm:$0xff] }
0x39e7   :  { %v5719_v31 = vadd.f32 %v5711_v57, %v5695_v33  ;;  %v5668_v51 = vadd.f32 %v5660_v4, %v5644_v58  ;;  %v5664_v18 = vmul.f32 %v9504_v3, %v10191_v21  ;;  %v5763_v2 = vadd.f32 %v5755_v59, %v5739_v61  ;;  %v10196_v3 = vld [vmem:[#allocation70_spill] sm:$0xff]  ;;  %v10203_v57 = vld [vmem:[#allocation25_spill] sm:$0xff] }
0x39e8   :  { %v5648_v14 = vadd.f32 %v5640_v29, %v5624_v6  ;;  %v5708_v25 = vmul.f32 %v9460_v1, %v10192_v63  ;;  %v5688_v15 = vmul.f32 %v9507_v7, %v10193_v41  ;;  %v5759_v8 = vmul.f32 %v9540_v32, %v10194_v23  ;;  %v10197_v1 = vld [vmem:[#allocation37_spill] sm:$0xff]  ;;  %v10198_v7 = vld [vmem:[#allocation80_spill] sm:$0xff]  ;;  %v10210_v23 = vld [vmem:[#allocation23_spill] sm:$0xff] }
0x39e9   :  { %5863 = vperm.xlu0 %7482, %v5766_v44   ;;  %v5743_v43 = vadd.f32 %v5735_v30, %v5719_v31  ;;  %v5692_v27 = vadd.f32 %v5684_v50, %v5668_v51  ;;  %v5732_v5 = vmul.f32 %v9463_v34, %v10195_v47  ;;  %v5712_v17 = vmul.f32 %v9510_v22, %v10196_v3  ;;  %v10204_v31 = vld [vmem:[#allocation8_spill] sm:$0xff]  ;;  %v10207_v51 = vld [vmem:[#allocation85_spill] sm:$0xff] }
0x39ea   :  { %v5672_v37 = vadd.f32 %v5664_v18, %v5648_v14  ;;  %v5756_v62 = vmul.f32 %v9476_v53, %v10197_v1  ;;  %v5736_v38 = vmul.f32 %v9529_v55, %v10198_v7  ;;  %v5760_v34 = vmul.f32 %v9540_v32, %v10199_v28  ;;  %v10201_v55 = vld [vmem:[#allocation68_spill] sm:$0xff]  ;;  %v10208_v50 = vld [vmem:[#allocation21_spill] sm:$0xff] }
0x39eb   :  { %v5716_v48 = vadd.f32 %v5708_v25, %v5692_v27  ;;  %v5767_v12 = vadd.f32 %v5759_v8, %v5743_v43  ;;  %v10205_v35 = vmov 0.0   ;;  %v10206_v30 = vmov 0.0|0.0   ;;  %v10209_v18 = vld [vmem:[#allocation84_spill] sm:$0xff] }
0x39ec   :  { %v5696_v36 = vadd.f32 %v5688_v15, %v5672_v37 }
0x39ed   :  { %5854 = vperm.xlu0 %7482, %v5763_v2   ;;  %v5740_v10 = vadd.f32 %v5732_v5, %v5716_v48 }
0x39ee   :  { %v5720_v54 = vadd.f32 %v5712_v17, %v5696_v36 }
0x39ef   :  { %v5764_v11 = vadd.f32 %v5756_v62, %v5740_v10  ;;  %v10211_v10 = vld [vmem:[#allocation10_spill] sm:$0xff]  ;;  %v10212_v62 = vld [vmem:[#allocation16_spill] sm:$0xff] }
0x39f0   :  { %v5744_v19 = vadd.f32 %v5736_v38, %v5720_v54 }
0x39f1   :  { %5866 = vperm.xlu0 %7482, %v5767_v12  }
0x39f2   :  { %v5768_v9 = vadd.f32 %v5760_v34, %v5744_v19 }
0x39f5   :  { %5857 = vperm.xlu0 %7482, %v5764_v11  }
0x39f9   :  { %5869 = vperm.xlu0 %7482, %v5768_v9  }
0x3a5c   :  { %v5849_v16 = vpop.permute.xlu0 %5848 }
0x3a5d   :  { %v5874_v44 = vrot.slane %v5849_v16, %v10202_v49 }
0x3a60   :  { %v5852_v22 = vpop.permute.xlu0 %5851 }
0x3a61   :  { %v5878_v53 = vrot.slane %v5852_v22, %v10200_v24  ;;  %v7740_v22 = vld [vmem:[#allocation2 + $0x108] sm:$0xff] }
0x3a63   :  { %v5879_v61 = vsel %vm3526_vm15, %v5878_v53, %v5874_v44  ;;  %v7743_v44 = vld [vmem:[#allocation2 + $0x120] sm:$0xff] }
0x3a64   :  { %v5861_v40 = vpop.permute.xlu0 %5860 }
0x3a65   :  { %v5893_v32 = vrot.slane %v5861_v40, %v10202_v49  ;;  %v7741_v40 = vld [vmem:[#allocation2 + $0x110] sm:$0xff]  ;;  %v7742_v49 = vld [vmem:[#allocation2 + $0x118] sm:$0xff] }
0x3a68   :  { %v5864_v45 = vpop.permute.xlu0 %5863 }
0x3a69   :  { %v5897_v46 = vrot.slane %v5864_v45, %v10200_v24  ;;  %v7484_v45 = vpack.i.bf16 %v7741_v40, %v7740_v22 }
0x3a6b   :  { %v5898_v33 = vsel %vm3526_vm15, %v5897_v46, %v5893_v32  ;;  %v7489_v32 = vpack.i.bf16 %v7743_v44, %v7742_v49 }
0x3a6c   :  { %v5855_v60 = vpop.permute.xlu0 %5854 }
0x3a6d   :  { %v5883_v0 = vrot.slane %v5855_v60, %v10201_v55  ;;  %v10213_v60 = vld [vmem:[#allocation88_spill] sm:$0xff] }
0x3a6f   :  { %v5884_v4 = vsel %vm3533_vm0, %v5883_v0, %v5879_v61 }
0x3a70   :  { %v5867_v13 = vpop.permute.xlu0 %5866 }
0x3a71   :  { %v5902_v39 = vrot.slane %v5867_v13, %v10201_v55 }
0x3a73   :  { %v5903_v59 = vsel %vm3533_vm0, %v5902_v39, %v5898_v33 }
0x3a74   :  { %v5858_v56 = vpop.permute.xlu0 %5857 }
0x3a75   :  { %v5888_v20 = vrot.slane %v5858_v56, %v10203_v57 }
0x3a77   :  { %v5889_v6 = vsel %vm3540_vm1, %v5888_v20, %v5884_v4  ;;  %v10214_v4 = vld [vmem:[#allocation86_spill] sm:$0xff] }
0x3a78   :  { %v5870_v26 = vpop.permute.xlu0 %5869 }
0x3a79   :  { %v5907_v58 = vrot.slane %v5870_v26, %v10203_v57  ;;  %v7744_v57 = vld [vmem:[#allocation2 + $0x128] ss:$0 sm:$0xff] }
0x3a7b   :  { %v5908_v52 = vsel %vm3540_vm1, %v5907_v58, %v5903_v59 }
0x3a7c   :  { %v5909_v29 = vsel %vm2787_vm13, %v5908_v52, %v5889_v6 }
0x3a7d   :  { %7123 = vmatmul.mubr.msk.f32.vlgmr.msra.gmra.mrb[44].mxu0 %vm209_vm5, %v5909_v29 }
0x3a7e   :  { %7438 = vmatpush3.bf16.msra.mxu0 %v10204_v31  ;;  %7144 = vmatprep.mubr.msk.f32.mxu0 %vm7799_vm4, %v10205_v35  ;;  %v10215_v31 = vld [vmem:[#allocation9_spill] sm:$0xff] }
0x3a7f   :  { %7439 = vmatprep.subr.bf16.mxu0 %v10206_v30 }
0x3a82   :  { %7441 = vmatpush3.bf16.msra.mxu0 %v10207_v51 }
0x3b50   :  { %v5978_v42 = vpop.f32.mrb[44].mxu0 }
0x3b51   :  { %v5979_v14 = vadd.f32 %v5978_v42, %v10208_v50  ;;  %v7124_v21 = vpop.f32.mrb[45].mxu0 }
0x3b53   :  { %v5982_v2 = vadd.f32 %v10209_v18, %v5979_v14 }
0x3b55   :  { %7718 = vtanh.f32 %v5982_v2  ;;  %v6388_v27 = vmul.f32 -1.442695, %v5982_v2 }
0x3b57   :  { %7720 = vpow2.f32 %v6388_v27 }
0x3b5f   :  { %v7719_v43 = vpop.eup %7718 }
0x3b60   :  { %5992 = vrot.lane.b32.xlu0 %v7719_v43, %s7801_s1 }
0x3b61   :  { %v7721_v63 = vpop.eup %7720 }
0x3b62   :  { %v5986_v25 = vadd.f32 1.0, %v7721_v63 }
0x3b64   :  { %7722 = vrcp.f32 %v5986_v25 }
0x3b6e   :  { %v7723_v37 = vpop.eup %7722 }
0x3b6f   :  { %v5990_v8 = vmul.f32 %v7723_v37, %v10210_v23 }
0x3bd2   :  { %v5993_v41 = vpop.permute.xlu0 %5992 }
0x3bd3   :  { %v5995_v15 = vmul.f32 %v7723_v37, %v5993_v41 }
0x3bd5   :  { %5997 = vrot.lane.b32.xlu1 %v5995_v15, %s7802_s7 }
0x3c47   :  { %v5998_v48 = vpop.permute.xlu1 %5997 }
0x3c48   :  { %v6000_v47 = vadd.f32 %v5998_v48, %v5990_v8 }
0x3c4a   :  { %7724 = vtanh.f32 %v6000_v47 }
0x3c54   :  { %v7725_v5 = vpop.eup %7724 }
0x3c55   :  { %6003 = vrot.lane.b32.xlu0 %v7725_v5, %s7801_s1 }
0x3cc7   :  { %v6004_v36 = vpop.permute.xlu0 %6003 }
0x3cc8   :  { %v6006_v3 = vmul.f32 %v7723_v37, %v6004_v36 }
0x3cca   :  { %6078 = vrot.lane.b32.xlu0 %v6006_v3, %s7802_s7 }
0x3d3c   :  { %v6079_v17 = vpop.permute.xlu0 %6078 }
0x3d3d   :  { %7145 = vmatmul.mubr.msk.f32.vlgmr.msra.gmra.mrb[46].mxu0 %vm209_vm5, %v6079_v17 }
0x3e10   :  { %v6148_v12 = vpop.f32.mrb[46].mxu0 }
0x3e11   :  { %v6149_v54 = vadd.f32 %v6148_v12, %v10211_v10  ;;  %v7146_v1 = vpop.f32.mrb[47].mxu0 }
0x3e13   :  { %v6152_v7 = vadd.f32 %v10212_v62, %v6149_v54 }
0x3e15   :  { %7726 = vtanh.f32 %v6152_v7  ;;  %v6391_v11 = vmul.f32 -1.442695, %v6152_v7 }
0x3e17   :  { %7728 = vpow2.f32 %v6391_v11 }
0x3e1f   :  { %v7727_v38 = vpop.eup %7726 }
0x3e20   :  { %6162 = vrot.lane.b32.xlu0 %v7727_v38, %s7801_s1 }
0x3e21   :  { %v7729_v19 = vpop.eup %7728 }
0x3e22   :  { %v6156_v28 = vadd.f32 1.0, %v7729_v19 }
0x3e24   :  { %7730 = vrcp.f32 %v6156_v28 }
0x3e2e   :  { %v7731_v34 = vpop.eup %7730 }
0x3e2f   :  { %v6160_v13 = vmul.f32 %v7731_v34, %v10213_v60 }
0x3e92   :  { %v6163_v9 = vpop.permute.xlu0 %6162 }
0x3e93   :  { %v6165_v16 = vmul.f32 %v7731_v34, %v6163_v9 }
0x3e95   :  { %6167 = vrot.lane.b32.xlu0 %v6165_v16, %s7802_s7 }
0x3e99   :  { %7485 = vrot.lane.b32.xlu0 %v7484_v45, %s7802_s7 }
0x3f07   :  { %v6168_v56 = vpop.permute.xlu0 %6167 }
0x3f08   :  { %v6170_v24 = vadd.f32 %v6168_v56, %v6160_v13 }
0x3f0a   :  { %7732 = vtanh.f32 %v6170_v24 }
0x3f0b   :  { %v7486_v53 = vpop.permute.xlu0 %7485 }
0x3f0c   :  { %v7488_v46 = vunpack.i.h.bf16 %v7486_v53  ;;  %v7487_v55 = vunpack.i.l.bf16 %v7486_v53 }
0x3f0e   :  { %v7443_v0 = vpack.c.bf16 %v7488_v46, %v7487_v55 }
0x3f10   :  { %7444 = vmatpush3.bf16.msra.mxu1 %v7443_v0 }
0x3f11   :  { %7445 = vmatprep.subr.bf16.mxu1 %v10206_v30 }
0x3f14   :  { %v7733_v39 = vpop.eup %7732 }
0x3f15   :  { %6173 = vrot.lane.b32.xlu1 %v7733_v39, %s7801_s1 }
0x3f19   :  { %7490 = vrot.lane.b32.xlu1 %v7489_v32, %s7802_s7 }
0x3f1d   :  { %6216 = vrot.lane.b32.xlu1 %v7744_v57, %s7803_s8 }
0x3f87   :  { %v6174_v20 = vpop.permute.xlu1 %6173 }
0x3f88   :  { %v6176_v26 = vmul.f32 %v7731_v34, %v6174_v20 }
0x3f8a   :  { %v6182_v61 = vrot.slane %v6176_v26, 5  ;;  %v6191_v33 = vrot.slane %v6176_v26, 6 }
0x3f8b   :  { %v7491_v58 = vpop.permute.xlu1 %7490 }
0x3f8c   :  { %v6195_v59 = vsel %vm2509_vm8, %v10214_v4, %v6191_v33  ;;  %v7493_v6 = vunpack.i.h.bf16 %v7491_v58  ;;  %v7492_v52 = vunpack.i.l.bf16 %v7491_v58  ;;  %v6186_v35 = vsel %vm2509_vm8, %v10215_v31, %v6182_v61 }
0x3f8d   :  { %v6197_v29 = vrot.slane %v6195_v59, 4 }
0x3f8e   :  { %v7446_v30 = vpack.c.bf16 %v7493_v6, %v7492_v52 }
0x3f8f   :  { %v6199_v51 = vsel %vm2511_vm9, %v6186_v35, %v6197_v29  ;;  %v6217_v50 = vpop.permute.xlu1 %6216 }
0x3f90   :  { %6201 = vrot.lane.b32.xlu0 %v6199_v51, %s7802_s7  ;;  %7447 = vmatpush3.bf16.msra.mxu1 %v7446_v30 }
0x4002   :  { %v6202_v42 = vpop.permute.xlu0 %6201 }
0x4003   :  { %7156 = vmatmul.mubr.msk.f32.vlgmr.msra.gmra.mrb[46].mxu1 %vm209_vm5, %v6202_v42 }
0x40d6   :  { %v6287_v14 = vpop.f32.mrb[46].mxu1 }
0x40d7   :  { %v6288_v21 = vadd.f32 %v6287_v14, %v6217_v50  ;;  %v7157_v18 = vpop.f32.mrb[47].mxu1 }
0x40d9   :  { %6292 = vst.msk [vmem:[#allocation5] sm:$0xf] %vm6291_vm2, %v6288_v21 }
0x40da   :  { %6295 = vst.msk [vmem:[#allocation5] sm:$0xf0] %vm6294_vm3, %v6288_v21 }
0x40db   :  { %7778 = shalt.err (!%p7775_p12)
}
0x40dc   :  { %s7779_s14 = scalar_lea.hbm %s9680_s3, 128 }
0x40dd   :  { %p7780_p13 = scmp.ne.s32.totalorder %s9680_s3, %s7779_s14  ;;  %p7783_p0 = scmp.lt.u32.totalorder %s7779_s14, %s9680_s3 }
0x40df   :  { %p7785_p1 = pnand %p7783_p0, %p7780_p13 }
0x40e1   :  { %7788 = shalt.err (!%p7785_p1)
}
0x40e2   :  { %6307 = dma.vmem_to_hbm [thread:$0]  %s6302_s10, 128, %s9680_s3, [#allocation4], %s7801_s1, %s7801_s1, %s7796_s30  }
0x40e3   :  { %7791 = dma.done.wait [#allocation4], 128  }
0x40e4   :  { %7792 = vsyncadd [#allocation4], 4294967168 }
0x40e5   :  { %6311 = vsyncpa [#allocation3], 1 }
0x40e6   :  { %6312 = vsyncpa [#allocation4], 1 }

</bundles_post_ra>
